<compile_context>
chip_gen: v7x
topology: tpu7x:2x2x1
jax: 0.10.0
libtpu: 0.0.40
codegen_flags: <defaults>
</compile_context>

<pallas_src>
from functools import partial

import jax
import jax.numpy as jnp
from jax.experimental import pallas as pl
from jax.experimental.pallas import tpu as pltpu

EPS = 1e-5  # PyTorch nn.LayerNorm default


# ------------------------------- kernel --------------------------------------

def _encoder_stack_kernel(
    x_ref,
    wqkv_ref, bqkv_ref, wo_ref, bo_ref, ln1_g_ref, ln1_b_ref,
    w1_ref, b1_ref, w2_ref, b2_ref, ln2_g_ref, ln2_b_ref,
    lnf_g_ref, lnf_b_ref,
    o_ref,
    qkv_scr, ctx_scr,
    *, n_layers, n_heads, seq_len, block_batch, scale, approx_recip):
  """All encoder layers + final LayerNorm for one batch tile of Bt*L token rows."""
  L, Bt = seq_len, block_batch
  _, D = x_ref.shape                       # block rows = Bt*L, D = d_model
  dh = D // n_heads
  f32 = jnp.float32
  mxu = jnp.bfloat16                       # MXU operand dtype (accumulate in f32)

  # Activations stay resident across the whole stack; the only HBM traffic per
  # grid step is the x tile in, the (once-fetched) weights, and the output tile.
  x = x_ref[...].astype(f32)               # (Bt*L, D)

  for l in range(n_layers):
    # ---- fused QKV projection: ONE MXU pass, M = Bt*L, K = D, N = 3D ----
    qkv = jnp.dot(x.astype(mxu), wqkv_ref[l],
                  preferred_element_type=f32) + bqkv_ref[l]          # (Bt*L, 3D)
    qkv_scr[...] = qkv                     # park in VMEM: head slices below are
                                           # vector loads, not vreg relayouts

    # ---- multi-head self-attention, per (batch element, head) ----
    # Each head's context goes straight into a lane-contiguous scratch so the
    # output projection is ONE K=D matmul (no per-head Wo slices / adds).
    for b in range(Bt):
      r0 = b * L
      for h in range(n_heads):
        c0 = h * dh
        q = qkv_scr[r0:r0 + L, c0:c0 + dh].astype(mxu)               # (L, dh)
        k = qkv_scr[r0:r0 + L, D + c0:D + c0 + dh].astype(mxu)
        v = qkv_scr[r0:r0 + L, 2 * D + c0:2 * D + c0 + dh].astype(mxu)
        # contraction on dim 1 of both operands: no materialized k.T
        s = jax.lax.dot_general(q, k, (((1,), (1,)), ((), ())),
                                preferred_element_type=f32) * scale  # (L, L)
        s = s - jnp.max(s, axis=-1, keepdims=True)
        p = jnp.exp(s)
        denom = jnp.sum(p, axis=-1, keepdims=True)
        if approx_recip:
          # EUP slot (essentially free); ~1e-3 relative error per softmax row.
          p = p * pl.reciprocal(denom, approx=True)
        else:
          p = p / denom
        oh = jnp.dot(p.astype(mxu), v, preferred_element_type=f32)    # (L, dh)
        ctx_scr[r0:r0 + L, c0:c0 + dh] = oh

    # ---- output projection: single (Bt*L, D) @ (D, D) matmul ----
    attn = jnp.dot(ctx_scr[...].astype(mxu), wo_ref[l],
                   preferred_element_type=f32) + bo_ref[l]            # (Bt*L, D)

    # ---- residual + LayerNorm 1 (f32 epilogue) ----
    y1 = x + attn
    mu1 = jnp.mean(y1, axis=-1, keepdims=True)
    var1 = jnp.mean(jnp.square(y1 - mu1), axis=-1, keepdims=True)
    x1 = (y1 - mu1) * jax.lax.rsqrt(var1 + EPS) * ln1_g_ref[l] + ln1_b_ref[l]

    # ---- position-wise FFN (1x1 Conv1d == linear), ReLU ----
    h1 = jnp.dot(x1.astype(mxu), w1_ref[l],
                 preferred_element_type=f32) + b1_ref[l]
    h1 = jnp.maximum(h1, 0.0)
    ffn = jnp.dot(h1.astype(mxu), w2_ref[l],
                  preferred_element_type=f32) + b2_ref[l]

    # ---- residual + LayerNorm 2 ----
    y2 = x1 + ffn
    mu2 = jnp.mean(y2, axis=-1, keepdims=True)
    var2 = jnp.mean(jnp.square(y2 - mu2), axis=-1, keepdims=True)
    x = (y2 - mu2) * jax.lax.rsqrt(var2 + EPS) * ln2_g_ref[l] + ln2_b_ref[l]

  # ---- fused final LayerNorm (the IEncoder's trailing nn.LayerNorm) ----
  muf = jnp.mean(x, axis=-1, keepdims=True)
  varf = jnp.mean(jnp.square(x - muf), axis=-1, keepdims=True)
  o_ref[...] = ((x - muf) * jax.lax.rsqrt(varf + EPS) * lnf_g_ref[...]
                + lnf_b_ref[...]).astype(o_ref.dtype)


# ------------------------------- wrapper --------------------------------------

def _pick_block_batch(B, L, max_rows=512):
  """Largest batch tile whose Bt*L row count feeds the MXU without blowing VMEM."""
  best = None
  for cand in range(1, B + 1):
    if B % cand:
      continue
    rows = cand * L
    if rows % 8 == 0 and rows <= max_rows:
      best = cand
  return best if best is not None else B


def iencoder_forward(x, params, n_heads, *, block_batch=None, approx_recip=True):
  """IEncoder.forward (conv_layers=None, attn_mask=None) as one fused pallas_call."""
  B, L, D = x.shape
  if D % n_heads != 0:
    raise ValueError(f"d_model={D} must be divisible by n_heads={n_heads}")
  n_layers = params["wqkv"].shape[0]
  Dff = params["w1"].shape[2]
  dh = D // n_heads
  scale = 1.0 / float(dh) ** 0.5            # FullAttention default scale

  Bt = _pick_block_batch(B, L) if block_batch is None else block_batch
  if B % Bt:
    raise ValueError(f"block_batch={Bt} must divide batch={B}")
  rows = Bt * L
  grid = (B // Bt,)

  # bf16 matmul weights / operands, f32 accumulation.  Note: real Informer
  # configs (D=512) are lane-dense; the tiny demo D=32 runs on 1/4 of the lanes.
  bf16 = jnp.bfloat16
  operands = (
      x.reshape(B * L, D),                  # token rows as the matmul M dim
      params["wqkv"].astype(bf16), params["bqkv"],
      params["wo"].astype(bf16), params["bo"],
      params["ln1_g"], params["ln1_b"],
      params["w1"].astype(bf16), params["b1"],
      params["w2"].astype(bf16), params["b2"],
      params["ln2_g"], params["ln2_b"],
      params["lnf_g"], params["lnf_b"],
  )

  x_spec = pl.BlockSpec((rows, D), lambda i: (i, 0))

  def const_spec(a):
    # Full-array block + constant index_map: DMA'd into VMEM once and reused by
    # every grid step (weights never re-stream from HBM across batch tiles).
    if a.ndim == 2:
      return pl.BlockSpec(a.shape, lambda i: (0, 0))
    return pl.BlockSpec(a.shape, lambda i: (0, 0, 0))

  in_specs = [x_spec] + [const_spec(a) for a in operands[1:]]

  flops = n_layers * B * (6 * L * D * D          # fused QKV matmul
                          + 4 * L * L * D        # scores + PV over all heads
                          + 2 * L * D * D        # output projection
                          + 4 * L * D * Dff)     # FFN (two matmuls)
  transcendentals = n_layers * B * n_heads * L * L
  in_bytes = sum(int(a.size) * a.dtype.itemsize for a in operands)
  bytes_accessed = in_bytes + B * L * D * 4      # + output

  scratch_shapes = [pltpu.VMEM((rows, 3 * D), jnp.float32),   # qkv
                    pltpu.VMEM((rows, D), jnp.float32)]       # per-head context

  # Size the VMEM limit from the footprint, capped per generation
  # (64 MiB physical on v7x vs 128 MiB on v5e/v6e).
  try:
    vmem_cap = pltpu.get_tpu_info().vmem_capacity_bytes
  except Exception:  # conservative fallback if the query is unavailable
    vmem_cap = 64 * 1024 * 1024
  est = (2 * in_bytes + 2 * rows * D * 4         # double-buffered inputs + out tile
         + rows * 4 * D * 4                      # scratch
         + (4 << 20))                            # headroom
  vmem_limit = int(min(max(est, 32 * 1024 * 1024), int(0.9 * vmem_cap)))

  out = pl.pallas_call(
      partial(_encoder_stack_kernel, n_layers=n_layers, n_heads=n_heads,
              seq_len=L, block_batch=Bt, scale=scale, approx_recip=approx_recip),
      out_shape=jax.ShapeDtypeStruct((B * L, D), x.dtype),
      grid=grid,
      in_specs=in_specs,
      out_specs=x_spec,
      scratch_shapes=scratch_shapes,
      compiler_params=pltpu.CompilerParams(
          dimension_semantics=("parallel",),
          vmem_limit_bytes=vmem_limit),
      cost_estimate=pl.CostEstimate(
          flops=int(flops), transcendentals=int(transcendentals),
          bytes_accessed=int(bytes_accessed)),
  )(*operands)
  return out.reshape(B, L, D)


# --------------------------- parameter init -----------------------------------

def init_params(key, n_layers, d_model, d_ff, dtype=jnp.float32):
  """Stacked per-layer parameters (leading axis = layer) + final LayerNorm."""
  D, F, nl = d_model, d_ff, n_layers
  ks = jax.random.split(key, 12)
  s = 0.02
  wq = s * jax.random.normal(ks[0], (nl, D, D), dtype)
  wk = s * jax.random.normal(ks[1], (nl, D, D), dtype)
  wv = s * jax.random.normal(ks[2], (nl, D, D), dtype)
  return {
      # Q/K/V weights packed once into [D, 3D] per layer (single MXU pass).
      "wqkv": jnp.concatenate([wq, wk, wv], axis=2),
      "bqkv": 0.01 * jax.random.normal(ks[3], (nl, 1, 3 * D), dtype),
      "wo": s * jax.random.normal(ks[4], (nl, D, D), dtype),
      "bo": 0.01 * jax.random.normal(ks[5], (nl, 1, D), dtype),
      "ln1_g": 1.0 + 0.05 * jax.random.normal(ks[6], (nl, 1, D), dtype),
      "ln1_b": 0.02 * jax.random.normal(ks[7], (nl, 1, D), dtype),
      "w1": s * jax.random.normal(ks[8], (nl, D, F), dtype),
      "b1": 0.01 * jax.random.normal(ks[9], (nl, 1, F), dtype),
      "w2": s * jax.random.normal(ks[10], (nl, F, D), dtype),
      "b2": 0.01 * jax.random.normal(ks[11], (nl, 1, D), dtype),
      "ln2_g": jnp.ones((nl, 1, D), dtype),
      "ln2_b": jnp.zeros((nl, 1, D), dtype),
      "lnf_g": jnp.ones((1, D), dtype),
      "lnf_b": jnp.zeros((1, D), dtype),
  }


# --------------------------- pure-JAX reference --------------------------------

def _ref_forward(x, params, n_heads):
  def ln(y, g, b):
    mu = jnp.mean(y, -1, keepdims=True)
    var = jnp.mean(jnp.square(y - mu), -1, keepdims=True)
    return (y - mu) / jnp.sqrt(var + EPS) * g + b

  B, L, D = x.shape
  H = n_heads
  dh = D // H
  nl = params["wqkv"].shape[0]
  for l in range(nl):
    qkv = x @ params["wqkv"][l] + params["bqkv"][l][0]
    q, k, v = qkv[..., :D], qkv[..., D:2 * D], qkv[..., 2 * D:]
    q = q.reshape(B, L, H, dh).transpose(0, 2, 1, 3)
    k = k.reshape(B, L, H, dh).transpose(0, 2, 1, 3)
    v = v.reshape(B, L, H, dh).transpose(0, 2, 1, 3)
    s = jnp.einsum("bhqd,bhkd->bhqk", q, k) / (dh ** 0.5)
    a = jax.nn.softmax(s, axis=-1)
    o = jnp.einsum("bhqk,bhkd->bhqd", a, v).transpose(0, 2, 1, 3).reshape(B, L, D)
    attn = o @ params["wo"][l] + params["bo"][l][0]
    x1 = ln(x + attn, params["ln1_g"][l][0], params["ln1_b"][l][0])
    y = (jnp.maximum(x1 @ params["w1"][l] + params["b1"][l][0], 0.0)
         @ params["w2"][l] + params["b2"][l][0])
    x = ln(x1 + y, params["ln2_g"][l][0], params["ln2_b"][l][0])
  return ln(x, params["lnf_g"][0], params["lnf_b"][0])


# ---------------------------------- main ---------------------------------------

if __name__ == "__main__":
  B, L, D = 2, 8, 32          # batch, seq len, d_model
  H, Dff = 4, 64              # heads, FFN width
  n_layers = 2

  key = jax.random.PRNGKey(0)
  kx, kp = jax.random.split(key)
  x = jax.random.normal(kx, (B, L, D), jnp.float32)
  params = init_params(kp, n_layers, D, Dff)

  fwd = jax.jit(iencoder_forward, static_argnums=(2,))
  out = jax.block_until_ready(fwd(x, params, H))

  assert out.shape == (B, L, D), out.shape
  assert bool(jnp.all(jnp.isfinite(out)))

  ref = _ref_forward(x, params, H)
  max_err = float(jnp.max(jnp.abs(out - ref)))
  # Tolerance covers bf16 matmul operands + approx softmax reciprocal.
  assert bool(jnp.allclose(out, ref, atol=2e-2, rtol=2e-2)), max_err

  print("KERNEL_OK")
</pallas_src>

<mosaic_0001>
module attributes {stable_mosaic.version = 11 : i64} {
  func.func @_encoder_stack_kernel(%arg0: i32, %arg1: memref<16x32xf32, #tpu.memory_space<vmem>>, %arg2: memref<2x32x96xbf16, #tpu.memory_space<vmem>>, %arg3: memref<2x1x96xf32, #tpu.memory_space<vmem>>, %arg4: memref<2x32x32xbf16, #tpu.memory_space<vmem>>, %arg5: memref<2x1x32xf32, #tpu.memory_space<vmem>>, %arg6: memref<2x1x32xf32, #tpu.memory_space<vmem>>, %arg7: memref<2x1x32xf32, #tpu.memory_space<vmem>>, %arg8: memref<2x32x64xbf16, #tpu.memory_space<vmem>>, %arg9: memref<2x1x64xf32, #tpu.memory_space<vmem>>, %arg10: memref<2x64x32xbf16, #tpu.memory_space<vmem>>, %arg11: memref<2x1x32xf32, #tpu.memory_space<vmem>>, %arg12: memref<2x1x32xf32, #tpu.memory_space<vmem>>, %arg13: memref<2x1x32xf32, #tpu.memory_space<vmem>>, %arg14: memref<1x32xf32, #tpu.memory_space<vmem>>, %arg15: memref<1x32xf32, #tpu.memory_space<vmem>>, %arg16: memref<16x32xf32, #tpu.memory_space<vmem>>, %arg17: memref<16x96xf32, #tpu.memory_space<vmem>>, %arg18: memref<16x32xf32, #tpu.memory_space<vmem>>) attributes {dimension_semantics = [#tpu.dimension_semantics<parallel>], iteration_bounds = array<i64: 1>, scalar_prefetch = 0 : i64, scratch_operands = 2 : i64, tpu.core_type = #tpu.core_type<tc>, window_params = [{transform_indices = @transform_0, window_bounds = array<i64: 16, 32>}, {pipeline_mode = #tpu.pipeline_mode<synchronous>, transform_indices = @transform_1, window_bounds = array<i64: 2, 32, 96>}, {pipeline_mode = #tpu.pipeline_mode<synchronous>, transform_indices = @transform_2, window_bounds = array<i64: 2, 1, 96>}, {pipeline_mode = #tpu.pipeline_mode<synchronous>, transform_indices = @transform_3, window_bounds = array<i64: 2, 32, 32>}, {pipeline_mode = #tpu.pipeline_mode<synchronous>, transform_indices = @transform_4, window_bounds = array<i64: 2, 1, 32>}, {pipeline_mode = #tpu.pipeline_mode<synchronous>, transform_indices = @transform_5, window_bounds = array<i64: 2, 1, 32>}, {pipeline_mode = #tpu.pipeline_mode<synchronous>, transform_indices = @transform_6, window_bounds = array<i64: 2, 1, 32>}, {pipeline_mode = #tpu.pipeline_mode<synchronous>, transform_indices = @transform_7, window_bounds = array<i64: 2, 32, 64>}, {pipeline_mode = #tpu.pipeline_mode<synchronous>, transform_indices = @transform_8, window_bounds = array<i64: 2, 1, 64>}, {pipeline_mode = #tpu.pipeline_mode<synchronous>, transform_indices = @transform_9, window_bounds = array<i64: 2, 64, 32>}, {pipeline_mode = #tpu.pipeline_mode<synchronous>, transform_indices = @transform_10, window_bounds = array<i64: 2, 1, 32>}, {pipeline_mode = #tpu.pipeline_mode<synchronous>, transform_indices = @transform_11, window_bounds = array<i64: 2, 1, 32>}, {pipeline_mode = #tpu.pipeline_mode<synchronous>, transform_indices = @transform_12, window_bounds = array<i64: 2, 1, 32>}, {pipeline_mode = #tpu.pipeline_mode<synchronous>, transform_indices = @transform_13, window_bounds = array<i64: 1, 32>}, {pipeline_mode = #tpu.pipeline_mode<synchronous>, transform_indices = @transform_14, window_bounds = array<i64: 1, 32>}, {transform_indices = @transform_15, window_bounds = array<i64: 16, 32>}]} {
    %c0 = arith.constant 0 : index
    %c0_0 = arith.constant 0 : index
    %0 = vector.load %arg1[%c0, %c0_0] : memref<16x32xf32, #tpu.memory_space<vmem>>, vector<16x32xf32>
    %1 = arith.truncf %0 : vector<16x32xf32> to vector<16x32xbf16>
    %c0_1 = arith.constant 0 : index
    %c0_2 = arith.constant 0 : index
    %c0_3 = arith.constant 0 : index
    %2 = vector.load %arg2[%c0_1, %c0_2, %c0_3] : memref<2x32x96xbf16, #tpu.memory_space<vmem>>, vector<1x32x96xbf16>
    %3 = vector.shape_cast %2 : vector<1x32x96xbf16> to vector<32x96xbf16>
    %cst = arith.constant dense<0.000000e+00> : vector<16x96xf32>
    %4 = tpu.matmul %1, %3, %cst {dimension_numbers = #tpu.dot_dimension_numbers<[1], [0], [0], [1], [0, 0, 1, 1], [], []>} : vector<16x32xbf16>, vector<32x96xbf16>, vector<16x96xf32> -> vector<16x96xf32>
    %c0_4 = arith.constant 0 : index
    %c0_5 = arith.constant 0 : index
    %c0_6 = arith.constant 0 : index
    %5 = vector.load %arg3[%c0_4, %c0_5, %c0_6] : memref<2x1x96xf32, #tpu.memory_space<vmem>>, vector<1x1x96xf32>
    %6 = vector.shape_cast %5 : vector<1x1x96xf32> to vector<1x96xf32>
    %7 = vector.broadcast %6 : vector<1x96xf32> to vector<16x96xf32>
    %8 = arith.addf %4, %7 : vector<16x96xf32>
    %c0_7 = arith.constant 0 : index
    %c0_8 = arith.constant 0 : index
    %9 = vector.load %arg17[%c0_7, %c0_8] : memref<16x96xf32, #tpu.memory_space<vmem>>, vector<16x96xf32>
    tpu.vector_store %arg17[%c0_7, %c0_8], %8 {strides = array<i32>} : memref<16x96xf32, #tpu.memory_space<vmem>>, vector<16x96xf32>,
    %c0_9 = arith.constant 0 : index
    %c0_10 = arith.constant 0 : index
    %10 = vector.load %arg17[%c0_9, %c0_10] : memref<16x96xf32, #tpu.memory_space<vmem>>, vector<8x8xf32>
    %11 = arith.truncf %10 : vector<8x8xf32> to vector<8x8xbf16>
    %c0_11 = arith.constant 0 : index
    %c32 = arith.constant 32 : index
    %12 = vector.load %arg17[%c0_11, %c32] : memref<16x96xf32, #tpu.memory_space<vmem>>, vector<8x8xf32>
    %13 = arith.truncf %12 : vector<8x8xf32> to vector<8x8xbf16>
    %c0_12 = arith.constant 0 : index
    %c64 = arith.constant 64 : index
    %14 = vector.load %arg17[%c0_12, %c64] : memref<16x96xf32, #tpu.memory_space<vmem>>, vector<8x8xf32>
    %15 = arith.truncf %14 : vector<8x8xf32> to vector<8x8xbf16>
    %cst_13 = arith.constant dense<0.000000e+00> : vector<8x8xf32>
    %16 = tpu.matmul %11, %13, %cst_13 {dimension_numbers = #tpu.dot_dimension_numbers<[1], [1], [0], [0], [0, 0, 1, 0], [], []>} : vector<8x8xbf16>, vector<8x8xbf16>, vector<8x8xf32> -> vector<8x8xf32>
    %cst_14 = arith.constant 0.353553385 : f32
    %17 = vector.broadcast %cst_14 : f32 to vector<8x8xf32>
    %18 = arith.mulf %16, %17 : vector<8x8xf32>
    %cst_15 = arith.constant dense<0xFF800000> : vector<8xf32>
    %19 = vector.multi_reduction <maximumf>, %18, %cst_15 [1] : vector<8x8xf32> to vector<8xf32>
    %20 = vector.shape_cast %19 : vector<8xf32> to vector<8x1xf32>
    %21 = vector.broadcast %20 : vector<8x1xf32> to vector<8x8xf32>
    %22 = arith.subf %18, %21 : vector<8x8xf32>
    %23 = math.exp %22 : vector<8x8xf32>
    %cst_16 = arith.constant dense<0.000000e+00> : vector<8xf32>
    %24 = vector.multi_reduction <add>, %23, %cst_16 [1] : vector<8x8xf32> to vector<8xf32>
    %25 = vector.shape_cast %24 : vector<8xf32> to vector<8x1xf32>
    %26 = tpu.reciprocal %25 {approx = true} : vector<8x1xf32> -> vector<8x1xf32>
    %27 = vector.broadcast %26 : vector<8x1xf32> to vector<8x8xf32>
    %28 = arith.mulf %23, %27 : vector<8x8xf32>
    %29 = arith.truncf %28 : vector<8x8xf32> to vector<8x8xbf16>
    %cst_17 = arith.constant dense<0.000000e+00> : vector<8x8xf32>
    %30 = tpu.matmul %29, %15, %cst_17 {dimension_numbers = #tpu.dot_dimension_numbers<[1], [0], [0], [1], [0, 0, 1, 1], [], []>} : vector<8x8xbf16>, vector<8x8xbf16>, vector<8x8xf32> -> vector<8x8xf32>
    %c0_18 = arith.constant 0 : index
    %c0_19 = arith.constant 0 : index
    %31 = vector.load %arg18[%c0_18, %c0_19] : memref<16x32xf32, #tpu.memory_space<vmem>>, vector<8x8xf32>
    tpu.vector_store %arg18[%c0_18, %c0_19], %30 {strides = array<i32>} : memref<16x32xf32, #tpu.memory_space<vmem>>, vector<8x8xf32>,
    %c0_20 = arith.constant 0 : index
    %c8 = arith.constant 8 : index
    %32 = vector.load %arg17[%c0_20, %c8] : memref<16x96xf32, #tpu.memory_space<vmem>>, vector<8x8xf32>
    %33 = arith.truncf %32 : vector<8x8xf32> to vector<8x8xbf16>
    %c0_21 = arith.constant 0 : index
    %c40 = arith.constant 40 : index
    %34 = vector.load %arg17[%c0_21, %c40] : memref<16x96xf32, #tpu.memory_space<vmem>>, vector<8x8xf32>
    %35 = arith.truncf %34 : vector<8x8xf32> to vector<8x8xbf16>
    %c0_22 = arith.constant 0 : index
    %c72 = arith.constant 72 : index
    %36 = vector.load %arg17[%c0_22, %c72] : memref<16x96xf32, #tpu.memory_space<vmem>>, vector<8x8xf32>
    %37 = arith.truncf %36 : vector<8x8xf32> to vector<8x8xbf16>
    %cst_23 = arith.constant dense<0.000000e+00> : vector<8x8xf32>
    %38 = tpu.matmul %33, %35, %cst_23 {dimension_numbers = #tpu.dot_dimension_numbers<[1], [1], [0], [0], [0, 0, 1, 0], [], []>} : vector<8x8xbf16>, vector<8x8xbf16>, vector<8x8xf32> -> vector<8x8xf32>
    %cst_24 = arith.constant 0.353553385 : f32
    %39 = vector.broadcast %cst_24 : f32 to vector<8x8xf32>
    %40 = arith.mulf %38, %39 : vector<8x8xf32>
    %cst_25 = arith.constant dense<0xFF800000> : vector<8xf32>
    %41 = vector.multi_reduction <maximumf>, %40, %cst_25 [1] : vector<8x8xf32> to vector<8xf32>
    %42 = vector.shape_cast %41 : vector<8xf32> to vector<8x1xf32>
    %43 = vector.broadcast %42 : vector<8x1xf32> to vector<8x8xf32>
    %44 = arith.subf %40, %43 : vector<8x8xf32>
    %45 = math.exp %44 : vector<8x8xf32>
    %cst_26 = arith.constant dense<0.000000e+00> : vector<8xf32>
    %46 = vector.multi_reduction <add>, %45, %cst_26 [1] : vector<8x8xf32> to vector<8xf32>
    %47 = vector.shape_cast %46 : vector<8xf32> to vector<8x1xf32>
    %48 = tpu.reciprocal %47 {approx = true} : vector<8x1xf32> -> vector<8x1xf32>
    %49 = vector.broadcast %48 : vector<8x1xf32> to vector<8x8xf32>
    %50 = arith.mulf %45, %49 : vector<8x8xf32>
    %51 = arith.truncf %50 : vector<8x8xf32> to vector<8x8xbf16>
    %cst_27 = arith.constant dense<0.000000e+00> : vector<8x8xf32>
    %52 = tpu.matmul %51, %37, %cst_27 {dimension_numbers = #tpu.dot_dimension_numbers<[1], [0], [0], [1], [0, 0, 1, 1], [], []>} : vector<8x8xbf16>, vector<8x8xbf16>, vector<8x8xf32> -> vector<8x8xf32>
    %c0_28 = arith.constant 0 : index
    %c8_29 = arith.constant 8 : index
    %53 = vector.load %arg18[%c0_28, %c8_29] : memref<16x32xf32, #tpu.memory_space<vmem>>, vector<8x8xf32>
    tpu.vector_store %arg18[%c0_28, %c8_29], %52 {strides = array<i32>} : memref<16x32xf32, #tpu.memory_space<vmem>>, vector<8x8xf32>,
    %c0_30 = arith.constant 0 : index
    %c16 = arith.constant 16 : index
    %54 = vector.load %arg17[%c0_30, %c16] : memref<16x96xf32, #tpu.memory_space<vmem>>, vector<8x8xf32>
    %55 = arith.truncf %54 : vector<8x8xf32> to vector<8x8xbf16>
    %c0_31 = arith.constant 0 : index
    %c48 = arith.constant 48 : index
    %56 = vector.load %arg17[%c0_31, %c48] : memref<16x96xf32, #tpu.memory_space<vmem>>, vector<8x8xf32>
    %57 = arith.truncf %56 : vector<8x8xf32> to vector<8x8xbf16>
    %c0_32 = arith.constant 0 : index
    %c80 = arith.constant 80 : index
    %58 = vector.load %arg17[%c0_32, %c80] : memref<16x96xf32, #tpu.memory_space<vmem>>, vector<8x8xf32>
    %59 = arith.truncf %58 : vector<8x8xf32> to vector<8x8xbf16>
    %cst_33 = arith.constant dense<0.000000e+00> : vector<8x8xf32>
    %60 = tpu.matmul %55, %57, %cst_33 {dimension_numbers = #tpu.dot_dimension_numbers<[1], [1], [0], [0], [0, 0, 1, 0], [], []>} : vector<8x8xbf16>, vector<8x8xbf16>, vector<8x8xf32> -> vector<8x8xf32>
    %cst_34 = arith.constant 0.353553385 : f32
    %61 = vector.broadcast %cst_34 : f32 to vector<8x8xf32>
    %62 = arith.mulf %60, %61 : vector<8x8xf32>
    %cst_35 = arith.constant dense<0xFF800000> : vector<8xf32>
    %63 = vector.multi_reduction <maximumf>, %62, %cst_35 [1] : vector<8x8xf32> to vector<8xf32>
    %64 = vector.shape_cast %63 : vector<8xf32> to vector<8x1xf32>
    %65 = vector.broadcast %64 : vector<8x1xf32> to vector<8x8xf32>
    %66 = arith.subf %62, %65 : vector<8x8xf32>
    %67 = math.exp %66 : vector<8x8xf32>
    %cst_36 = arith.constant dense<0.000000e+00> : vector<8xf32>
    %68 = vector.multi_reduction <add>, %67, %cst_36 [1] : vector<8x8xf32> to vector<8xf32>
    %69 = vector.shape_cast %68 : vector<8xf32> to vector<8x1xf32>
    %70 = tpu.reciprocal %69 {approx = true} : vector<8x1xf32> -> vector<8x1xf32>
    %71 = vector.broadcast %70 : vector<8x1xf32> to vector<8x8xf32>
    %72 = arith.mulf %67, %71 : vector<8x8xf32>
    %73 = arith.truncf %72 : vector<8x8xf32> to vector<8x8xbf16>
    %cst_37 = arith.constant dense<0.000000e+00> : vector<8x8xf32>
    %74 = tpu.matmul %73, %59, %cst_37 {dimension_numbers = #tpu.dot_dimension_numbers<[1], [0], [0], [1], [0, 0, 1, 1], [], []>} : vector<8x8xbf16>, vector<8x8xbf16>, vector<8x8xf32> -> vector<8x8xf32>
    %c0_38 = arith.constant 0 : index
    %c16_39 = arith.constant 16 : index
    %75 = vector.load %arg18[%c0_38, %c16_39] : memref<16x32xf32, #tpu.memory_space<vmem>>, vector<8x8xf32>
    tpu.vector_store %arg18[%c0_38, %c16_39], %74 {strides = array<i32>} : memref<16x32xf32, #tpu.memory_space<vmem>>, vector<8x8xf32>,
    %c0_40 = arith.constant 0 : index
    %c24 = arith.constant 24 : index
    %76 = vector.load %arg17[%c0_40, %c24] : memref<16x96xf32, #tpu.memory_space<vmem>>, vector<8x8xf32>
    %77 = arith.truncf %76 : vector<8x8xf32> to vector<8x8xbf16>
    %c0_41 = arith.constant 0 : index
    %c56 = arith.constant 56 : index
    %78 = vector.load %arg17[%c0_41, %c56] : memref<16x96xf32, #tpu.memory_space<vmem>>, vector<8x8xf32>
    %79 = arith.truncf %78 : vector<8x8xf32> to vector<8x8xbf16>
    %c0_42 = arith.constant 0 : index
    %c88 = arith.constant 88 : index
    %80 = vector.load %arg17[%c0_42, %c88] : memref<16x96xf32, #tpu.memory_space<vmem>>, vector<8x8xf32>
    %81 = arith.truncf %80 : vector<8x8xf32> to vector<8x8xbf16>
    %cst_43 = arith.constant dense<0.000000e+00> : vector<8x8xf32>
    %82 = tpu.matmul %77, %79, %cst_43 {dimension_numbers = #tpu.dot_dimension_numbers<[1], [1], [0], [0], [0, 0, 1, 0], [], []>} : vector<8x8xbf16>, vector<8x8xbf16>, vector<8x8xf32> -> vector<8x8xf32>
    %cst_44 = arith.constant 0.353553385 : f32
    %83 = vector.broadcast %cst_44 : f32 to vector<8x8xf32>
    %84 = arith.mulf %82, %83 : vector<8x8xf32>
    %cst_45 = arith.constant dense<0xFF800000> : vector<8xf32>
    %85 = vector.multi_reduction <maximumf>, %84, %cst_45 [1] : vector<8x8xf32> to vector<8xf32>
    %86 = vector.shape_cast %85 : vector<8xf32> to vector<8x1xf32>
    %87 = vector.broadcast %86 : vector<8x1xf32> to vector<8x8xf32>
    %88 = arith.subf %84, %87 : vector<8x8xf32>
    %89 = math.exp %88 : vector<8x8xf32>
    %cst_46 = arith.constant dense<0.000000e+00> : vector<8xf32>
    %90 = vector.multi_reduction <add>, %89, %cst_46 [1] : vector<8x8xf32> to vector<8xf32>
    %91 = vector.shape_cast %90 : vector<8xf32> to vector<8x1xf32>
    %92 = tpu.reciprocal %91 {approx = true} : vector<8x1xf32> -> vector<8x1xf32>
    %93 = vector.broadcast %92 : vector<8x1xf32> to vector<8x8xf32>
    %94 = arith.mulf %89, %93 : vector<8x8xf32>
    %95 = arith.truncf %94 : vector<8x8xf32> to vector<8x8xbf16>
    %cst_47 = arith.constant dense<0.000000e+00> : vector<8x8xf32>
    %96 = tpu.matmul %95, %81, %cst_47 {dimension_numbers = #tpu.dot_dimension_numbers<[1], [0], [0], [1], [0, 0, 1, 1], [], []>} : vector<8x8xbf16>, vector<8x8xbf16>, vector<8x8xf32> -> vector<8x8xf32>
    %c0_48 = arith.constant 0 : index
    %c24_49 = arith.constant 24 : index
    %97 = vector.load %arg18[%c0_48, %c24_49] : memref<16x32xf32, #tpu.memory_space<vmem>>, vector<8x8xf32>
    tpu.vector_store %arg18[%c0_48, %c24_49], %96 {strides = array<i32>} : memref<16x32xf32, #tpu.memory_space<vmem>>, vector<8x8xf32>,
    %c8_50 = arith.constant 8 : index
    %c0_51 = arith.constant 0 : index
    %98 = vector.load %arg17[%c8_50, %c0_51] : memref<16x96xf32, #tpu.memory_space<vmem>>, vector<8x8xf32>
    %99 = arith.truncf %98 : vector<8x8xf32> to vector<8x8xbf16>
    %c8_52 = arith.constant 8 : index
    %c32_53 = arith.constant 32 : index
    %100 = vector.load %arg17[%c8_52, %c32_53] : memref<16x96xf32, #tpu.memory_space<vmem>>, vector<8x8xf32>
    %101 = arith.truncf %100 : vector<8x8xf32> to vector<8x8xbf16>
    %c8_54 = arith.constant 8 : index
    %c64_55 = arith.constant 64 : index
    %102 = vector.load %arg17[%c8_54, %c64_55] : memref<16x96xf32, #tpu.memory_space<vmem>>, vector<8x8xf32>
    %103 = arith.truncf %102 : vector<8x8xf32> to vector<8x8xbf16>
    %cst_56 = arith.constant dense<0.000000e+00> : vector<8x8xf32>
    %104 = tpu.matmul %99, %101, %cst_56 {dimension_numbers = #tpu.dot_dimension_numbers<[1], [1], [0], [0], [0, 0, 1, 0], [], []>} : vector<8x8xbf16>, vector<8x8xbf16>, vector<8x8xf32> -> vector<8x8xf32>
    %cst_57 = arith.constant 0.353553385 : f32
    %105 = vector.broadcast %cst_57 : f32 to vector<8x8xf32>
    %106 = arith.mulf %104, %105 : vector<8x8xf32>
    %cst_58 = arith.constant dense<0xFF800000> : vector<8xf32>
    %107 = vector.multi_reduction <maximumf>, %106, %cst_58 [1] : vector<8x8xf32> to vector<8xf32>
    %108 = vector.shape_cast %107 : vector<8xf32> to vector<8x1xf32>
    %109 = vector.broadcast %108 : vector<8x1xf32> to vector<8x8xf32>
    %110 = arith.subf %106, %109 : vector<8x8xf32>
    %111 = math.exp %110 : vector<8x8xf32>
    %cst_59 = arith.constant dense<0.000000e+00> : vector<8xf32>
    %112 = vector.multi_reduction <add>, %111, %cst_59 [1] : vector<8x8xf32> to vector<8xf32>
    %113 = vector.shape_cast %112 : vector<8xf32> to vector<8x1xf32>
    %114 = tpu.reciprocal %113 {approx = true} : vector<8x1xf32> -> vector<8x1xf32>
    %115 = vector.broadcast %114 : vector<8x1xf32> to vector<8x8xf32>
    %116 = arith.mulf %111, %115 : vector<8x8xf32>
    %117 = arith.truncf %116 : vector<8x8xf32> to vector<8x8xbf16>
    %cst_60 = arith.constant dense<0.000000e+00> : vector<8x8xf32>
    %118 = tpu.matmul %117, %103, %cst_60 {dimension_numbers = #tpu.dot_dimension_numbers<[1], [0], [0], [1], [0, 0, 1, 1], [], []>} : vector<8x8xbf16>, vector<8x8xbf16>, vector<8x8xf32> -> vector<8x8xf32>
    %c8_61 = arith.constant 8 : index
    %c0_62 = arith.constant 0 : index
    %119 = vector.load %arg18[%c8_61, %c0_62] : memref<16x32xf32, #tpu.memory_space<vmem>>, vector<8x8xf32>
    tpu.vector_store %arg18[%c8_61, %c0_62], %118 {strides = array<i32>} : memref<16x32xf32, #tpu.memory_space<vmem>>, vector<8x8xf32>,
    %c8_63 = arith.constant 8 : index
    %c8_64 = arith.constant 8 : index
    %120 = vector.load %arg17[%c8_63, %c8_64] : memref<16x96xf32, #tpu.memory_space<vmem>>, vector<8x8xf32>
    %121 = arith.truncf %120 : vector<8x8xf32> to vector<8x8xbf16>
    %c8_65 = arith.constant 8 : index
    %c40_66 = arith.constant 40 : index
    %122 = vector.load %arg17[%c8_65, %c40_66] : memref<16x96xf32, #tpu.memory_space<vmem>>, vector<8x8xf32>
    %123 = arith.truncf %122 : vector<8x8xf32> to vector<8x8xbf16>
    %c8_67 = arith.constant 8 : index
    %c72_68 = arith.constant 72 : index
    %124 = vector.load %arg17[%c8_67, %c72_68] : memref<16x96xf32, #tpu.memory_space<vmem>>, vector<8x8xf32>
    %125 = arith.truncf %124 : vector<8x8xf32> to vector<8x8xbf16>
    %cst_69 = arith.constant dense<0.000000e+00> : vector<8x8xf32>
    %126 = tpu.matmul %121, %123, %cst_69 {dimension_numbers = #tpu.dot_dimension_numbers<[1], [1], [0], [0], [0, 0, 1, 0], [], []>} : vector<8x8xbf16>, vector<8x8xbf16>, vector<8x8xf32> -> vector<8x8xf32>
    %cst_70 = arith.constant 0.353553385 : f32
    %127 = vector.broadcast %cst_70 : f32 to vector<8x8xf32>
    %128 = arith.mulf %126, %127 : vector<8x8xf32>
    %cst_71 = arith.constant dense<0xFF800000> : vector<8xf32>
    %129 = vector.multi_reduction <maximumf>, %128, %cst_71 [1] : vector<8x8xf32> to vector<8xf32>
    %130 = vector.shape_cast %129 : vector<8xf32> to vector<8x1xf32>
    %131 = vector.broadcast %130 : vector<8x1xf32> to vector<8x8xf32>
    %132 = arith.subf %128, %131 : vector<8x8xf32>
    %133 = math.exp %132 : vector<8x8xf32>
    %cst_72 = arith.constant dense<0.000000e+00> : vector<8xf32>
    %134 = vector.multi_reduction <add>, %133, %cst_72 [1] : vector<8x8xf32> to vector<8xf32>
    %135 = vector.shape_cast %134 : vector<8xf32> to vector<8x1xf32>
    %136 = tpu.reciprocal %135 {approx = true} : vector<8x1xf32> -> vector<8x1xf32>
    %137 = vector.broadcast %136 : vector<8x1xf32> to vector<8x8xf32>
    %138 = arith.mulf %133, %137 : vector<8x8xf32>
    %139 = arith.truncf %138 : vector<8x8xf32> to vector<8x8xbf16>
    %cst_73 = arith.constant dense<0.000000e+00> : vector<8x8xf32>
    %140 = tpu.matmul %139, %125, %cst_73 {dimension_numbers = #tpu.dot_dimension_numbers<[1], [0], [0], [1], [0, 0, 1, 1], [], []>} : vector<8x8xbf16>, vector<8x8xbf16>, vector<8x8xf32> -> vector<8x8xf32>
    %c8_74 = arith.constant 8 : index
    %c8_75 = arith.constant 8 : index
    %141 = vector.load %arg18[%c8_74, %c8_75] : memref<16x32xf32, #tpu.memory_space<vmem>>, vector<8x8xf32>
    tpu.vector_store %arg18[%c8_74, %c8_75], %140 {strides = array<i32>} : memref<16x32xf32, #tpu.memory_space<vmem>>, vector<8x8xf32>,
    %c8_76 = arith.constant 8 : index
    %c16_77 = arith.constant 16 : index
    %142 = vector.load %arg17[%c8_76, %c16_77] : memref<16x96xf32, #tpu.memory_space<vmem>>, vector<8x8xf32>
    %143 = arith.truncf %142 : vector<8x8xf32> to vector<8x8xbf16>
    %c8_78 = arith.constant 8 : index
    %c48_79 = arith.constant 48 : index
    %144 = vector.load %arg17[%c8_78, %c48_79] : memref<16x96xf32, #tpu.memory_space<vmem>>, vector<8x8xf32>
    %145 = arith.truncf %144 : vector<8x8xf32> to vector<8x8xbf16>
    %c8_80 = arith.constant 8 : index
    %c80_81 = arith.constant 80 : index
    %146 = vector.load %arg17[%c8_80, %c80_81] : memref<16x96xf32, #tpu.memory_space<vmem>>, vector<8x8xf32>
    %147 = arith.truncf %146 : vector<8x8xf32> to vector<8x8xbf16>
    %cst_82 = arith.constant dense<0.000000e+00> : vector<8x8xf32>
    %148 = tpu.matmul %143, %145, %cst_82 {dimension_numbers = #tpu.dot_dimension_numbers<[1], [1], [0], [0], [0, 0, 1, 0], [], []>} : vector<8x8xbf16>, vector<8x8xbf16>, vector<8x8xf32> -> vector<8x8xf32>
    %cst_83 = arith.constant 0.353553385 : f32
    %149 = vector.broadcast %cst_83 : f32 to vector<8x8xf32>
    %150 = arith.mulf %148, %149 : vector<8x8xf32>
    %cst_84 = arith.constant dense<0xFF800000> : vector<8xf32>
    %151 = vector.multi_reduction <maximumf>, %150, %cst_84 [1] : vector<8x8xf32> to vector<8xf32>
    %152 = vector.shape_cast %151 : vector<8xf32> to vector<8x1xf32>
    %153 = vector.broadcast %152 : vector<8x1xf32> to vector<8x8xf32>
    %154 = arith.subf %150, %153 : vector<8x8xf32>
    %155 = math.exp %154 : vector<8x8xf32>
    %cst_85 = arith.constant dense<0.000000e+00> : vector<8xf32>
    %156 = vector.multi_reduction <add>, %155, %cst_85 [1] : vector<8x8xf32> to vector<8xf32>
    %157 = vector.shape_cast %156 : vector<8xf32> to vector<8x1xf32>
    %158 = tpu.reciprocal %157 {approx = true} : vector<8x1xf32> -> vector<8x1xf32>
    %159 = vector.broadcast %158 : vector<8x1xf32> to vector<8x8xf32>
    %160 = arith.mulf %155, %159 : vector<8x8xf32>
    %161 = arith.truncf %160 : vector<8x8xf32> to vector<8x8xbf16>
    %cst_86 = arith.constant dense<0.000000e+00> : vector<8x8xf32>
    %162 = tpu.matmul %161, %147, %cst_86 {dimension_numbers = #tpu.dot_dimension_numbers<[1], [0], [0], [1], [0, 0, 1, 1], [], []>} : vector<8x8xbf16>, vector<8x8xbf16>, vector<8x8xf32> -> vector<8x8xf32>
    %c8_87 = arith.constant 8 : index
    %c16_88 = arith.constant 16 : index
    %163 = vector.load %arg18[%c8_87, %c16_88] : memref<16x32xf32, #tpu.memory_space<vmem>>, vector<8x8xf32>
    tpu.vector_store %arg18[%c8_87, %c16_88], %162 {strides = array<i32>} : memref<16x32xf32, #tpu.memory_space<vmem>>, vector<8x8xf32>,
    %c8_89 = arith.constant 8 : index
    %c24_90 = arith.constant 24 : index
    %164 = vector.load %arg17[%c8_89, %c24_90] : memref<16x96xf32, #tpu.memory_space<vmem>>, vector<8x8xf32>
    %165 = arith.truncf %164 : vector<8x8xf32> to vector<8x8xbf16>
    %c8_91 = arith.constant 8 : index
    %c56_92 = arith.constant 56 : index
    %166 = vector.load %arg17[%c8_91, %c56_92] : memref<16x96xf32, #tpu.memory_space<vmem>>, vector<8x8xf32>
    %167 = arith.truncf %166 : vector<8x8xf32> to vector<8x8xbf16>
    %c8_93 = arith.constant 8 : index
    %c88_94 = arith.constant 88 : index
    %168 = vector.load %arg17[%c8_93, %c88_94] : memref<16x96xf32, #tpu.memory_space<vmem>>, vector<8x8xf32>
    %169 = arith.truncf %168 : vector<8x8xf32> to vector<8x8xbf16>
    %cst_95 = arith.constant dense<0.000000e+00> : vector<8x8xf32>
    %170 = tpu.matmul %165, %167, %cst_95 {dimension_numbers = #tpu.dot_dimension_numbers<[1], [1], [0], [0], [0, 0, 1, 0], [], []>} : vector<8x8xbf16>, vector<8x8xbf16>, vector<8x8xf32> -> vector<8x8xf32>
    %cst_96 = arith.constant 0.353553385 : f32
    %171 = vector.broadcast %cst_96 : f32 to vector<8x8xf32>
    %172 = arith.mulf %170, %171 : vector<8x8xf32>
    %cst_97 = arith.constant dense<0xFF800000> : vector<8xf32>
    %173 = vector.multi_reduction <maximumf>, %172, %cst_97 [1] : vector<8x8xf32> to vector<8xf32>
    %174 = vector.shape_cast %173 : vector<8xf32> to vector<8x1xf32>
    %175 = vector.broadcast %174 : vector<8x1xf32> to vector<8x8xf32>
    %176 = arith.subf %172, %175 : vector<8x8xf32>
    %177 = math.exp %176 : vector<8x8xf32>
    %cst_98 = arith.constant dense<0.000000e+00> : vector<8xf32>
    %178 = vector.multi_reduction <add>, %177, %cst_98 [1] : vector<8x8xf32> to vector<8xf32>
    %179 = vector.shape_cast %178 : vector<8xf32> to vector<8x1xf32>
    %180 = tpu.reciprocal %179 {approx = true} : vector<8x1xf32> -> vector<8x1xf32>
    %181 = vector.broadcast %180 : vector<8x1xf32> to vector<8x8xf32>
    %182 = arith.mulf %177, %181 : vector<8x8xf32>
    %183 = arith.truncf %182 : vector<8x8xf32> to vector<8x8xbf16>
    %cst_99 = arith.constant dense<0.000000e+00> : vector<8x8xf32>
    %184 = tpu.matmul %183, %169, %cst_99 {dimension_numbers = #tpu.dot_dimension_numbers<[1], [0], [0], [1], [0, 0, 1, 1], [], []>} : vector<8x8xbf16>, vector<8x8xbf16>, vector<8x8xf32> -> vector<8x8xf32>
    %c8_100 = arith.constant 8 : index
    %c24_101 = arith.constant 24 : index
    %185 = vector.load %arg18[%c8_100, %c24_101] : memref<16x32xf32, #tpu.memory_space<vmem>>, vector<8x8xf32>
    tpu.vector_store %arg18[%c8_100, %c24_101], %184 {strides = array<i32>} : memref<16x32xf32, #tpu.memory_space<vmem>>, vector<8x8xf32>,
    %c0_102 = arith.constant 0 : index
    %c0_103 = arith.constant 0 : index
    %186 = vector.load %arg18[%c0_102, %c0_103] : memref<16x32xf32, #tpu.memory_space<vmem>>, vector<16x32xf32>
    %187 = arith.truncf %186 : vector<16x32xf32> to vector<16x32xbf16>
    %c0_104 = arith.constant 0 : index
    %c0_105 = arith.constant 0 : index
    %c0_106 = arith.constant 0 : index
    %188 = vector.load %arg4[%c0_104, %c0_105, %c0_106] : memref<2x32x32xbf16, #tpu.memory_space<vmem>>, vector<1x32x32xbf16>
    %189 = vector.shape_cast %188 : vector<1x32x32xbf16> to vector<32x32xbf16>
    %cst_107 = arith.constant dense<0.000000e+00> : vector<16x32xf32>
    %190 = tpu.matmul %187, %189, %cst_107 {dimension_numbers = #tpu.dot_dimension_numbers<[1], [0], [0], [1], [0, 0, 1, 1], [], []>} : vector<16x32xbf16>, vector<32x32xbf16>, vector<16x32xf32> -> vector<16x32xf32>
    %c0_108 = arith.constant 0 : index
    %c0_109 = arith.constant 0 : index
    %c0_110 = arith.constant 0 : index
    %191 = vector.load %arg5[%c0_108, %c0_109, %c0_110] : memref<2x1x32xf32, #tpu.memory_space<vmem>>, vector<1x1x32xf32>
    %192 = vector.shape_cast %191 : vector<1x1x32xf32> to vector<1x32xf32>
    %193 = vector.broadcast %192 : vector<1x32xf32> to vector<16x32xf32>
    %194 = arith.addf %190, %193 : vector<16x32xf32>
    %195 = arith.addf %0, %194 : vector<16x32xf32>
    %cst_111 = arith.constant dense<0.000000e+00> : vector<16xf32>
    %196 = vector.multi_reduction <add>, %195, %cst_111 [1] : vector<16x32xf32> to vector<16xf32>
    %197 = vector.shape_cast %196 : vector<16xf32> to vector<16x1xf32>
    %cst_112 = arith.constant 3.200000e+01 : f32
    %198 = vector.broadcast %cst_112 : f32 to vector<16x1xf32>
    %199 = arith.divf %197, %198 : vector<16x1xf32>
    %200 = vector.broadcast %199 : vector<16x1xf32> to vector<16x32xf32>
    %201 = arith.subf %195, %200 : vector<16x32xf32>
    %202 = arith.mulf %201, %201 : vector<16x32xf32>
    %cst_113 = arith.constant dense<0.000000e+00> : vector<16xf32>
    %203 = vector.multi_reduction <add>, %202, %cst_113 [1] : vector<16x32xf32> to vector<16xf32>
    %204 = vector.shape_cast %203 : vector<16xf32> to vector<16x1xf32>
    %cst_114 = arith.constant 3.200000e+01 : f32
    %205 = vector.broadcast %cst_114 : f32 to vector<16x1xf32>
    %206 = arith.divf %204, %205 : vector<16x1xf32>
    %207 = vector.broadcast %199 : vector<16x1xf32> to vector<16x32xf32>
    %208 = arith.subf %195, %207 : vector<16x32xf32>
    %cst_115 = arith.constant 9.99999974E-6 : f32
    %209 = vector.broadcast %cst_115 : f32 to vector<16x1xf32>
    %210 = arith.addf %206, %209 : vector<16x1xf32>
    %211 = math.rsqrt %210 : vector<16x1xf32>
    %212 = vector.broadcast %211 : vector<16x1xf32> to vector<16x32xf32>
    %213 = arith.mulf %208, %212 : vector<16x32xf32>
    %c0_116 = arith.constant 0 : index
    %c0_117 = arith.constant 0 : index
    %c0_118 = arith.constant 0 : index
    %214 = vector.load %arg6[%c0_116, %c0_117, %c0_118] : memref<2x1x32xf32, #tpu.memory_space<vmem>>, vector<1x1x32xf32>
    %215 = vector.shape_cast %214 : vector<1x1x32xf32> to vector<1x32xf32>
    %216 = vector.broadcast %215 : vector<1x32xf32> to vector<16x32xf32>
    %217 = arith.mulf %213, %216 : vector<16x32xf32>
    %c0_119 = arith.constant 0 : index
    %c0_120 = arith.constant 0 : index
    %c0_121 = arith.constant 0 : index
    %218 = vector.load %arg7[%c0_119, %c0_120, %c0_121] : memref<2x1x32xf32, #tpu.memory_space<vmem>>, vector<1x1x32xf32>
    %219 = vector.shape_cast %218 : vector<1x1x32xf32> to vector<1x32xf32>
    %220 = vector.broadcast %219 : vector<1x32xf32> to vector<16x32xf32>
    %221 = arith.addf %217, %220 : vector<16x32xf32>
    %222 = arith.truncf %221 : vector<16x32xf32> to vector<16x32xbf16>
    %c0_122 = arith.constant 0 : index
    %c0_123 = arith.constant 0 : index
    %c0_124 = arith.constant 0 : index
    %223 = vector.load %arg8[%c0_122, %c0_123, %c0_124] : memref<2x32x64xbf16, #tpu.memory_space<vmem>>, vector<1x32x64xbf16>
    %224 = vector.shape_cast %223 : vector<1x32x64xbf16> to vector<32x64xbf16>
    %cst_125 = arith.constant dense<0.000000e+00> : vector<16x64xf32>
    %225 = tpu.matmul %222, %224, %cst_125 {dimension_numbers = #tpu.dot_dimension_numbers<[1], [0], [0], [1], [0, 0, 1, 1], [], []>} : vector<16x32xbf16>, vector<32x64xbf16>, vector<16x64xf32> -> vector<16x64xf32>
    %c0_126 = arith.constant 0 : index
    %c0_127 = arith.constant 0 : index
    %c0_128 = arith.constant 0 : index
    %226 = vector.load %arg9[%c0_126, %c0_127, %c0_128] : memref<2x1x64xf32, #tpu.memory_space<vmem>>, vector<1x1x64xf32>
    %227 = vector.shape_cast %226 : vector<1x1x64xf32> to vector<1x64xf32>
    %228 = vector.broadcast %227 : vector<1x64xf32> to vector<16x64xf32>
    %229 = arith.addf %225, %228 : vector<16x64xf32>
    %cst_129 = arith.constant 0.000000e+00 : f32
    %230 = vector.broadcast %cst_129 : f32 to vector<16x64xf32>
    %231 = arith.maximumf %229, %230 : vector<16x64xf32>
    %232 = arith.truncf %231 : vector<16x64xf32> to vector<16x64xbf16>
    %c0_130 = arith.constant 0 : index
    %c0_131 = arith.constant 0 : index
    %c0_132 = arith.constant 0 : index
    %233 = vector.load %arg10[%c0_130, %c0_131, %c0_132] : memref<2x64x32xbf16, #tpu.memory_space<vmem>>, vector<1x64x32xbf16>
    %234 = vector.shape_cast %233 : vector<1x64x32xbf16> to vector<64x32xbf16>
    %cst_133 = arith.constant dense<0.000000e+00> : vector<16x32xf32>
    %235 = tpu.matmul %232, %234, %cst_133 {dimension_numbers = #tpu.dot_dimension_numbers<[1], [0], [0], [1], [0, 0, 1, 1], [], []>} : vector<16x64xbf16>, vector<64x32xbf16>, vector<16x32xf32> -> vector<16x32xf32>
    %c0_134 = arith.constant 0 : index
    %c0_135 = arith.constant 0 : index
    %c0_136 = arith.constant 0 : index
    %236 = vector.load %arg11[%c0_134, %c0_135, %c0_136] : memref<2x1x32xf32, #tpu.memory_space<vmem>>, vector<1x1x32xf32>
    %237 = vector.shape_cast %236 : vector<1x1x32xf32> to vector<1x32xf32>
    %238 = vector.broadcast %237 : vector<1x32xf32> to vector<16x32xf32>
    %239 = arith.addf %235, %238 : vector<16x32xf32>
    %240 = arith.addf %221, %239 : vector<16x32xf32>
    %cst_137 = arith.constant dense<0.000000e+00> : vector<16xf32>
    %241 = vector.multi_reduction <add>, %240, %cst_137 [1] : vector<16x32xf32> to vector<16xf32>
    %242 = vector.shape_cast %241 : vector<16xf32> to vector<16x1xf32>
    %cst_138 = arith.constant 3.200000e+01 : f32
    %243 = vector.broadcast %cst_138 : f32 to vector<16x1xf32>
    %244 = arith.divf %242, %243 : vector<16x1xf32>
    %245 = vector.broadcast %244 : vector<16x1xf32> to vector<16x32xf32>
    %246 = arith.subf %240, %245 : vector<16x32xf32>
    %247 = arith.mulf %246, %246 : vector<16x32xf32>
    %cst_139 = arith.constant dense<0.000000e+00> : vector<16xf32>
    %248 = vector.multi_reduction <add>, %247, %cst_139 [1] : vector<16x32xf32> to vector<16xf32>
    %249 = vector.shape_cast %248 : vector<16xf32> to vector<16x1xf32>
    %cst_140 = arith.constant 3.200000e+01 : f32
    %250 = vector.broadcast %cst_140 : f32 to vector<16x1xf32>
    %251 = arith.divf %249, %250 : vector<16x1xf32>
    %252 = vector.broadcast %244 : vector<16x1xf32> to vector<16x32xf32>
    %253 = arith.subf %240, %252 : vector<16x32xf32>
    %cst_141 = arith.constant 9.99999974E-6 : f32
    %254 = vector.broadcast %cst_141 : f32 to vector<16x1xf32>
    %255 = arith.addf %251, %254 : vector<16x1xf32>
    %256 = math.rsqrt %255 : vector<16x1xf32>
    %257 = vector.broadcast %256 : vector<16x1xf32> to vector<16x32xf32>
    %258 = arith.mulf %253, %257 : vector<16x32xf32>
    %c0_142 = arith.constant 0 : index
    %c0_143 = arith.constant 0 : index
    %c0_144 = arith.constant 0 : index
    %259 = vector.load %arg12[%c0_142, %c0_143, %c0_144] : memref<2x1x32xf32, #tpu.memory_space<vmem>>, vector<1x1x32xf32>
    %260 = vector.shape_cast %259 : vector<1x1x32xf32> to vector<1x32xf32>
    %261 = vector.broadcast %260 : vector<1x32xf32> to vector<16x32xf32>
    %262 = arith.mulf %258, %261 : vector<16x32xf32>
    %c0_145 = arith.constant 0 : index
    %c0_146 = arith.constant 0 : index
    %c0_147 = arith.constant 0 : index
    %263 = vector.load %arg13[%c0_145, %c0_146, %c0_147] : memref<2x1x32xf32, #tpu.memory_space<vmem>>, vector<1x1x32xf32>
    %264 = vector.shape_cast %263 : vector<1x1x32xf32> to vector<1x32xf32>
    %265 = vector.broadcast %264 : vector<1x32xf32> to vector<16x32xf32>
    %266 = arith.addf %262, %265 : vector<16x32xf32>
    %267 = arith.truncf %266 : vector<16x32xf32> to vector<16x32xbf16>
    %c1 = arith.constant 1 : index
    %c0_148 = arith.constant 0 : index
    %c0_149 = arith.constant 0 : index
    %268 = vector.load %arg2[%c1, %c0_148, %c0_149] : memref<2x32x96xbf16, #tpu.memory_space<vmem>>, vector<1x32x96xbf16>
    %269 = vector.shape_cast %268 : vector<1x32x96xbf16> to vector<32x96xbf16>
    %cst_150 = arith.constant dense<0.000000e+00> : vector<16x96xf32>
    %270 = tpu.matmul %267, %269, %cst_150 {dimension_numbers = #tpu.dot_dimension_numbers<[1], [0], [0], [1], [0, 0, 1, 1], [], []>} : vector<16x32xbf16>, vector<32x96xbf16>, vector<16x96xf32> -> vector<16x96xf32>
    %c1_151 = arith.constant 1 : index
    %c0_152 = arith.constant 0 : index
    %c0_153 = arith.constant 0 : index
    %271 = vector.load %arg3[%c1_151, %c0_152, %c0_153] : memref<2x1x96xf32, #tpu.memory_space<vmem>>, vector<1x1x96xf32>
    %272 = vector.shape_cast %271 : vector<1x1x96xf32> to vector<1x96xf32>
    %273 = vector.broadcast %272 : vector<1x96xf32> to vector<16x96xf32>
    %274 = arith.addf %270, %273 : vector<16x96xf32>
    %c0_154 = arith.constant 0 : index
    %c0_155 = arith.constant 0 : index
    %275 = vector.load %arg17[%c0_154, %c0_155] : memref<16x96xf32, #tpu.memory_space<vmem>>, vector<16x96xf32>
    tpu.vector_store %arg17[%c0_154, %c0_155], %274 {strides = array<i32>} : memref<16x96xf32, #tpu.memory_space<vmem>>, vector<16x96xf32>,
    %c0_156 = arith.constant 0 : index
    %c0_157 = arith.constant 0 : index
    %276 = vector.load %arg17[%c0_156, %c0_157] : memref<16x96xf32, #tpu.memory_space<vmem>>, vector<8x8xf32>
    %277 = arith.truncf %276 : vector<8x8xf32> to vector<8x8xbf16>
    %c0_158 = arith.constant 0 : index
    %c32_159 = arith.constant 32 : index
    %278 = vector.load %arg17[%c0_158, %c32_159] : memref<16x96xf32, #tpu.memory_space<vmem>>, vector<8x8xf32>
    %279 = arith.truncf %278 : vector<8x8xf32> to vector<8x8xbf16>
    %c0_160 = arith.constant 0 : index
    %c64_161 = arith.constant 64 : index
    %280 = vector.load %arg17[%c0_160, %c64_161] : memref<16x96xf32, #tpu.memory_space<vmem>>, vector<8x8xf32>
    %281 = arith.truncf %280 : vector<8x8xf32> to vector<8x8xbf16>
    %cst_162 = arith.constant dense<0.000000e+00> : vector<8x8xf32>
    %282 = tpu.matmul %277, %279, %cst_162 {dimension_numbers = #tpu.dot_dimension_numbers<[1], [1], [0], [0], [0, 0, 1, 0], [], []>} : vector<8x8xbf16>, vector<8x8xbf16>, vector<8x8xf32> -> vector<8x8xf32>
    %cst_163 = arith.constant 0.353553385 : f32
    %283 = vector.broadcast %cst_163 : f32 to vector<8x8xf32>
    %284 = arith.mulf %282, %283 : vector<8x8xf32>
    %cst_164 = arith.constant dense<0xFF800000> : vector<8xf32>
    %285 = vector.multi_reduction <maximumf>, %284, %cst_164 [1] : vector<8x8xf32> to vector<8xf32>
    %286 = vector.shape_cast %285 : vector<8xf32> to vector<8x1xf32>
    %287 = vector.broadcast %286 : vector<8x1xf32> to vector<8x8xf32>
    %288 = arith.subf %284, %287 : vector<8x8xf32>
    %289 = math.exp %288 : vector<8x8xf32>
    %cst_165 = arith.constant dense<0.000000e+00> : vector<8xf32>
    %290 = vector.multi_reduction <add>, %289, %cst_165 [1] : vector<8x8xf32> to vector<8xf32>
    %291 = vector.shape_cast %290 : vector<8xf32> to vector<8x1xf32>
    %292 = tpu.reciprocal %291 {approx = true} : vector<8x1xf32> -> vector<8x1xf32>
    %293 = vector.broadcast %292 : vector<8x1xf32> to vector<8x8xf32>
    %294 = arith.mulf %289, %293 : vector<8x8xf32>
    %295 = arith.truncf %294 : vector<8x8xf32> to vector<8x8xbf16>
    %cst_166 = arith.constant dense<0.000000e+00> : vector<8x8xf32>
    %296 = tpu.matmul %295, %281, %cst_166 {dimension_numbers = #tpu.dot_dimension_numbers<[1], [0], [0], [1], [0, 0, 1, 1], [], []>} : vector<8x8xbf16>, vector<8x8xbf16>, vector<8x8xf32> -> vector<8x8xf32>
    %c0_167 = arith.constant 0 : index
    %c0_168 = arith.constant 0 : index
    %297 = vector.load %arg18[%c0_167, %c0_168] : memref<16x32xf32, #tpu.memory_space<vmem>>, vector<8x8xf32>
    tpu.vector_store %arg18[%c0_167, %c0_168], %296 {strides = array<i32>} : memref<16x32xf32, #tpu.memory_space<vmem>>, vector<8x8xf32>,
    %c0_169 = arith.constant 0 : index
    %c8_170 = arith.constant 8 : index
    %298 = vector.load %arg17[%c0_169, %c8_170] : memref<16x96xf32, #tpu.memory_space<vmem>>, vector<8x8xf32>
    %299 = arith.truncf %298 : vector<8x8xf32> to vector<8x8xbf16>
    %c0_171 = arith.constant 0 : index
    %c40_172 = arith.constant 40 : index
    %300 = vector.load %arg17[%c0_171, %c40_172] : memref<16x96xf32, #tpu.memory_space<vmem>>, vector<8x8xf32>
    %301 = arith.truncf %300 : vector<8x8xf32> to vector<8x8xbf16>
    %c0_173 = arith.constant 0 : index
    %c72_174 = arith.constant 72 : index
    %302 = vector.load %arg17[%c0_173, %c72_174] : memref<16x96xf32, #tpu.memory_space<vmem>>, vector<8x8xf32>
    %303 = arith.truncf %302 : vector<8x8xf32> to vector<8x8xbf16>
    %cst_175 = arith.constant dense<0.000000e+00> : vector<8x8xf32>
    %304 = tpu.matmul %299, %301, %cst_175 {dimension_numbers = #tpu.dot_dimension_numbers<[1], [1], [0], [0], [0, 0, 1, 0], [], []>} : vector<8x8xbf16>, vector<8x8xbf16>, vector<8x8xf32> -> vector<8x8xf32>
    %cst_176 = arith.constant 0.353553385 : f32
    %305 = vector.broadcast %cst_176 : f32 to vector<8x8xf32>
    %306 = arith.mulf %304, %305 : vector<8x8xf32>
    %cst_177 = arith.constant dense<0xFF800000> : vector<8xf32>
    %307 = vector.multi_reduction <maximumf>, %306, %cst_177 [1] : vector<8x8xf32> to vector<8xf32>
    %308 = vector.shape_cast %307 : vector<8xf32> to vector<8x1xf32>
    %309 = vector.broadcast %308 : vector<8x1xf32> to vector<8x8xf32>
    %310 = arith.subf %306, %309 : vector<8x8xf32>
    %311 = math.exp %310 : vector<8x8xf32>
    %cst_178 = arith.constant dense<0.000000e+00> : vector<8xf32>
    %312 = vector.multi_reduction <add>, %311, %cst_178 [1] : vector<8x8xf32> to vector<8xf32>
    %313 = vector.shape_cast %312 : vector<8xf32> to vector<8x1xf32>
    %314 = tpu.reciprocal %313 {approx = true} : vector<8x1xf32> -> vector<8x1xf32>
    %315 = vector.broadcast %314 : vector<8x1xf32> to vector<8x8xf32>
    %316 = arith.mulf %311, %315 : vector<8x8xf32>
    %317 = arith.truncf %316 : vector<8x8xf32> to vector<8x8xbf16>
    %cst_179 = arith.constant dense<0.000000e+00> : vector<8x8xf32>
    %318 = tpu.matmul %317, %303, %cst_179 {dimension_numbers = #tpu.dot_dimension_numbers<[1], [0], [0], [1], [0, 0, 1, 1], [], []>} : vector<8x8xbf16>, vector<8x8xbf16>, vector<8x8xf32> -> vector<8x8xf32>
    %c0_180 = arith.constant 0 : index
    %c8_181 = arith.constant 8 : index
    %319 = vector.load %arg18[%c0_180, %c8_181] : memref<16x32xf32, #tpu.memory_space<vmem>>, vector<8x8xf32>
    tpu.vector_store %arg18[%c0_180, %c8_181], %318 {strides = array<i32>} : memref<16x32xf32, #tpu.memory_space<vmem>>, vector<8x8xf32>,
    %c0_182 = arith.constant 0 : index
    %c16_183 = arith.constant 16 : index
    %320 = vector.load %arg17[%c0_182, %c16_183] : memref<16x96xf32, #tpu.memory_space<vmem>>, vector<8x8xf32>
    %321 = arith.truncf %320 : vector<8x8xf32> to vector<8x8xbf16>
    %c0_184 = arith.constant 0 : index
    %c48_185 = arith.constant 48 : index
    %322 = vector.load %arg17[%c0_184, %c48_185] : memref<16x96xf32, #tpu.memory_space<vmem>>, vector<8x8xf32>
    %323 = arith.truncf %322 : vector<8x8xf32> to vector<8x8xbf16>
    %c0_186 = arith.constant 0 : index
    %c80_187 = arith.constant 80 : index
    %324 = vector.load %arg17[%c0_186, %c80_187] : memref<16x96xf32, #tpu.memory_space<vmem>>, vector<8x8xf32>
    %325 = arith.truncf %324 : vector<8x8xf32> to vector<8x8xbf16>
    %cst_188 = arith.constant dense<0.000000e+00> : vector<8x8xf32>
    %326 = tpu.matmul %321, %323, %cst_188 {dimension_numbers = #tpu.dot_dimension_numbers<[1], [1], [0], [0], [0, 0, 1, 0], [], []>} : vector<8x8xbf16>, vector<8x8xbf16>, vector<8x8xf32> -> vector<8x8xf32>
    %cst_189 = arith.constant 0.353553385 : f32
    %327 = vector.broadcast %cst_189 : f32 to vector<8x8xf32>
    %328 = arith.mulf %326, %327 : vector<8x8xf32>
    %cst_190 = arith.constant dense<0xFF800000> : vector<8xf32>
    %329 = vector.multi_reduction <maximumf>, %328, %cst_190 [1] : vector<8x8xf32> to vector<8xf32>
    %330 = vector.shape_cast %329 : vector<8xf32> to vector<8x1xf32>
    %331 = vector.broadcast %330 : vector<8x1xf32> to vector<8x8xf32>
    %332 = arith.subf %328, %331 : vector<8x8xf32>
    %333 = math.exp %332 : vector<8x8xf32>
    %cst_191 = arith.constant dense<0.000000e+00> : vector<8xf32>
    %334 = vector.multi_reduction <add>, %333, %cst_191 [1] : vector<8x8xf32> to vector<8xf32>
    %335 = vector.shape_cast %334 : vector<8xf32> to vector<8x1xf32>
    %336 = tpu.reciprocal %335 {approx = true} : vector<8x1xf32> -> vector<8x1xf32>
    %337 = vector.broadcast %336 : vector<8x1xf32> to vector<8x8xf32>
    %338 = arith.mulf %333, %337 : vector<8x8xf32>
    %339 = arith.truncf %338 : vector<8x8xf32> to vector<8x8xbf16>
    %cst_192 = arith.constant dense<0.000000e+00> : vector<8x8xf32>
    %340 = tpu.matmul %339, %325, %cst_192 {dimension_numbers = #tpu.dot_dimension_numbers<[1], [0], [0], [1], [0, 0, 1, 1], [], []>} : vector<8x8xbf16>, vector<8x8xbf16>, vector<8x8xf32> -> vector<8x8xf32>
    %c0_193 = arith.constant 0 : index
    %c16_194 = arith.constant 16 : index
    %341 = vector.load %arg18[%c0_193, %c16_194] : memref<16x32xf32, #tpu.memory_space<vmem>>, vector<8x8xf32>
    tpu.vector_store %arg18[%c0_193, %c16_194], %340 {strides = array<i32>} : memref<16x32xf32, #tpu.memory_space<vmem>>, vector<8x8xf32>,
    %c0_195 = arith.constant 0 : index
    %c24_196 = arith.constant 24 : index
    %342 = vector.load %arg17[%c0_195, %c24_196] : memref<16x96xf32, #tpu.memory_space<vmem>>, vector<8x8xf32>
    %343 = arith.truncf %342 : vector<8x8xf32> to vector<8x8xbf16>
    %c0_197 = arith.constant 0 : index
    %c56_198 = arith.constant 56 : index
    %344 = vector.load %arg17[%c0_197, %c56_198] : memref<16x96xf32, #tpu.memory_space<vmem>>, vector<8x8xf32>
    %345 = arith.truncf %344 : vector<8x8xf32> to vector<8x8xbf16>
    %c0_199 = arith.constant 0 : index
    %c88_200 = arith.constant 88 : index
    %346 = vector.load %arg17[%c0_199, %c88_200] : memref<16x96xf32, #tpu.memory_space<vmem>>, vector<8x8xf32>
    %347 = arith.truncf %346 : vector<8x8xf32> to vector<8x8xbf16>
    %cst_201 = arith.constant dense<0.000000e+00> : vector<8x8xf32>
    %348 = tpu.matmul %343, %345, %cst_201 {dimension_numbers = #tpu.dot_dimension_numbers<[1], [1], [0], [0], [0, 0, 1, 0], [], []>} : vector<8x8xbf16>, vector<8x8xbf16>, vector<8x8xf32> -> vector<8x8xf32>
    %cst_202 = arith.constant 0.353553385 : f32
    %349 = vector.broadcast %cst_202 : f32 to vector<8x8xf32>
    %350 = arith.mulf %348, %349 : vector<8x8xf32>
    %cst_203 = arith.constant dense<0xFF800000> : vector<8xf32>
    %351 = vector.multi_reduction <maximumf>, %350, %cst_203 [1] : vector<8x8xf32> to vector<8xf32>
    %352 = vector.shape_cast %351 : vector<8xf32> to vector<8x1xf32>
    %353 = vector.broadcast %352 : vector<8x1xf32> to vector<8x8xf32>
    %354 = arith.subf %350, %353 : vector<8x8xf32>
    %355 = math.exp %354 : vector<8x8xf32>
    %cst_204 = arith.constant dense<0.000000e+00> : vector<8xf32>
    %356 = vector.multi_reduction <add>, %355, %cst_204 [1] : vector<8x8xf32> to vector<8xf32>
    %357 = vector.shape_cast %356 : vector<8xf32> to vector<8x1xf32>
    %358 = tpu.reciprocal %357 {approx = true} : vector<8x1xf32> -> vector<8x1xf32>
    %359 = vector.broadcast %358 : vector<8x1xf32> to vector<8x8xf32>
    %360 = arith.mulf %355, %359 : vector<8x8xf32>
    %361 = arith.truncf %360 : vector<8x8xf32> to vector<8x8xbf16>
    %cst_205 = arith.constant dense<0.000000e+00> : vector<8x8xf32>
    %362 = tpu.matmul %361, %347, %cst_205 {dimension_numbers = #tpu.dot_dimension_numbers<[1], [0], [0], [1], [0, 0, 1, 1], [], []>} : vector<8x8xbf16>, vector<8x8xbf16>, vector<8x8xf32> -> vector<8x8xf32>
    %c0_206 = arith.constant 0 : index
    %c24_207 = arith.constant 24 : index
    %363 = vector.load %arg18[%c0_206, %c24_207] : memref<16x32xf32, #tpu.memory_space<vmem>>, vector<8x8xf32>
    tpu.vector_store %arg18[%c0_206, %c24_207], %362 {strides = array<i32>} : memref<16x32xf32, #tpu.memory_space<vmem>>, vector<8x8xf32>,
    %c8_208 = arith.constant 8 : index
    %c0_209 = arith.constant 0 : index
    %364 = vector.load %arg17[%c8_208, %c0_209] : memref<16x96xf32, #tpu.memory_space<vmem>>, vector<8x8xf32>
    %365 = arith.truncf %364 : vector<8x8xf32> to vector<8x8xbf16>
    %c8_210 = arith.constant 8 : index
    %c32_211 = arith.constant 32 : index
    %366 = vector.load %arg17[%c8_210, %c32_211] : memref<16x96xf32, #tpu.memory_space<vmem>>, vector<8x8xf32>
    %367 = arith.truncf %366 : vector<8x8xf32> to vector<8x8xbf16>
    %c8_212 = arith.constant 8 : index
    %c64_213 = arith.constant 64 : index
    %368 = vector.load %arg17[%c8_212, %c64_213] : memref<16x96xf32, #tpu.memory_space<vmem>>, vector<8x8xf32>
    %369 = arith.truncf %368 : vector<8x8xf32> to vector<8x8xbf16>
    %cst_214 = arith.constant dense<0.000000e+00> : vector<8x8xf32>
    %370 = tpu.matmul %365, %367, %cst_214 {dimension_numbers = #tpu.dot_dimension_numbers<[1], [1], [0], [0], [0, 0, 1, 0], [], []>} : vector<8x8xbf16>, vector<8x8xbf16>, vector<8x8xf32> -> vector<8x8xf32>
    %cst_215 = arith.constant 0.353553385 : f32
    %371 = vector.broadcast %cst_215 : f32 to vector<8x8xf32>
    %372 = arith.mulf %370, %371 : vector<8x8xf32>
    %cst_216 = arith.constant dense<0xFF800000> : vector<8xf32>
    %373 = vector.multi_reduction <maximumf>, %372, %cst_216 [1] : vector<8x8xf32> to vector<8xf32>
    %374 = vector.shape_cast %373 : vector<8xf32> to vector<8x1xf32>
    %375 = vector.broadcast %374 : vector<8x1xf32> to vector<8x8xf32>
    %376 = arith.subf %372, %375 : vector<8x8xf32>
    %377 = math.exp %376 : vector<8x8xf32>
    %cst_217 = arith.constant dense<0.000000e+00> : vector<8xf32>
    %378 = vector.multi_reduction <add>, %377, %cst_217 [1] : vector<8x8xf32> to vector<8xf32>
    %379 = vector.shape_cast %378 : vector<8xf32> to vector<8x1xf32>
    %380 = tpu.reciprocal %379 {approx = true} : vector<8x1xf32> -> vector<8x1xf32>
    %381 = vector.broadcast %380 : vector<8x1xf32> to vector<8x8xf32>
    %382 = arith.mulf %377, %381 : vector<8x8xf32>
    %383 = arith.truncf %382 : vector<8x8xf32> to vector<8x8xbf16>
    %cst_218 = arith.constant dense<0.000000e+00> : vector<8x8xf32>
    %384 = tpu.matmul %383, %369, %cst_218 {dimension_numbers = #tpu.dot_dimension_numbers<[1], [0], [0], [1], [0, 0, 1, 1], [], []>} : vector<8x8xbf16>, vector<8x8xbf16>, vector<8x8xf32> -> vector<8x8xf32>
    %c8_219 = arith.constant 8 : index
    %c0_220 = arith.constant 0 : index
    %385 = vector.load %arg18[%c8_219, %c0_220] : memref<16x32xf32, #tpu.memory_space<vmem>>, vector<8x8xf32>
    tpu.vector_store %arg18[%c8_219, %c0_220], %384 {strides = array<i32>} : memref<16x32xf32, #tpu.memory_space<vmem>>, vector<8x8xf32>,
    %c8_221 = arith.constant 8 : index
    %c8_222 = arith.constant 8 : index
    %386 = vector.load %arg17[%c8_221, %c8_222] : memref<16x96xf32, #tpu.memory_space<vmem>>, vector<8x8xf32>
    %387 = arith.truncf %386 : vector<8x8xf32> to vector<8x8xbf16>
    %c8_223 = arith.constant 8 : index
    %c40_224 = arith.constant 40 : index
    %388 = vector.load %arg17[%c8_223, %c40_224] : memref<16x96xf32, #tpu.memory_space<vmem>>, vector<8x8xf32>
    %389 = arith.truncf %388 : vector<8x8xf32> to vector<8x8xbf16>
    %c8_225 = arith.constant 8 : index
    %c72_226 = arith.constant 72 : index
    %390 = vector.load %arg17[%c8_225, %c72_226] : memref<16x96xf32, #tpu.memory_space<vmem>>, vector<8x8xf32>
    %391 = arith.truncf %390 : vector<8x8xf32> to vector<8x8xbf16>
    %cst_227 = arith.constant dense<0.000000e+00> : vector<8x8xf32>
    %392 = tpu.matmul %387, %389, %cst_227 {dimension_numbers = #tpu.dot_dimension_numbers<[1], [1], [0], [0], [0, 0, 1, 0], [], []>} : vector<8x8xbf16>, vector<8x8xbf16>, vector<8x8xf32> -> vector<8x8xf32>
    %cst_228 = arith.constant 0.353553385 : f32
    %393 = vector.broadcast %cst_228 : f32 to vector<8x8xf32>
    %394 = arith.mulf %392, %393 : vector<8x8xf32>
    %cst_229 = arith.constant dense<0xFF800000> : vector<8xf32>
    %395 = vector.multi_reduction <maximumf>, %394, %cst_229 [1] : vector<8x8xf32> to vector<8xf32>
    %396 = vector.shape_cast %395 : vector<8xf32> to vector<8x1xf32>
    %397 = vector.broadcast %396 : vector<8x1xf32> to vector<8x8xf32>
    %398 = arith.subf %394, %397 : vector<8x8xf32>
    %399 = math.exp %398 : vector<8x8xf32>
    %cst_230 = arith.constant dense<0.000000e+00> : vector<8xf32>
    %400 = vector.multi_reduction <add>, %399, %cst_230 [1] : vector<8x8xf32> to vector<8xf32>
    %401 = vector.shape_cast %400 : vector<8xf32> to vector<8x1xf32>
    %402 = tpu.reciprocal %401 {approx = true} : vector<8x1xf32> -> vector<8x1xf32>
    %403 = vector.broadcast %402 : vector<8x1xf32> to vector<8x8xf32>
    %404 = arith.mulf %399, %403 : vector<8x8xf32>
    %405 = arith.truncf %404 : vector<8x8xf32> to vector<8x8xbf16>
    %cst_231 = arith.constant dense<0.000000e+00> : vector<8x8xf32>
    %406 = tpu.matmul %405, %391, %cst_231 {dimension_numbers = #tpu.dot_dimension_numbers<[1], [0], [0], [1], [0, 0, 1, 1], [], []>} : vector<8x8xbf16>, vector<8x8xbf16>, vector<8x8xf32> -> vector<8x8xf32>
    %c8_232 = arith.constant 8 : index
    %c8_233 = arith.constant 8 : index
    %407 = vector.load %arg18[%c8_232, %c8_233] : memref<16x32xf32, #tpu.memory_space<vmem>>, vector<8x8xf32>
    tpu.vector_store %arg18[%c8_232, %c8_233], %406 {strides = array<i32>} : memref<16x32xf32, #tpu.memory_space<vmem>>, vector<8x8xf32>,
    %c8_234 = arith.constant 8 : index
    %c16_235 = arith.constant 16 : index
    %408 = vector.load %arg17[%c8_234, %c16_235] : memref<16x96xf32, #tpu.memory_space<vmem>>, vector<8x8xf32>
    %409 = arith.truncf %408 : vector<8x8xf32> to vector<8x8xbf16>
    %c8_236 = arith.constant 8 : index
    %c48_237 = arith.constant 48 : index
    %410 = vector.load %arg17[%c8_236, %c48_237] : memref<16x96xf32, #tpu.memory_space<vmem>>, vector<8x8xf32>
    %411 = arith.truncf %410 : vector<8x8xf32> to vector<8x8xbf16>
    %c8_238 = arith.constant 8 : index
    %c80_239 = arith.constant 80 : index
    %412 = vector.load %arg17[%c8_238, %c80_239] : memref<16x96xf32, #tpu.memory_space<vmem>>, vector<8x8xf32>
    %413 = arith.truncf %412 : vector<8x8xf32> to vector<8x8xbf16>
    %cst_240 = arith.constant dense<0.000000e+00> : vector<8x8xf32>
    %414 = tpu.matmul %409, %411, %cst_240 {dimension_numbers = #tpu.dot_dimension_numbers<[1], [1], [0], [0], [0, 0, 1, 0], [], []>} : vector<8x8xbf16>, vector<8x8xbf16>, vector<8x8xf32> -> vector<8x8xf32>
    %cst_241 = arith.constant 0.353553385 : f32
    %415 = vector.broadcast %cst_241 : f32 to vector<8x8xf32>
    %416 = arith.mulf %414, %415 : vector<8x8xf32>
    %cst_242 = arith.constant dense<0xFF800000> : vector<8xf32>
    %417 = vector.multi_reduction <maximumf>, %416, %cst_242 [1] : vector<8x8xf32> to vector<8xf32>
    %418 = vector.shape_cast %417 : vector<8xf32> to vector<8x1xf32>
    %419 = vector.broadcast %418 : vector<8x1xf32> to vector<8x8xf32>
    %420 = arith.subf %416, %419 : vector<8x8xf32>
    %421 = math.exp %420 : vector<8x8xf32>
    %cst_243 = arith.constant dense<0.000000e+00> : vector<8xf32>
    %422 = vector.multi_reduction <add>, %421, %cst_243 [1] : vector<8x8xf32> to vector<8xf32>
    %423 = vector.shape_cast %422 : vector<8xf32> to vector<8x1xf32>
    %424 = tpu.reciprocal %423 {approx = true} : vector<8x1xf32> -> vector<8x1xf32>
    %425 = vector.broadcast %424 : vector<8x1xf32> to vector<8x8xf32>
    %426 = arith.mulf %421, %425 : vector<8x8xf32>
    %427 = arith.truncf %426 : vector<8x8xf32> to vector<8x8xbf16>
    %cst_244 = arith.constant dense<0.000000e+00> : vector<8x8xf32>
    %428 = tpu.matmul %427, %413, %cst_244 {dimension_numbers = #tpu.dot_dimension_numbers<[1], [0], [0], [1], [0, 0, 1, 1], [], []>} : vector<8x8xbf16>, vector<8x8xbf16>, vector<8x8xf32> -> vector<8x8xf32>
    %c8_245 = arith.constant 8 : index
    %c16_246 = arith.constant 16 : index
    %429 = vector.load %arg18[%c8_245, %c16_246] : memref<16x32xf32, #tpu.memory_space<vmem>>, vector<8x8xf32>
    tpu.vector_store %arg18[%c8_245, %c16_246], %428 {strides = array<i32>} : memref<16x32xf32, #tpu.memory_space<vmem>>, vector<8x8xf32>,
    %c8_247 = arith.constant 8 : index
    %c24_248 = arith.constant 24 : index
    %430 = vector.load %arg17[%c8_247, %c24_248] : memref<16x96xf32, #tpu.memory_space<vmem>>, vector<8x8xf32>
    %431 = arith.truncf %430 : vector<8x8xf32> to vector<8x8xbf16>
    %c8_249 = arith.constant 8 : index
    %c56_250 = arith.constant 56 : index
    %432 = vector.load %arg17[%c8_249, %c56_250] : memref<16x96xf32, #tpu.memory_space<vmem>>, vector<8x8xf32>
    %433 = arith.truncf %432 : vector<8x8xf32> to vector<8x8xbf16>
    %c8_251 = arith.constant 8 : index
    %c88_252 = arith.constant 88 : index
    %434 = vector.load %arg17[%c8_251, %c88_252] : memref<16x96xf32, #tpu.memory_space<vmem>>, vector<8x8xf32>
    %435 = arith.truncf %434 : vector<8x8xf32> to vector<8x8xbf16>
    %cst_253 = arith.constant dense<0.000000e+00> : vector<8x8xf32>
    %436 = tpu.matmul %431, %433, %cst_253 {dimension_numbers = #tpu.dot_dimension_numbers<[1], [1], [0], [0], [0, 0, 1, 0], [], []>} : vector<8x8xbf16>, vector<8x8xbf16>, vector<8x8xf32> -> vector<8x8xf32>
    %cst_254 = arith.constant 0.353553385 : f32
    %437 = vector.broadcast %cst_254 : f32 to vector<8x8xf32>
    %438 = arith.mulf %436, %437 : vector<8x8xf32>
    %cst_255 = arith.constant dense<0xFF800000> : vector<8xf32>
    %439 = vector.multi_reduction <maximumf>, %438, %cst_255 [1] : vector<8x8xf32> to vector<8xf32>
    %440 = vector.shape_cast %439 : vector<8xf32> to vector<8x1xf32>
    %441 = vector.broadcast %440 : vector<8x1xf32> to vector<8x8xf32>
    %442 = arith.subf %438, %441 : vector<8x8xf32>
    %443 = math.exp %442 : vector<8x8xf32>
    %cst_256 = arith.constant dense<0.000000e+00> : vector<8xf32>
    %444 = vector.multi_reduction <add>, %443, %cst_256 [1] : vector<8x8xf32> to vector<8xf32>
    %445 = vector.shape_cast %444 : vector<8xf32> to vector<8x1xf32>
    %446 = tpu.reciprocal %445 {approx = true} : vector<8x1xf32> -> vector<8x1xf32>
    %447 = vector.broadcast %446 : vector<8x1xf32> to vector<8x8xf32>
    %448 = arith.mulf %443, %447 : vector<8x8xf32>
    %449 = arith.truncf %448 : vector<8x8xf32> to vector<8x8xbf16>
    %cst_257 = arith.constant dense<0.000000e+00> : vector<8x8xf32>
    %450 = tpu.matmul %449, %435, %cst_257 {dimension_numbers = #tpu.dot_dimension_numbers<[1], [0], [0], [1], [0, 0, 1, 1], [], []>} : vector<8x8xbf16>, vector<8x8xbf16>, vector<8x8xf32> -> vector<8x8xf32>
    %c8_258 = arith.constant 8 : index
    %c24_259 = arith.constant 24 : index
    %451 = vector.load %arg18[%c8_258, %c24_259] : memref<16x32xf32, #tpu.memory_space<vmem>>, vector<8x8xf32>
    tpu.vector_store %arg18[%c8_258, %c24_259], %450 {strides = array<i32>} : memref<16x32xf32, #tpu.memory_space<vmem>>, vector<8x8xf32>,
    %c0_260 = arith.constant 0 : index
    %c0_261 = arith.constant 0 : index
    %452 = vector.load %arg18[%c0_260, %c0_261] : memref<16x32xf32, #tpu.memory_space<vmem>>, vector<16x32xf32>
    %453 = arith.truncf %452 : vector<16x32xf32> to vector<16x32xbf16>
    %c1_262 = arith.constant 1 : index
    %c0_263 = arith.constant 0 : index
    %c0_264 = arith.constant 0 : index
    %454 = vector.load %arg4[%c1_262, %c0_263, %c0_264] : memref<2x32x32xbf16, #tpu.memory_space<vmem>>, vector<1x32x32xbf16>
    %455 = vector.shape_cast %454 : vector<1x32x32xbf16> to vector<32x32xbf16>
    %cst_265 = arith.constant dense<0.000000e+00> : vector<16x32xf32>
    %456 = tpu.matmul %453, %455, %cst_265 {dimension_numbers = #tpu.dot_dimension_numbers<[1], [0], [0], [1], [0, 0, 1, 1], [], []>} : vector<16x32xbf16>, vector<32x32xbf16>, vector<16x32xf32> -> vector<16x32xf32>
    %c1_266 = arith.constant 1 : index
    %c0_267 = arith.constant 0 : index
    %c0_268 = arith.constant 0 : index
    %457 = vector.load %arg5[%c1_266, %c0_267, %c0_268] : memref<2x1x32xf32, #tpu.memory_space<vmem>>, vector<1x1x32xf32>
    %458 = vector.shape_cast %457 : vector<1x1x32xf32> to vector<1x32xf32>
    %459 = vector.broadcast %458 : vector<1x32xf32> to vector<16x32xf32>
    %460 = arith.addf %456, %459 : vector<16x32xf32>
    %461 = arith.addf %266, %460 : vector<16x32xf32>
    %cst_269 = arith.constant dense<0.000000e+00> : vector<16xf32>
    %462 = vector.multi_reduction <add>, %461, %cst_269 [1] : vector<16x32xf32> to vector<16xf32>
    %463 = vector.shape_cast %462 : vector<16xf32> to vector<16x1xf32>
    %cst_270 = arith.constant 3.200000e+01 : f32
    %464 = vector.broadcast %cst_270 : f32 to vector<16x1xf32>
    %465 = arith.divf %463, %464 : vector<16x1xf32>
    %466 = vector.broadcast %465 : vector<16x1xf32> to vector<16x32xf32>
    %467 = arith.subf %461, %466 : vector<16x32xf32>
    %468 = arith.mulf %467, %467 : vector<16x32xf32>
    %cst_271 = arith.constant dense<0.000000e+00> : vector<16xf32>
    %469 = vector.multi_reduction <add>, %468, %cst_271 [1] : vector<16x32xf32> to vector<16xf32>
    %470 = vector.shape_cast %469 : vector<16xf32> to vector<16x1xf32>
    %cst_272 = arith.constant 3.200000e+01 : f32
    %471 = vector.broadcast %cst_272 : f32 to vector<16x1xf32>
    %472 = arith.divf %470, %471 : vector<16x1xf32>
    %473 = vector.broadcast %465 : vector<16x1xf32> to vector<16x32xf32>
    %474 = arith.subf %461, %473 : vector<16x32xf32>
    %cst_273 = arith.constant 9.99999974E-6 : f32
    %475 = vector.broadcast %cst_273 : f32 to vector<16x1xf32>
    %476 = arith.addf %472, %475 : vector<16x1xf32>
    %477 = math.rsqrt %476 : vector<16x1xf32>
    %478 = vector.broadcast %477 : vector<16x1xf32> to vector<16x32xf32>
    %479 = arith.mulf %474, %478 : vector<16x32xf32>
    %c1_274 = arith.constant 1 : index
    %c0_275 = arith.constant 0 : index
    %c0_276 = arith.constant 0 : index
    %480 = vector.load %arg6[%c1_274, %c0_275, %c0_276] : memref<2x1x32xf32, #tpu.memory_space<vmem>>, vector<1x1x32xf32>
    %481 = vector.shape_cast %480 : vector<1x1x32xf32> to vector<1x32xf32>
    %482 = vector.broadcast %481 : vector<1x32xf32> to vector<16x32xf32>
    %483 = arith.mulf %479, %482 : vector<16x32xf32>
    %c1_277 = arith.constant 1 : index
    %c0_278 = arith.constant 0 : index
    %c0_279 = arith.constant 0 : index
    %484 = vector.load %arg7[%c1_277, %c0_278, %c0_279] : memref<2x1x32xf32, #tpu.memory_space<vmem>>, vector<1x1x32xf32>
    %485 = vector.shape_cast %484 : vector<1x1x32xf32> to vector<1x32xf32>
    %486 = vector.broadcast %485 : vector<1x32xf32> to vector<16x32xf32>
    %487 = arith.addf %483, %486 : vector<16x32xf32>
    %488 = arith.truncf %487 : vector<16x32xf32> to vector<16x32xbf16>
    %c1_280 = arith.constant 1 : index
    %c0_281 = arith.constant 0 : index
    %c0_282 = arith.constant 0 : index
    %489 = vector.load %arg8[%c1_280, %c0_281, %c0_282] : memref<2x32x64xbf16, #tpu.memory_space<vmem>>, vector<1x32x64xbf16>
    %490 = vector.shape_cast %489 : vector<1x32x64xbf16> to vector<32x64xbf16>
    %cst_283 = arith.constant dense<0.000000e+00> : vector<16x64xf32>
    %491 = tpu.matmul %488, %490, %cst_283 {dimension_numbers = #tpu.dot_dimension_numbers<[1], [0], [0], [1], [0, 0, 1, 1], [], []>} : vector<16x32xbf16>, vector<32x64xbf16>, vector<16x64xf32> -> vector<16x64xf32>
    %c1_284 = arith.constant 1 : index
    %c0_285 = arith.constant 0 : index
    %c0_286 = arith.constant 0 : index
    %492 = vector.load %arg9[%c1_284, %c0_285, %c0_286] : memref<2x1x64xf32, #tpu.memory_space<vmem>>, vector<1x1x64xf32>
    %493 = vector.shape_cast %492 : vector<1x1x64xf32> to vector<1x64xf32>
    %494 = vector.broadcast %493 : vector<1x64xf32> to vector<16x64xf32>
    %495 = arith.addf %491, %494 : vector<16x64xf32>
    %cst_287 = arith.constant 0.000000e+00 : f32
    %496 = vector.broadcast %cst_287 : f32 to vector<16x64xf32>
    %497 = arith.maximumf %495, %496 : vector<16x64xf32>
    %498 = arith.truncf %497 : vector<16x64xf32> to vector<16x64xbf16>
    %c1_288 = arith.constant 1 : index
    %c0_289 = arith.constant 0 : index
    %c0_290 = arith.constant 0 : index
    %499 = vector.load %arg10[%c1_288, %c0_289, %c0_290] : memref<2x64x32xbf16, #tpu.memory_space<vmem>>, vector<1x64x32xbf16>
    %500 = vector.shape_cast %499 : vector<1x64x32xbf16> to vector<64x32xbf16>
    %cst_291 = arith.constant dense<0.000000e+00> : vector<16x32xf32>
    %501 = tpu.matmul %498, %500, %cst_291 {dimension_numbers = #tpu.dot_dimension_numbers<[1], [0], [0], [1], [0, 0, 1, 1], [], []>} : vector<16x64xbf16>, vector<64x32xbf16>, vector<16x32xf32> -> vector<16x32xf32>
    %c1_292 = arith.constant 1 : index
    %c0_293 = arith.constant 0 : index
    %c0_294 = arith.constant 0 : index
    %502 = vector.load %arg11[%c1_292, %c0_293, %c0_294] : memref<2x1x32xf32, #tpu.memory_space<vmem>>, vector<1x1x32xf32>
    %503 = vector.shape_cast %502 : vector<1x1x32xf32> to vector<1x32xf32>
    %504 = vector.broadcast %503 : vector<1x32xf32> to vector<16x32xf32>
    %505 = arith.addf %501, %504 : vector<16x32xf32>
    %506 = arith.addf %487, %505 : vector<16x32xf32>
    %cst_295 = arith.constant dense<0.000000e+00> : vector<16xf32>
    %507 = vector.multi_reduction <add>, %506, %cst_295 [1] : vector<16x32xf32> to vector<16xf32>
    %508 = vector.shape_cast %507 : vector<16xf32> to vector<16x1xf32>
    %cst_296 = arith.constant 3.200000e+01 : f32
    %509 = vector.broadcast %cst_296 : f32 to vector<16x1xf32>
    %510 = arith.divf %508, %509 : vector<16x1xf32>
    %511 = vector.broadcast %510 : vector<16x1xf32> to vector<16x32xf32>
    %512 = arith.subf %506, %511 : vector<16x32xf32>
    %513 = arith.mulf %512, %512 : vector<16x32xf32>
    %cst_297 = arith.constant dense<0.000000e+00> : vector<16xf32>
    %514 = vector.multi_reduction <add>, %513, %cst_297 [1] : vector<16x32xf32> to vector<16xf32>
    %515 = vector.shape_cast %514 : vector<16xf32> to vector<16x1xf32>
    %cst_298 = arith.constant 3.200000e+01 : f32
    %516 = vector.broadcast %cst_298 : f32 to vector<16x1xf32>
    %517 = arith.divf %515, %516 : vector<16x1xf32>
    %518 = vector.broadcast %510 : vector<16x1xf32> to vector<16x32xf32>
    %519 = arith.subf %506, %518 : vector<16x32xf32>
    %cst_299 = arith.constant 9.99999974E-6 : f32
    %520 = vector.broadcast %cst_299 : f32 to vector<16x1xf32>
    %521 = arith.addf %517, %520 : vector<16x1xf32>
    %522 = math.rsqrt %521 : vector<16x1xf32>
    %523 = vector.broadcast %522 : vector<16x1xf32> to vector<16x32xf32>
    %524 = arith.mulf %519, %523 : vector<16x32xf32>
    %c1_300 = arith.constant 1 : index
    %c0_301 = arith.constant 0 : index
    %c0_302 = arith.constant 0 : index
    %525 = vector.load %arg12[%c1_300, %c0_301, %c0_302] : memref<2x1x32xf32, #tpu.memory_space<vmem>>, vector<1x1x32xf32>
    %526 = vector.shape_cast %525 : vector<1x1x32xf32> to vector<1x32xf32>
    %527 = vector.broadcast %526 : vector<1x32xf32> to vector<16x32xf32>
    %528 = arith.mulf %524, %527 : vector<16x32xf32>
    %c1_303 = arith.constant 1 : index
    %c0_304 = arith.constant 0 : index
    %c0_305 = arith.constant 0 : index
    %529 = vector.load %arg13[%c1_303, %c0_304, %c0_305] : memref<2x1x32xf32, #tpu.memory_space<vmem>>, vector<1x1x32xf32>
    %530 = vector.shape_cast %529 : vector<1x1x32xf32> to vector<1x32xf32>
    %531 = vector.broadcast %530 : vector<1x32xf32> to vector<16x32xf32>
    %532 = arith.addf %528, %531 : vector<16x32xf32>
    %cst_306 = arith.constant dense<0.000000e+00> : vector<16xf32>
    %533 = vector.multi_reduction <add>, %532, %cst_306 [1] : vector<16x32xf32> to vector<16xf32>
    %534 = vector.shape_cast %533 : vector<16xf32> to vector<16x1xf32>
    %cst_307 = arith.constant 3.200000e+01 : f32
    %535 = vector.broadcast %cst_307 : f32 to vector<16x1xf32>
    %536 = arith.divf %534, %535 : vector<16x1xf32>
    %537 = vector.broadcast %536 : vector<16x1xf32> to vector<16x32xf32>
    %538 = arith.subf %532, %537 : vector<16x32xf32>
    %539 = arith.mulf %538, %538 : vector<16x32xf32>
    %cst_308 = arith.constant dense<0.000000e+00> : vector<16xf32>
    %540 = vector.multi_reduction <add>, %539, %cst_308 [1] : vector<16x32xf32> to vector<16xf32>
    %541 = vector.shape_cast %540 : vector<16xf32> to vector<16x1xf32>
    %cst_309 = arith.constant 3.200000e+01 : f32
    %542 = vector.broadcast %cst_309 : f32 to vector<16x1xf32>
    %543 = arith.divf %541, %542 : vector<16x1xf32>
    %544 = vector.broadcast %536 : vector<16x1xf32> to vector<16x32xf32>
    %545 = arith.subf %532, %544 : vector<16x32xf32>
    %cst_310 = arith.constant 9.99999974E-6 : f32
    %546 = vector.broadcast %cst_310 : f32 to vector<16x1xf32>
    %547 = arith.addf %543, %546 : vector<16x1xf32>
    %548 = math.rsqrt %547 : vector<16x1xf32>
    %549 = vector.broadcast %548 : vector<16x1xf32> to vector<16x32xf32>
    %550 = arith.mulf %545, %549 : vector<16x32xf32>
    %c0_311 = arith.constant 0 : index
    %c0_312 = arith.constant 0 : index
    %551 = vector.load %arg14[%c0_311, %c0_312] : memref<1x32xf32, #tpu.memory_space<vmem>>, vector<1x32xf32>
    %552 = vector.broadcast %551 : vector<1x32xf32> to vector<16x32xf32>
    %553 = arith.mulf %550, %552 : vector<16x32xf32>
    %c0_313 = arith.constant 0 : index
    %c0_314 = arith.constant 0 : index
    %554 = vector.load %arg15[%c0_313, %c0_314] : memref<1x32xf32, #tpu.memory_space<vmem>>, vector<1x32xf32>
    %555 = vector.broadcast %554 : vector<1x32xf32> to vector<16x32xf32>
    %556 = arith.addf %553, %555 : vector<16x32xf32>
    %c0_315 = arith.constant 0 : index
    %c0_316 = arith.constant 0 : index
    %557 = vector.load %arg16[%c0_315, %c0_316] : memref<16x32xf32, #tpu.memory_space<vmem>>, vector<16x32xf32>
    tpu.vector_store %arg16[%c0_315, %c0_316], %556 {strides = array<i32>} : memref<16x32xf32, #tpu.memory_space<vmem>>, vector<16x32xf32>,
    return
  }
  func.func @transform_0(%arg0: i32) -> (i32, i32) {
    %c0_i32 = arith.constant 0 : i32
    %c0_i32_0 = arith.constant 0 : i32
    return %arg0, %c0_i32 : i32, i32
  }
  func.func @transform_1(%arg0: i32) -> (i32, i32, i32) {
    %c0_i32 = arith.constant 0 : i32
    %c0_i32_0 = arith.constant 0 : i32
    %c0_i32_1 = arith.constant 0 : i32
    %c0_i32_2 = arith.constant 0 : i32
    return %c0_i32, %c0_i32_0, %c0_i32_1 : i32, i32, i32
  }
  func.func @transform_2(%arg0: i32) -> (i32, i32, i32) {
    %c0_i32 = arith.constant 0 : i32
    %c0_i32_0 = arith.constant 0 : i32
    %c0_i32_1 = arith.constant 0 : i32
    %c0_i32_2 = arith.constant 0 : i32
    return %c0_i32, %c0_i32_0, %c0_i32_1 : i32, i32, i32
  }
  func.func @transform_3(%arg0: i32) -> (i32, i32, i32) {
    %c0_i32 = arith.constant 0 : i32
    %c0_i32_0 = arith.constant 0 : i32
    %c0_i32_1 = arith.constant 0 : i32
    %c0_i32_2 = arith.constant 0 : i32
    return %c0_i32, %c0_i32_0, %c0_i32_1 : i32, i32, i32
  }
  func.func @transform_4(%arg0: i32) -> (i32, i32, i32) {
    %c0_i32 = arith.constant 0 : i32
    %c0_i32_0 = arith.constant 0 : i32
    %c0_i32_1 = arith.constant 0 : i32
    %c0_i32_2 = arith.constant 0 : i32
    return %c0_i32, %c0_i32_0, %c0_i32_1 : i32, i32, i32
  }
  func.func @transform_5(%arg0: i32) -> (i32, i32, i32) {
    %c0_i32 = arith.constant 0 : i32
    %c0_i32_0 = arith.constant 0 : i32
    %c0_i32_1 = arith.constant 0 : i32
    %c0_i32_2 = arith.constant 0 : i32
    return %c0_i32, %c0_i32_0, %c0_i32_1 : i32, i32, i32
  }
  func.func @transform_6(%arg0: i32) -> (i32, i32, i32) {
    %c0_i32 = arith.constant 0 : i32
    %c0_i32_0 = arith.constant 0 : i32
    %c0_i32_1 = arith.constant 0 : i32
    %c0_i32_2 = arith.constant 0 : i32
    return %c0_i32, %c0_i32_0, %c0_i32_1 : i32, i32, i32
  }
  func.func @transform_7(%arg0: i32) -> (i32, i32, i32) {
    %c0_i32 = arith.constant 0 : i32
    %c0_i32_0 = arith.constant 0 : i32
    %c0_i32_1 = arith.constant 0 : i32
    %c0_i32_2 = arith.constant 0 : i32
    return %c0_i32, %c0_i32_0, %c0_i32_1 : i32, i32, i32
  }
  func.func @transform_8(%arg0: i32) -> (i32, i32, i32) {
    %c0_i32 = arith.constant 0 : i32
    %c0_i32_0 = arith.constant 0 : i32
    %c0_i32_1 = arith.constant 0 : i32
    %c0_i32_2 = arith.constant 0 : i32
    return %c0_i32, %c0_i32_0, %c0_i32_1 : i32, i32, i32
  }
  func.func @transform_9(%arg0: i32) -> (i32, i32, i32) {
    %c0_i32 = arith.constant 0 : i32
    %c0_i32_0 = arith.constant 0 : i32
    %c0_i32_1 = arith.constant 0 : i32
    %c0_i32_2 = arith.constant 0 : i32
    return %c0_i32, %c0_i32_0, %c0_i32_1 : i32, i32, i32
  }
  func.func @transform_10(%arg0: i32) -> (i32, i32, i32) {
    %c0_i32 = arith.constant 0 : i32
    %c0_i32_0 = arith.constant 0 : i32
    %c0_i32_1 = arith.constant 0 : i32
    %c0_i32_2 = arith.constant 0 : i32
    return %c0_i32, %c0_i32_0, %c0_i32_1 : i32, i32, i32
  }
  func.func @transform_11(%arg0: i32) -> (i32, i32, i32) {
    %c0_i32 = arith.constant 0 : i32
    %c0_i32_0 = arith.constant 0 : i32
    %c0_i32_1 = arith.constant 0 : i32
    %c0_i32_2 = arith.constant 0 : i32
    return %c0_i32, %c0_i32_0, %c0_i32_1 : i32, i32, i32
  }
  func.func @transform_12(%arg0: i32) -> (i32, i32, i32) {
    %c0_i32 = arith.constant 0 : i32
    %c0_i32_0 = arith.constant 0 : i32
    %c0_i32_1 = arith.constant 0 : i32
    %c0_i32_2 = arith.constant 0 : i32
    return %c0_i32, %c0_i32_0, %c0_i32_1 : i32, i32, i32
  }
  func.func @transform_13(%arg0: i32) -> (i32, i32) {
    %c0_i32 = arith.constant 0 : i32
    %c0_i32_0 = arith.constant 0 : i32
    %c0_i32_1 = arith.constant 0 : i32
    return %c0_i32, %c0_i32_0 : i32, i32
  }
  func.func @transform_14(%arg0: i32) -> (i32, i32) {
    %c0_i32 = arith.constant 0 : i32
    %c0_i32_0 = arith.constant 0 : i32
    %c0_i32_1 = arith.constant 0 : i32
    return %c0_i32, %c0_i32_0 : i32, i32
  }
  func.func @transform_15(%arg0: i32) -> (i32, i32) {
    %c0_i32 = arith.constant 0 : i32
    %c0_i32_0 = arith.constant 0 : i32
    return %arg0, %c0_i32 : i32, i32
  }
}

</mosaic_0001>

<bundles_post_ra>
// kernel: iencoder_forward.1
= control target key start
LH: loop header
LB: loop body
LE: loop exit
PB: predicated region body
PF: predicated region fallthrough
CT: control target
= control target key end

     0   :  { %v3397_v1 = vmov 0.0   ;;  %vm3398_vm0 = vmmov 0   ;;  %vm78_vm1 = vcmask 261120   ;;  %s4114_s0 = inlined_call_operand.vmem [shape: f32[16,32], index: 0, kind: input, shape index: {}]   ;;  %s4115_s1 = inlined_call_operand.vmem [shape: bf16[2,32,96], index: 1, kind: input, shape index: {}]   ;;  %s4116_s2 = inlined_call_operand.vmem [shape: f32[2,1,96], index: 2, kind: input, shape index: {}]   ;;  %s4117_s3 = inlined_call_operand.vmem [shape: bf16[2,32,32], index: 3, kind: input, shape index: {}]   ;;  %s4118_s4 = inlined_call_operand.vmem [shape: f32[2,1,32], index: 4, kind: input, shape index: {}]   ;;  %s4119_s5 = inlined_call_operand.vmem [shape: f32[2,1,32], index: 5, kind: input, shape index: {}]   ;;  %s4120_s6 = inlined_call_operand.vmem [shape: f32[2,1,32], index: 6, kind: input, shape index: {}]   ;;  %s4121_s7 = inlined_call_operand.vmem [shape: bf16[2,32,64], index: 7, kind: input, shape index: {}]   ;;  %s4122_s8 = inlined_call_operand.vmem [shape: f32[2,1,64], index: 8, kind: input, shape index: {}]   ;;  %s4123_s9 = inlined_call_operand.vmem [shape: bf16[2,64,32], index: 9, kind: input, shape index: {}]   ;;  %s4124_s10 = inlined_call_operand.vmem [shape: f32[2,1,32], index: 10, kind: input, shape index: {}]   ;;  %s4125_s11 = inlined_call_operand.vmem [shape: f32[2,1,32], index: 11, kind: input, shape index: {}]   ;;  %s4126_s12 = inlined_call_operand.vmem [shape: f32[2,1,32], index: 12, kind: input, shape index: {}]   ;;  %s4127_s13 = inlined_call_operand.vmem [shape: f32[1,32], index: 13, kind: input, shape index: {}]   ;;  %s4128_s14 = inlined_call_operand.vmem [shape: f32[1,32], index: 14, kind: input, shape index: {}]   ;;  %s4129_s15 = inlined_call_operand.hbm [shape: f32[16,32], index: 15, kind: output, shape index: {}]  }
   0x1   :  { %v3269_v0 = vld [vmem:[%s4115_s1] sm:$0xff]   ;;  %2987 = vmatprep.subr.bf16.mxu1 %v3397_v1  ;;  %3001 = vmatprep.subr.bf16.mxu0 %v3397_v1  ;;  %v3270_v2 = vld [vmem:[%s4115_s1 + $0x8] sm:$0xff]  }
   0x2   :  { %2988 = vmatpush3.bf16.msra.mxu1 %v3269_v0  ;;  %2991 = vmatprep.mubr.msk.bf16.mxu1 %vm3398_vm0, %v3397_v1  ;;  %v3508_v3 = vld [vmem:[%s4114_s0] sm:$0xff]  ;;  %v3513_v4 = vld [vmem:[%s4114_s0 + $0x8] sm:$0xff] }
   0x3   :  { %2989 = vmatprep.subr.bf16.mxu1 %v3397_v1  ;;  %3003 = vmatprep.mubr.msk.bf16.mxu0 %vm3398_vm0, %v3397_v1  ;;  %v54_v5 = vpack.c.bf16 %v3513_v4, %v3508_v3 }
   0x6   :  { %2990 = vmatpush3.bf16.msra.mxu1 %v3270_v2 }
   0x7   :  { %2995 = vmatprep.subr.bf16.mxu1 %v3397_v1 }
   0x9   :  { %2992 = vmatmul.mubr.msk.bf16.vlgmr.msra.gmra.mrb[0].mxu1 %vm78_vm1, %v54_v5 }
   0xa   :  { %2997 = vmatprep.mubr.msk.bf16.mxu1 %vm3398_vm0, %v3397_v1 }
   0xb   :  { %20 = vsyncpa [#allocation5], 0  ;;  %v2789_v6 = vld [vmem:[%s4116_s2] ss:$0 sm:$0xff]  ;;  %vm123_vm2 = vcmask 785408   ;;  %s3399_s27 = smov 120  }
   0xc   :  { %s3400_s28 = smov 96   ;;  %s3401_s29 = smov 80   ;;  %vm131_vm3 = vcmask 64512   ;;  %vm196_vm4 = vcmask 1043456   ;;  %vm359_vm5 = vcmask 130112   ;;  %vm479_vm6 = vcmask 195712  }
   0xd   :  { %s3402_s30 = smov 88   ;;  %s3403_s16 = smov 72   ;;  %vm599_vm7 = vcmask 261312   ;;  %vm1298_vm8 = vcmask 523264  }
   0xe   :  { %s3404_s17 = smov 112   ;;  %s3405_s18 = smov 104  }
   0xf   :  { %s3406_s19 = smov 56   ;;  %s4140_s20 = smov 64  }
  0x10   :  { %s4132_s21 = smov 48   ;;  %s4130_s22 = smov 40  }
  0x11   :  { %s4138_s23 = smov 8   ;;  %s4136_s24 = smov 16  }
  0x12   :  { %s4134_s25 = smov 24  }
  0xdc   :  { %v116_v7 = vpop.f32.mrb[0].mxu1 }
  0xdd   :  { %v117_v8 = vadd.f32 %v2789_v6, %v116_v7  ;;  %v2993_v9 = vpop.f32.mrb[1].mxu1 }
  0xde   :  { %v119_v10 = vpop.f32.mrb[2].mxu1 }
  0xdf   :  { %124 = vst.msk [vmem:[#allocation2] sm:$0xff] %vm123_vm2, %v117_v8  ;;  %v120_v11 = vadd.f32 %v2789_v6, %v119_v10  ;;  %v2994_v12 = vpop.f32.mrb[3].mxu1 }
  0xe1   :  { %125 = vst.msk [vmem:[#allocation2 + $0x8] sm:$0xff] %vm123_vm2, %v120_v11 }
  0xe6   :  { %v241_v13 = vld [vmem:[#allocation2] sm:$0xff] }
  0xe7   :  { %v3529_v14 = vpack.c.bf16 %v241_v13, %v241_v13 }
  0xe8   :  { %v601_v15 = vld [vmem:[#allocation2 + $0x8] sm:$0xff] }
  0xe9   :  { %244 = vrot.lane.b32.xlu1 %v3529_v14, %s3399_s27  ;;  %129 = vrot.lane.b32.xlu0 %v3529_v14, %s3400_s28  ;;  %v3543_v16 = vpack.c.bf16 %v601_v15, %v601_v15 }
  0xed   :  { %366 = vrot.lane.b32.xlu1 %v3529_v14, %s3401_s29  ;;  %246 = vrot.lane.b32.xlu0 %v3529_v14, %s3402_s30 }
  0xf1   :  { %486 = vrot.lane.b32.xlu1 %v3529_v14, %s3403_s16  ;;  %364 = vrot.lane.b32.xlu0 %v3529_v14, %s3404_s17 }
  0xf5   :  { %484 = vrot.lane.b32.xlu0 %v3529_v14, %s3405_s18  ;;  %604 = vrot.lane.b32.xlu1 %v3543_v16, %s3400_s28 }
  0xf9   :  { %719 = vrot.lane.b32.xlu0 %v3543_v16, %s3402_s30  ;;  %717 = vrot.lane.b32.xlu1 %v3543_v16, %s3399_s27 }
  0xfd   :  { %838 = vrot.lane.b32.xlu0 %v3543_v16, %s3401_s29  ;;  %836 = vrot.lane.b32.xlu1 %v3543_v16, %s3404_s17 }
 0x101   :  { %957 = vrot.lane.b32.xlu0 %v3543_v16, %s3403_s16  ;;  %955 = vrot.lane.b32.xlu1 %v3543_v16, %s3405_s18 }
 0x15b   :  { %v130_v17 = vpop.permute.xlu0 %129  ;;  %v245_v20 = vpop.permute.xlu1 %244 }
 0x15c   :  { %v136_v18 = vsel %vm131_vm3, %v130_v17, 0 }
 0x15d   :  { %2996 = vmatpush3.bf16.xpose.msra.mxu1 %v136_v18 }
 0x15e   :  { %3007 = vmatprep.subr.bf16.mxu1 %v3397_v1 }
 0x15f   :  { %v247_v19 = vpop.permute.xlu0 %246  ;;  %v367_v22 = vpop.permute.xlu1 %366 }
 0x160   :  { %v252_v21 = vsel %vm131_vm3, %v247_v19, 0  ;;  %v372_v23 = vsel %vm131_vm3, %v367_v22, 0 }
 0x163   :  { %v487_v24 = vpop.permute.xlu1 %486  ;;  %v365_v25 = vpop.permute.xlu0 %364 }
 0x164   :  { %2998 = vmatmul.mubr.msk.bf16.vlgmr.msra.gmra.mrb[4].mxu1 %vm131_vm3, %v3529_v14  ;;  %v492_v26 = vsel %vm131_vm3, %v487_v24, 0 }
 0x165   :  { %3008 = vmatpush3.bf16.xpose.msra.mxu1 %v252_v21  ;;  %3009 = vmatprep.mubr.msk.bf16.mxu1 %vm3398_vm0, %v3397_v1 }
 0x166   :  { %3019 = vmatprep.subr.bf16.mxu1 %v3397_v1 }
 0x167   :  { %v605_v27 = vpop.permute.xlu1 %604  ;;  %v485_v28 = vpop.permute.xlu0 %484 }
 0x168   :  { %v610_v29 = vsel %vm131_vm3, %v605_v27, 0 }
 0x16b   :  { %v720_v30 = vpop.permute.xlu0 %719  ;;  %v718_v33 = vpop.permute.xlu1 %717 }
 0x16c   :  { %3010 = vmatmul.mubr.msk.bf16.vlgmr.msra.gmra.mrb[8].mxu1 %vm131_vm3, %v245_v20  ;;  %v725_v31 = vsel %vm131_vm3, %v720_v30, 0 }
 0x16d   :  { %3020 = vmatpush3.bf16.xpose.msra.mxu1 %v372_v23  ;;  %3021 = vmatprep.mubr.msk.bf16.mxu1 %vm3398_vm0, %v3397_v1 }
 0x16e   :  { %3031 = vmatprep.subr.bf16.mxu1 %v3397_v1 }
 0x16f   :  { %v839_v32 = vpop.permute.xlu0 %838  ;;  %v837_v36 = vpop.permute.xlu1 %836 }
 0x170   :  { %v844_v34 = vsel %vm131_vm3, %v839_v32, 0 }
 0x173   :  { %v958_v35 = vpop.permute.xlu0 %957  ;;  %v956_v38 = vpop.permute.xlu1 %955 }
 0x174   :  { %3022 = vmatmul.mubr.msk.bf16.vlgmr.msra.gmra.mrb[12].mxu1 %vm131_vm3, %v365_v25  ;;  %v963_v37 = vsel %vm131_vm3, %v958_v35, 0 }
 0x175   :  { %3032 = vmatpush3.bf16.xpose.msra.mxu1 %v492_v26  ;;  %3033 = vmatprep.mubr.msk.bf16.mxu1 %vm3398_vm0, %v3397_v1 }
 0x176   :  { %3043 = vmatprep.subr.bf16.mxu1 %v3397_v1 }
 0x17c   :  { %3034 = vmatmul.mubr.msk.bf16.vlgmr.msra.gmra.mrb[16].mxu1 %vm131_vm3, %v485_v28 }
 0x17d   :  { %3044 = vmatpush3.bf16.xpose.msra.mxu1 %v610_v29  ;;  %3045 = vmatprep.mubr.msk.bf16.mxu1 %vm3398_vm0, %v3397_v1 }
 0x17e   :  { %3055 = vmatprep.subr.bf16.mxu1 %v3397_v1 }
 0x184   :  { %3046 = vmatmul.mubr.msk.bf16.vlgmr.msra.gmra.mrb[20].mxu1 %vm131_vm3, %v3543_v16 }
 0x185   :  { %3056 = vmatpush3.bf16.xpose.msra.mxu1 %v725_v31  ;;  %3057 = vmatprep.mubr.msk.bf16.mxu1 %vm3398_vm0, %v3397_v1 }
 0x186   :  { %3067 = vmatprep.subr.bf16.mxu1 %v3397_v1 }
 0x18c   :  { %3058 = vmatmul.mubr.msk.bf16.vlgmr.msra.gmra.mrb[24].mxu1 %vm131_vm3, %v718_v33 }
 0x18d   :  { %3068 = vmatpush3.bf16.xpose.msra.mxu1 %v844_v34  ;;  %3069 = vmatprep.mubr.msk.bf16.mxu1 %vm3398_vm0, %v3397_v1 }
 0x18e   :  { %3079 = vmatprep.subr.bf16.mxu1 %v3397_v1 }
 0x194   :  { %3070 = vmatmul.mubr.msk.bf16.vlgmr.msra.gmra.mrb[28].mxu1 %vm131_vm3, %v837_v36 }
 0x195   :  { %3080 = vmatpush3.bf16.xpose.msra.mxu1 %v963_v37  ;;  %3081 = vmatprep.mubr.msk.bf16.mxu1 %vm3398_vm0, %v3397_v1 }
 0x196   :  { %3091 = vmatprep.subr.bf16.mxu1 %v3397_v1 }
 0x19c   :  { %3082 = vmatmul.mubr.msk.bf16.vlgmr.msra.gmra.mrb[32].mxu1 %vm131_vm3, %v956_v38 }
 0x19d   :  { %3095 = vmatprep.mubr.msk.bf16.mxu1 %vm3398_vm0, %v3397_v1 }
 0x237   :  { %v172_v39 = vpop.f32.mrb[4].mxu1 }
 0x238   :  { %v178_v40 = vmul.f32 0.35355338, %v172_v39  ;;  %v2999_v41 = vpop.f32.mrb[5].mxu1 }
 0x239   :  { %v175_v42 = vpop.f32.mrb[6].mxu1 }
 0x23a   :  { %v3000_v43 = vpop.f32.mrb[7].mxu1  ;;  %v179_v44 = vsel %vm131_vm3, %v178_v40, -inf }
 0x23b   :  { %180 = vmax.xlane.f32.xlu0 %v179_v44 }
 0x23f   :  { %v288_v45 = vpop.f32.mrb[8].mxu1 }
 0x240   :  { %v294_v46 = vmul.f32 0.35355338, %v288_v45  ;;  %v3011_v47 = vpop.f32.mrb[9].mxu1 }
 0x241   :  { %v291_v48 = vpop.f32.mrb[10].mxu1 }
 0x242   :  { %v3012_v49 = vpop.f32.mrb[11].mxu1  ;;  %v295_v50 = vsel %vm131_vm3, %v294_v46, -inf }
 0x243   :  { %296 = vmax.xlane.f32.xlu1 %v295_v50 }
 0x247   :  { %v408_v51 = vpop.f32.mrb[12].mxu1 }
 0x248   :  { %v414_v52 = vmul.f32 0.35355338, %v408_v51  ;;  %v3023_v53 = vpop.f32.mrb[13].mxu1 }
 0x249   :  { %v411_v54 = vpop.f32.mrb[14].mxu1 }
 0x24a   :  { %v3024_v55 = vpop.f32.mrb[15].mxu1  ;;  %v415_v56 = vsel %vm131_vm3, %v414_v52, -inf }
 0x24b   :  { %416 = vmax.xlane.f32.xlu0 %v415_v56 }
 0x24f   :  { %v528_v57 = vpop.f32.mrb[16].mxu1 }
 0x250   :  { %v3606_v58 = vmul.f32 0.35355338, %v528_v57  ;;  %v3035_v59 = vpop.f32.mrb[17].mxu1 }
 0x251   :  { %v531_v60 = vpop.f32.mrb[18].mxu1 }
 0x252   :  { %v3036_v61 = vpop.f32.mrb[19].mxu1  ;;  %v535_v62 = vsel %vm131_vm3, %v3606_v58, -inf }
 0x253   :  { %536 = vmax.xlane.f32.xlu0 %v535_v62 }
 0x257   :  { %v646_v63 = vpop.f32.mrb[20].mxu1 }
 0x258   :  { %v3610_v0 = vmul.f32 0.35355338, %v646_v63  ;;  %v3047_v2 = vpop.f32.mrb[21].mxu1 }
 0x259   :  { %v649_v5 = vpop.f32.mrb[22].mxu1 }
 0x25a   :  { %v3048_v6 = vpop.f32.mrb[23].mxu1  ;;  %v653_v7 = vsel %vm131_vm3, %v3610_v0, -inf }
 0x25b   :  { %654 = vmax.xlane.f32.xlu1 %v653_v7 }
 0x25f   :  { %v761_v8 = vpop.f32.mrb[24].mxu1 }
 0x260   :  { %v3614_v9 = vmul.f32 0.35355338, %v761_v8  ;;  %v3059_v10 = vpop.f32.mrb[25].mxu1 }
 0x261   :  { %v764_v11 = vpop.f32.mrb[26].mxu1 }
 0x262   :  { %v3060_v12 = vpop.f32.mrb[27].mxu1  ;;  %v768_v13 = vsel %vm131_vm3, %v3614_v9, -inf }
 0x263   :  { %769 = vmax.xlane.f32.xlu0 %v768_v13 }
 0x267   :  { %v880_v15 = vpop.f32.mrb[28].mxu1 }
 0x268   :  { %v886_v17 = vmul.f32 0.35355338, %v880_v15  ;;  %v3071_v18 = vpop.f32.mrb[29].mxu1 }
 0x269   :  { %v883_v19 = vpop.f32.mrb[30].mxu1 }
 0x26a   :  { %v3072_v20 = vpop.f32.mrb[31].mxu1  ;;  %v887_v21 = vsel %vm131_vm3, %v886_v17, -inf }
 0x26b   :  { %888 = vmax.xlane.f32.xlu1 %v887_v21 }
 0x26f   :  { %v999_v22 = vpop.f32.mrb[32].mxu1 }
 0x270   :  { %v3083_v23 = vpop.f32.mrb[33].mxu1  ;;  %v3623_v26 = vmul.f32 0.35355338, %v999_v22 }
 0x271   :  { %v1002_v24 = vpop.f32.mrb[34].mxu1 }
 0x272   :  { %v3084_v25 = vpop.f32.mrb[35].mxu1  ;;  %v1006_v27 = vsel %vm131_vm3, %v3623_v26, -inf }
 0x279   :  { %307 = vrot.lane.b32.xlu0 %v3529_v14, %s3406_s19 }
 0x27c   :  { %191 = vrot.lane.b32.xlu1 %v3529_v14, %s4140_s20 }
 0x298   :  { %1007 = vmax.xlane.f32.xlu0 %v1006_v27 }
 0x2c8   :  { %v181_v28 = vpop.xlane.xlu0 %180 }
 0x2c9   :  { %v182_v29 = vsub.f32 %v178_v40, %v181_v28 }
 0x2cb   :  { %v183_v30 = vmul.f32 1.442695, %v182_v29 }
 0x2cd   :  { %3289 = vpow2.f32 %v183_v30 }
 0x2d0   :  { %v297_v31 = vpop.xlane.xlu1 %296 }
 0x2d1   :  { %v298_v32 = vsub.f32 %v294_v46, %v297_v31 }
 0x2d3   :  { %v299_v33 = vmul.f32 1.442695, %v298_v32 }
 0x2d5   :  { %3291 = vpow2.f32 %v299_v33 }
 0x2d7   :  { %v3627_v34 = vpop.eup %3289 }
 0x2d8   :  { %v417_v35 = vpop.xlane.xlu0 %416  ;;  %v185_v36 = vsel %vm131_vm3, %v3627_v34, 0.0 }
 0x2d9   :  { %v418_v37 = vsub.f32 %v414_v52, %v417_v35  ;;  %186 = vadd.xlane.f32.xlu1 %v185_v36 }
 0x2db   :  { %v419_v38 = vmul.f32 1.442695, %v418_v37 }
 0x2dd   :  { %3293 = vpow2.f32 %v419_v38 }
 0x2df   :  { %v3631_v39 = vpop.eup %3291 }
 0x2e0   :  { %v301_v40 = vsel %vm131_vm3, %v3631_v39, 0.0  ;;  %v537_v46 = vpop.xlane.xlu0 %536 }
 0x2e1   :  { %302 = vadd.xlane.f32.xlu0 %v301_v40  ;;  %v538_v48 = vsub.f32 %v3606_v58, %v537_v46 }
 0x2e3   :  { %v539_v49 = vmul.f32 1.442695, %v538_v48 }
 0x2e5   :  { %3295 = vpow2.f32 %v539_v49 }
 0x2e7   :  { %v3635_v41 = vpop.eup %3293 }
 0x2e8   :  { %v421_v42 = vsel %vm131_vm3, %v3635_v41, 0.0  ;;  %v655_v43 = vpop.xlane.xlu1 %654 }
 0x2e9   :  { %422 = vadd.xlane.f32.xlu1 %v421_v42  ;;  %v656_v50 = vsub.f32 %v3610_v0, %v655_v43 }
 0x2eb   :  { %v657_v53 = vmul.f32 1.442695, %v656_v50 }
 0x2ed   :  { %3297 = vpow2.f32 %v657_v53 }
 0x2ef   :  { %v3296_v56 = vpop.eup %3295 }
 0x2f0   :  { %v770_v51 = vpop.xlane.xlu0 %769  ;;  %v541_v57 = vsel %vm131_vm3, %v3296_v56, 0.0 }
 0x2f1   :  { %v771_v52 = vsub.f32 %v3614_v9, %v770_v51 }
 0x2f4   :  { %v308_v0 = vpop.permute.xlu0 %307 }
 0x2f5   :  { %v313_v15 = vsel %vm196_vm4, %v308_v0, 0 }
 0x2f7   :  { %427 = vrot.lane.b32.xlu0 %v3529_v14, %s4132_s21  ;;  %v3649_v59 = vpop.eup %3297 }
 0x2f8   :  { %v889_v44 = vpop.xlane.xlu1 %888  ;;  %v659_v60 = vsel %vm131_vm3, %v3649_v59, 0.0 }
 0x2f9   :  { %v890_v54 = vsub.f32 %v886_v17, %v889_v44 }
 0x2fa   :  { %547 = vrot.lane.b32.xlu1 %v3529_v14, %s4130_s22  ;;  %v772_v14 = vmul.f32 1.442695, %v771_v52 }
 0x2fb   :  { %v891_v55 = vmul.f32 1.442695, %v890_v54 }
 0x2fc   :  { %v192_v45 = vpop.permute.xlu1 %191  ;;  %3299 = vpow2.f32 %v772_v14 }
 0x2fd   :  { %v198_v47 = vsel %vm196_vm4, %v192_v45, 0  ;;  %3301 = vpow2.f32 %v891_v55 }
 0x2fe   :  { %3002 = vmatpush3.bf16.msra.mxu0 %v198_v47 }
 0x2ff   :  { %3013 = vmatprep.subr.bf16.mxu0 %v3397_v1 }
 0x306   :  { %v3651_v58 = vpop.eup %3299 }
 0x307   :  { %v3655_v61 = vpop.eup %3301  ;;  %v774_v62 = vsel %vm131_vm3, %v3651_v58, 0.0 }
 0x308   :  { %v893_v63 = vsel %vm131_vm3, %v3655_v61, 0.0 }
 0x316   :  { %542 = vadd.xlane.f32.xlu0 %v541_v57 }
 0x31a   :  { %660 = vadd.xlane.f32.xlu0 %v659_v60 }
 0x31e   :  { %775 = vadd.xlane.f32.xlu1 %v774_v62  ;;  %894 = vadd.xlane.f32.xlu0 %v893_v63 }
 0x325   :  { %v1008_v2 = vpop.xlane.xlu0 %1007 }
 0x326   :  { %v1009_v5 = vsub.f32 %v3623_v26, %v1008_v2 }
 0x328   :  { %v1010_v6 = vmul.f32 1.442695, %v1009_v5 }
 0x32a   :  { %3303 = vpow2.f32 %v1010_v6 }
 0x32f   :  { %780 = vrot.lane.b32.xlu1 %v3543_v16, %s3406_s19 }
 0x333   :  { %899 = vrot.lane.b32.xlu1 %v3543_v16, %s4132_s21 }
 0x334   :  { %v3666_v7 = vpop.eup %3303 }
 0x335   :  { %v1012_v8 = vsel %vm131_vm3, %v3666_v7, 0.0 }
 0x336   :  { %1013 = vadd.xlane.f32.xlu0 %v1012_v8 }
 0x337   :  { %1018 = vrot.lane.b32.xlu1 %v3543_v16, %s4130_s22  ;;  %s3413_s22 = smov [#allocation4]  }
 0x34c   :  { %665 = vrot.lane.b32.xlu0 %v3543_v16, %s4140_s20 }
 0x366   :  { %v187_v9 = vpop.xlane.xlu1 %186 }
 0x367   :  { %3305 = vrcp.f32 %v187_v9 }
 0x36e   :  { %v303_v10 = vpop.xlane.xlu0 %302 }
 0x36f   :  { %3307 = vrcp.f32 %v303_v10 }
 0x371   :  { %v3306_v11 = vpop.eup %3305 }
 0x372   :  { %v189_v12 = vmul.f32 %v3306_v11, %v3627_v34  ;;  %v428_v19 = vpop.permute.xlu0 %427 }
 0x373   :  { %v433_v21 = vsel %vm196_vm4, %v428_v19, 0  ;;  %v3272_v19 = vld [vmem:[%s4117_s3 + $0x8] sm:$0xff]  }
 0x374   :  { %v190_v13 = vpack.c.bf16 %v189_v12, %v189_v12 }
 0x376   :  { %3004 = vmatmul.mubr.msk.bf16.vlgmr.msra.gmra.mrb[0].mxu0 %vm131_vm3, %v190_v13  ;;  %v423_v17 = vpop.xlane.xlu1 %422 }
 0x377   :  { %3014 = vmatpush3.bf16.msra.mxu0 %v313_v15  ;;  %3309 = vrcp.f32 %v423_v17  ;;  %3015 = vmatprep.mubr.msk.bf16.mxu0 %vm3398_vm0, %v3397_v1 }
 0x378   :  { %3025 = vmatprep.subr.bf16.mxu0 %v3397_v1 }
 0x379   :  { %v3308_v16 = vpop.eup %3307 }
 0x37a   :  { %v305_v18 = vmul.f32 %v3308_v16, %v3631_v39  ;;  %v548_v24 = vpop.permute.xlu1 %547 }
 0x37b   :  { %v553_v26 = vsel %vm196_vm4, %v548_v24, 0 }
 0x37c   :  { %v306_v20 = vpack.c.bf16 %v305_v18, %v305_v18  ;;  %v3271_v18 = vld [vmem:[%s4117_s3] sm:$0xff]  }
 0x37d   :  { %3092 = vmatpush3.bf16.msra.mxu1 %v3271_v18  ;;  %v2815_v18 = vld [vmem:[%s4122_s8] ss:$0 sm:$0xff] }
 0x37e   :  { %3016 = vmatmul.mubr.msk.bf16.vlgmr.msra.gmra.mrb[4].mxu0 %vm131_vm3, %v306_v20  ;;  %3093 = vmatprep.subr.bf16.mxu1 %v3397_v1 }
 0x37f   :  { %3026 = vmatpush3.bf16.msra.mxu0 %v433_v21  ;;  %3027 = vmatprep.mubr.msk.bf16.mxu0 %vm3398_vm0, %v3397_v1 }
 0x380   :  { %3037 = vmatprep.subr.bf16.mxu0 %v3397_v1 }
 0x381   :  { %v3310_v22 = vpop.eup %3309  ;;  %3094 = vmatpush3.bf16.msra.mxu1 %v3272_v19 }
 0x382   :  { %v425_v23 = vmul.f32 %v3310_v22, %v3635_v41  ;;  %3107 = vmatprep.subr.bf16.mxu1 %v3397_v1 }
 0x384   :  { %v426_v25 = vpack.c.bf16 %v425_v23, %v425_v23 }
 0x386   :  { %3028 = vmatmul.mubr.msk.bf16.vlgmr.msra.gmra.mrb[8].mxu0 %vm131_vm3, %v426_v25 }
 0x387   :  { %3038 = vmatpush3.bf16.msra.mxu0 %v553_v26  ;;  %3039 = vmatprep.mubr.msk.bf16.mxu0 %vm3398_vm0, %v3397_v1 }
 0x388   :  { %3049 = vmatprep.subr.bf16.mxu0 %v3397_v1 }
 0x3a3   :  { %v543_v27 = vpop.xlane.xlu0 %542 }
 0x3a4   :  { %3311 = vrcp.f32 %v543_v27 }
 0x3a7   :  { %v661_v31 = vpop.xlane.xlu0 %660 }
 0x3a8   :  { %3313 = vrcp.f32 %v661_v31 }
 0x3ab   :  { %v776_v32 = vpop.xlane.xlu1 %775  ;;  %v895_v33 = vpop.xlane.xlu0 %894 }
 0x3ac   :  { %3315 = vrcp.f32 %v776_v32 }
 0x3ad   :  { %3317 = vrcp.f32 %v895_v33 }
 0x3ae   :  { %v3312_v28 = vpop.eup %3311 }
 0x3af   :  { %v545_v29 = vmul.f32 %v3312_v28, %v3296_v56  ;;  %v781_v39 = vpop.permute.xlu1 %780 }
 0x3b0   :  { %v786_v42 = vsel %vm196_vm4, %v781_v39, 0 }
 0x3b1   :  { %v546_v30 = vpack.c.bf16 %v545_v29, %v545_v29 }
 0x3b2   :  { %v3314_v34 = vpop.eup %3313 }
 0x3b3   :  { %3040 = vmatmul.mubr.msk.bf16.vlgmr.msra.gmra.mrb[12].mxu0 %vm131_vm3, %v546_v30  ;;  %v663_v36 = vmul.f32 %v3314_v34, %v3649_v59  ;;  %v900_v44 = vpop.permute.xlu1 %899 }
 0x3b4   :  { %3051 = vmatprep.mubr.msk.bf16.mxu0 %vm3398_vm0, %v3397_v1  ;;  %v905_v47 = vsel %vm196_vm4, %v900_v44, 0 }
 0x3b5   :  { %v664_v40 = vpack.c.bf16 %v663_v36, %v663_v36 }
 0x3b6   :  { %v3316_v41 = vpop.eup %3315 }
 0x3b7   :  { %v778_v43 = vmul.f32 %v3316_v41, %v3651_v58  ;;  %v3318_v46 = vpop.eup %3317  ;;  %v1019_v49 = vpop.permute.xlu1 %1018 }
 0x3b8   :  { %v897_v48 = vmul.f32 %v3318_v46, %v3655_v61  ;;  %v1024_v52 = vsel %vm196_vm4, %v1019_v49, 0 }
 0x3b9   :  { %v779_v45 = vpack.c.bf16 %v778_v43, %v778_v43 }
 0x3ba   :  { %v898_v50 = vpack.c.bf16 %v897_v48, %v897_v48 }
 0x3c3   :  { %v1014_v35 = vpop.xlane.xlu0 %1013 }
 0x3c4   :  { %3319 = vrcp.f32 %v1014_v35 }
 0x3c7   :  { %v666_v37 = vpop.permute.xlu0 %665 }
 0x3c8   :  { %v671_v38 = vsel %vm196_vm4, %v666_v37, 0  ;;  %v2809_v37 = vld [vmem:[%s4118_s4] ss:$0 sm:$0xff] }
 0x3c9   :  { %3050 = vmatpush3.bf16.msra.mxu0 %v671_v38 }
 0x3ca   :  { %3061 = vmatprep.subr.bf16.mxu0 %v3397_v1 }
 0x3cc   :  { %3052 = vmatmul.mubr.msk.bf16.vlgmr.msra.gmra.mrb[16].mxu0 %vm131_vm3, %v664_v40 }
 0x3cd   :  { %3062 = vmatpush3.bf16.msra.mxu0 %v786_v42  ;;  %3063 = vmatprep.mubr.msk.bf16.mxu0 %vm3398_vm0, %v3397_v1 }
 0x3ce   :  { %3073 = vmatprep.subr.bf16.mxu0 %v3397_v1  ;;  %v3320_v51 = vpop.eup %3319 }
 0x3cf   :  { %v1016_v53 = vmul.f32 %v3320_v51, %v3666_v7 }
 0x3d1   :  { %v1017_v54 = vpack.c.bf16 %v1016_v53, %v1016_v53 }
 0x3d4   :  { %3064 = vmatmul.mubr.msk.bf16.vlgmr.msra.gmra.mrb[20].mxu0 %vm131_vm3, %v779_v45 }
 0x3d5   :  { %3074 = vmatpush3.bf16.msra.mxu0 %v905_v47  ;;  %3075 = vmatprep.mubr.msk.bf16.mxu0 %vm3398_vm0, %v3397_v1 }
 0x3d6   :  { %3085 = vmatprep.subr.bf16.mxu0 %v3397_v1 }
 0x3dc   :  { %3076 = vmatmul.mubr.msk.bf16.vlgmr.msra.gmra.mrb[24].mxu0 %vm131_vm3, %v898_v50 }
 0x3dd   :  { %3086 = vmatpush3.bf16.msra.mxu0 %v1024_v52  ;;  %3087 = vmatprep.mubr.msk.bf16.mxu0 %vm3398_vm0, %v3397_v1 }
 0x3de   :  { %3099 = vmatprep.subr.bf16.mxu0 %v3397_v1 }
 0x3e4   :  { %3088 = vmatmul.mubr.msk.bf16.vlgmr.msra.gmra.mrb[28].mxu0 %vm131_vm3, %v1017_v54 }
 0x3e5   :  { %3103 = vmatprep.mubr.msk.bf16.mxu0 %vm3398_vm0, %v3397_v1 }
 0x449   :  { %v234_v14 = vpop.f32.mrb[0].mxu0 }
 0x44a   :  { %240 = vst.msk [vmem:[#allocation3] sm:$0xff] %vm131_vm3, %v234_v14  ;;  %v3005_v55 = vpop.f32.mrb[1].mxu0 }
 0x44b   :  { %v237_v56 = vpop.f32.mrb[2].mxu0 }
 0x44c   :  { %v3006_v57 = vpop.f32.mrb[3].mxu0  ;;  %v3274_v56 = vld [vmem:[%s4121_s7 + $0x8] sm:$0xff]  }
 0x44d   :  { %v3275_v57 = vld [vmem:[%s4123_s9] sm:$0xff]  }
 0x451   :  { %v349_v59 = vpop.f32.mrb[4].mxu0 }
 0x452   :  { %356 = vrot.lane.b32.xlu1 %v349_v59, %s4138_s23  ;;  %v3017_v58 = vpop.f32.mrb[5].mxu0  ;;  %v3276_v59 = vld [vmem:[%s4123_s9 + $0x8] sm:$0xff]  }
 0x453   :  { %v352_v60 = vpop.f32.mrb[6].mxu0 }
 0x454   :  { %v3018_v61 = vpop.f32.mrb[7].mxu0 }
 0x459   :  { %v469_v62 = vpop.f32.mrb[8].mxu0 }
 0x45a   :  { %476 = vrot.lane.b32.xlu0 %v469_v62, %s4136_s24  ;;  %v3029_v63 = vpop.f32.mrb[9].mxu0 }
 0x45b   :  { %v472_v0 = vpop.f32.mrb[10].mxu0 }
 0x45c   :  { %v3030_v2 = vpop.f32.mrb[11].mxu0 }
 0x486   :  { %v589_v5 = vpop.f32.mrb[12].mxu0 }
 0x487   :  { %596 = vrot.lane.b32.xlu0 %v589_v5, %s4134_s25  ;;  %v3041_v6 = vpop.f32.mrb[13].mxu0 }
 0x488   :  { %v592_v7 = vpop.f32.mrb[14].mxu0  ;;  %v2813_v6 = vld [vmem:[%s4119_s5] ss:$0 sm:$0xff] }
 0x489   :  { %v3042_v8 = vpop.f32.mrb[15].mxu0 }
 0x49f   :  { %v707_v9 = vpop.f32.mrb[16].mxu0 }
 0x4a0   :  { %713 = vst.msk [vmem:[#allocation3 + $0x8] sm:$0xff] %vm131_vm3, %v707_v9  ;;  %v3053_v10 = vpop.f32.mrb[17].mxu0 }
 0x4a1   :  { %v710_v11 = vpop.f32.mrb[18].mxu0  ;;  %v2814_v10 = vld [vmem:[%s4120_s6] ss:$0 sm:$0xff] }
 0x4a2   :  { %v3054_v12 = vpop.f32.mrb[19].mxu0 }
 0x4a7   :  { %v822_v13 = vpop.f32.mrb[20].mxu0 }
 0x4a8   :  { %829 = vrot.lane.b32.xlu1 %v822_v13, %s4138_s23  ;;  %v3065_v15 = vpop.f32.mrb[21].mxu0 }
 0x4a9   :  { %v825_v17 = vpop.f32.mrb[22].mxu0 }
 0x4aa   :  { %v3066_v16 = vpop.f32.mrb[23].mxu0  ;;  %v3277_v17 = vld [vmem:[%s4123_s9 + $0x10] sm:$0xff]  }
 0x4ab   :  { %v3278_v16 = vld [vmem:[%s4123_s9 + $0x18] sm:$0xff]  }
 0x4af   :  { %v941_v20 = vpop.f32.mrb[24].mxu0 }
 0x4b0   :  { %948 = vrot.lane.b32.xlu1 %v941_v20, %s4136_s24  ;;  %v3077_v21 = vpop.f32.mrb[25].mxu0  ;;  %s2778_s24 = sshll.u32 %s3413_s22, 4  ;;  %s2779_s24 = int_to_ptr.vmem [resolvable:$true] %s2778_s24 }
 0x4b1   :  { %v944_v22 = vpop.f32.mrb[26].mxu0  ;;  %p3378_p1 = scmp.lt.s32.totalorder %s2779_s24, %s2779_s24 }
 0x4b2   :  { %v3078_v23 = vpop.f32.mrb[27].mxu0 }
 0x4b7   :  { %v1060_v24 = vpop.f32.mrb[28].mxu0 }
 0x4b8   :  { %1067 = vrot.lane.b32.xlu1 %v1060_v24, %s4134_s25  ;;  %v3089_v25 = vpop.f32.mrb[29].mxu0  ;;  %s3373_s25 = scalar_lea.vmem %s2779_s24, 256 }
 0x4b9   :  { %v1063_v26 = vpop.f32.mrb[30].mxu0  ;;  %p3374_p0 = scmp.ne.s32.totalorder %s2779_s24, %s3373_s25  ;;  %p3379_p2 = scmp.lt.s32.totalorder %s3373_s25, %s3373_s25 }
 0x4ba   :  { %v3090_v27 = vpop.f32.mrb[31].mxu0 }
 0x4bb   :  { %p3380_p3 = por %p3379_p2, %p3378_p1 }
 0x4bd   :  { %p3381_p4 = pnand %p3380_p3, %p3374_p0 }
 0x4c4   :  { %v357_v28 = vpop.permute.xlu1 %356 }
 0x4c5   :  { %360 = vst.msk [vmem:[#allocation3] sm:$0xff] %vm359_vm5, %v357_v28  ;;  %v2819_v28 = vld [vmem:[%s4124_s10] ss:$0 sm:$0xff] }
 0x4cc   :  { %v477_v29 = vpop.permute.xlu0 %476 }
 0x4cd   :  { %480 = vst.msk [vmem:[#allocation3] sm:$0xff] %vm479_vm6, %v477_v29 }
 0x4f9   :  { %v597_v30 = vpop.permute.xlu0 %596 }
 0x4fa   :  { %600 = vst.msk [vmem:[#allocation3] sm:$0xff] %vm599_vm7, %v597_v30 }
 0x501   :  { %v1071_v34 = vld [vmem:[#allocation3] sm:$0xff] }
 0x51a   :  { %v830_v31 = vpop.permute.xlu1 %829 }
 0x51b   :  { %832 = vst.msk [vmem:[#allocation3 + $0x8] sm:$0xff] %vm359_vm5, %v830_v31 }
 0x522   :  { %v949_v32 = vpop.permute.xlu1 %948 }
 0x523   :  { %951 = vst.msk [vmem:[#allocation3 + $0x8] sm:$0xff] %vm479_vm6, %v949_v32 }
 0x52a   :  { %v1068_v33 = vpop.permute.xlu1 %1067 }
 0x52b   :  { %1070 = vst.msk [vmem:[#allocation3 + $0x8] sm:$0xff] %vm599_vm7, %v1068_v33 }
 0x532   :  { %v1072_v35 = vld [vmem:[#allocation3 + $0x8] sm:$0xff] }
 0x533   :  { %v1073_v36 = vpack.c.bf16 %v1072_v35, %v1071_v34 }
 0x535   :  { %3096 = vmatmul.mubr.msk.bf16.vlgmr.msra.gmra.mrb[36].mxu1 %vm78_vm1, %v1073_v36 }
 0x536   :  { %3115 = vmatprep.mubr.msk.bf16.mxu1 %vm3398_vm0, %v3397_v1  ;;  %3108 = vmatpush3.bf16.msra.mxu1 %v3275_v57 }
 0x537   :  { %3109 = vmatprep.subr.bf16.mxu1 %v3397_v1 }
 0x53a   :  { %3110 = vmatpush3.bf16.msra.mxu1 %v3276_v59 }
 0x53b   :  { %3111 = vmatprep.subr.bf16.mxu1 %v3397_v1 }
 0x53e   :  { %3112 = vmatpush3.bf16.msra.mxu1 %v3277_v17 }
 0x53f   :  { %3113 = vmatprep.subr.bf16.mxu1 %v3397_v1 }
 0x542   :  { %3114 = vmatpush3.bf16.msra.mxu1 %v3278_v16 }
 0x543   :  { %3133 = vmatprep.subr.bf16.mxu1 %v3397_v1 }
 0x608   :  { %v1134_v38 = vpop.f32.mrb[36].mxu1 }
 0x609   :  { %v1135_v39 = vadd.f32 %v2809_v37, %v1134_v38  ;;  %v3097_v40 = vpop.f32.mrb[37].mxu1 }
 0x60a   :  { %v1137_v41 = vpop.f32.mrb[38].mxu1 }
 0x60b   :  { %v1138_v42 = vadd.f32 %v2809_v37, %v1137_v41  ;;  %v3098_v43 = vpop.f32.mrb[39].mxu1  ;;  %v1141_v44 = vadd.f32 %v1135_v39, %v3508_v3 }
 0x60d   :  { %v1143_v45 = vsel %vm78_vm1, %v1141_v44, 0.0  ;;  %v1142_v46 = vadd.f32 %v1138_v42, %v3513_v4  ;;  %v3273_v4 = vld [vmem:[%s4121_s7] sm:$0xff]  }
 0x60e   :  { %1144 = vadd.xlane.f32.xlu0 %v1143_v45  ;;  %3100 = vmatpush3.bf16.msra.mxu0 %v3273_v4  ;;  %v2825_v4 = vld [vmem:[%s4125_s11] ss:$0 sm:$0xff] }
 0x60f   :  { %v1146_v47 = vsel %vm78_vm1, %v1142_v46, 0.0  ;;  %3101 = vmatprep.subr.bf16.mxu0 %v3397_v1 }
 0x610   :  { %1147 = vadd.xlane.f32.xlu1 %v1146_v47 }
 0x612   :  { %3102 = vmatpush3.bf16.msra.mxu0 %v3274_v56 }
 0x613   :  { %3119 = vmatprep.subr.bf16.mxu0 %v3397_v1 }
 0x69b   :  { %v1145_v48 = vpop.xlane.xlu0 %1144 }
 0x69c   :  { %v1150_v49 = vmul.f32 0.03125, %v1145_v48 }
 0x69d   :  { %v1148_v50 = vpop.xlane.xlu1 %1147 }
 0x69e   :  { %v1152_v51 = vsub.f32 %v1141_v44, %v1150_v49  ;;  %v1151_v52 = vmul.f32 0.03125, %v1148_v50  ;;  %v3279_v49 = vld [vmem:[%s4115_s1 + $0x10] sm:$0xff]   ;;  %v3280_v50 = vld [vmem:[%s4115_s1 + $0x18] sm:$0xff]  }
 0x6a0   :  { %v1153_v53 = vsub.f32 %v1142_v46, %v1151_v52  ;;  %v1154_v54 = vmul.f32 %v1152_v51, %v1152_v51 }
 0x6a2   :  { %v1156_v14 = vsel %vm78_vm1, %v1154_v54, 0.0  ;;  %v1155_v55 = vmul.f32 %v1153_v53, %v1153_v53 }
 0x6a3   :  { %1157 = vadd.xlane.f32.xlu0 %v1156_v14 }
 0x6a4   :  { %v1159_v3 = vsel %vm78_vm1, %v1155_v55, 0.0 }
 0x6a7   :  { %1160 = vadd.xlane.f32.xlu0 %v1159_v3 }
 0x730   :  { %v1158_v58 = vpop.xlane.xlu0 %1157 }
 0x731   :  { %v1162_v60 = vmul.f32 0.03125, %v1158_v58 }
 0x733   :  { %v1164_v61 = vadd.f32 1e-05, %v1162_v60  ;;  %v2826_v60 = vld [vmem:[%s4126_s12] ss:$0 sm:$0xff] }
 0x734   :  { %v1161_v62 = vpop.xlane.xlu0 %1160 }
 0x735   :  { %3321 = vrsqrt.f32 %v1164_v61  ;;  %v1163_v63 = vmul.f32 0.03125, %v1161_v62 }
 0x737   :  { %v1165_v0 = vadd.f32 1e-05, %v1163_v63 }
 0x739   :  { %3323 = vrsqrt.f32 %v1165_v0 }
 0x73f   :  { %v3322_v2 = vpop.eup %3321 }
 0x740   :  { %v1168_v5 = vmul.f32 %v3322_v2, %v1152_v51  ;;  %v2832_v2 = vld [vmem:[%s4116_s2 + $0x1] ss:$0 sm:$0xff]  ;;  %s4142_s2 = smov 64  }
 0x742   :  { %v1177_v8 = vmul.f32 %v2813_v6, %v1168_v5 }
 0x743   :  { %v3324_v7 = vpop.eup %3323 }
 0x744   :  { %v1169_v9 = vmul.f32 %v3324_v7, %v1153_v53  ;;  %v1186_v12 = vadd.f32 %v2814_v10, %v1177_v8 }
 0x746   :  { %v1178_v11 = vmul.f32 %v2813_v6, %v1169_v9 }
 0x748   :  { %v1187_v13 = vadd.f32 %v2814_v10, %v1178_v11 }
 0x74a   :  { %v1188_v15 = vpack.c.bf16 %v1187_v13, %v1186_v12 }
 0x74c   :  { %3104 = vmatmul.mubr.msk.bf16.vlgmr.msra.gmra.mrb[32].mxu0 %vm78_vm1, %v1188_v15 }
 0x74d   :  { %3123 = vmatprep.mubr.msk.bf16.mxu0 %vm3398_vm0, %v3397_v1  ;;  %3120 = vmatpush3.bf16.msra.mxu0 %v3279_v49 }
 0x74e   :  { %3121 = vmatprep.subr.bf16.mxu0 %v3397_v1 }
 0x751   :  { %3122 = vmatpush3.bf16.msra.mxu0 %v3280_v50 }
 0x752   :  { %3127 = vmatprep.subr.bf16.mxu0 %v3397_v1 }
 0x81f   :  { %v1249_v19 = vpop.f32.mrb[32].mxu0 }
 0x820   :  { %v1250_v20 = vadd.f32 %v2815_v18, %v1249_v19  ;;  %v3105_v21 = vpop.f32.mrb[33].mxu0 }
 0x821   :  { %v1252_v22 = vpop.f32.mrb[34].mxu0 }
 0x822   :  { %v1253_v23 = vadd.f32 %v2815_v18, %v1252_v22  ;;  %v3106_v24 = vpop.f32.mrb[35].mxu0  ;;  %v1256_v25 = vmax.f32 %v1250_v20, 0.0 }
 0x824   :  { %v1257_v26 = vmax.f32 %v1253_v23, 0.0 }
 0x826   :  { %v1258_v27 = vpack.c.bf16 %v1257_v26, %v1256_v25 }
 0x828   :  { %3116 = vmatmul.mubr.msk.bf16.vlgmr.msra.gmra.mrb[40].mxu1 %vm1298_vm8, %v1258_v27 }
 0x829   :  { %3135 = vmatprep.mubr.msk.bf16.mxu1 %vm3398_vm0, %v3397_v1 }
 0x8fb   :  { %v1336_v29 = vpop.f32.mrb[40].mxu1 }
 0x8fc   :  { %v1337_v30 = vadd.f32 %v2819_v28, %v1336_v29  ;;  %v3117_v31 = vpop.f32.mrb[41].mxu1 }
 0x8fd   :  { %v1339_v32 = vpop.f32.mrb[42].mxu1 }
 0x8fe   :  { %v1340_v33 = vadd.f32 %v2819_v28, %v1339_v32  ;;  %v3118_v34 = vpop.f32.mrb[43].mxu1  ;;  %v1343_v35 = vadd.f32 %v1337_v30, %v1186_v12 }
 0x900   :  { %v1345_v36 = vsel %vm78_vm1, %v1343_v35, 0.0  ;;  %v1344_v37 = vadd.f32 %v1340_v33, %v1187_v13 }
 0x901   :  { %1346 = vadd.xlane.f32.xlu1 %v1345_v36 }
 0x902   :  { %v1348_v38 = vsel %vm78_vm1, %v1344_v37, 0.0 }
 0x903   :  { %1349 = vadd.xlane.f32.xlu0 %v1348_v38 }
 0x98e   :  { %v1347_v39 = vpop.xlane.xlu1 %1346 }
 0x98f   :  { %v1351_v40 = vmul.f32 0.03125, %v1347_v39 }
 0x990   :  { %v1350_v41 = vpop.xlane.xlu0 %1349 }
 0x991   :  { %v1353_v42 = vsub.f32 %v1343_v35, %v1351_v40  ;;  %v1352_v43 = vmul.f32 0.03125, %v1350_v41 }
 0x993   :  { %v1354_v44 = vsub.f32 %v1344_v37, %v1352_v43  ;;  %v1355_v45 = vmul.f32 %v1353_v42, %v1353_v42 }
 0x995   :  { %v1357_v46 = vsel %vm78_vm1, %v1355_v45, 0.0  ;;  %v1356_v47 = vmul.f32 %v1354_v44, %v1354_v44 }
 0x996   :  { %1358 = vadd.xlane.f32.xlu1 %v1357_v46 }
 0x997   :  { %v1360_v48 = vsel %vm78_vm1, %v1356_v47, 0.0 }
 0x998   :  { %1361 = vadd.xlane.f32.xlu0 %v1360_v48 }
 0xa23   :  { %v1359_v51 = vpop.xlane.xlu1 %1358 }
 0xa24   :  { %v1363_v52 = vmul.f32 0.03125, %v1359_v51 }
 0xa25   :  { %v1362_v53 = vpop.xlane.xlu0 %1361 }
 0xa26   :  { %v1365_v54 = vadd.f32 1e-05, %v1363_v52  ;;  %v1364_v14 = vmul.f32 0.03125, %v1362_v53 }
 0xa28   :  { %3325 = vrsqrt.f32 %v1365_v54  ;;  %v1366_v55 = vadd.f32 1e-05, %v1364_v14 }
 0xa2a   :  { %3327 = vrsqrt.f32 %v1366_v55 }
 0xa32   :  { %v3326_v3 = vpop.eup %3325 }
 0xa33   :  { %v1369_v56 = vmul.f32 %v3326_v3, %v1353_v42 }
 0xa34   :  { %v3328_v57 = vpop.eup %3327 }
 0xa35   :  { %v1378_v59 = vmul.f32 %v2825_v4, %v1369_v56  ;;  %v1370_v58 = vmul.f32 %v3328_v57, %v1354_v44 }
 0xa37   :  { %v1379_v61 = vmul.f32 %v2825_v4, %v1370_v58  ;;  %v3813_v62 = vadd.f32 %v2826_v60, %v1378_v59 }
 0xa39   :  { %v3815_v63 = vadd.f32 %v2826_v60, %v1379_v61 }
 0xa3b   :  { %v1389_v0 = vpack.c.bf16 %v3815_v63, %v3813_v62 }
 0xa3d   :  { %3124 = vmatmul.mubr.msk.bf16.vlgmr.msra.gmra.mrb[36].mxu0 %vm78_vm1, %v1389_v0 }
 0xa3e   :  { %3129 = vmatprep.mubr.msk.bf16.mxu0 %vm3398_vm0, %v3397_v1 }
 0xb10   :  { %v1452_v5 = vpop.f32.mrb[36].mxu0 }
 0xb11   :  { %v1453_v6 = vadd.f32 %v2832_v2, %v1452_v5  ;;  %v3125_v7 = vpop.f32.mrb[37].mxu0 }
 0xb12   :  { %v1455_v8 = vpop.f32.mrb[38].mxu0 }
 0xb13   :  { %1459 = vst.msk [vmem:[#allocation2] sm:$0xff] %vm123_vm2, %v1453_v6  ;;  %v1456_v9 = vadd.f32 %v2832_v2, %v1455_v8  ;;  %v3126_v10 = vpop.f32.mrb[39].mxu0 }
 0xb15   :  { %1460 = vst.msk [vmem:[#allocation2 + $0x8] sm:$0xff] %vm123_vm2, %v1456_v9 }
 0xb1a   :  { %v1574_v11 = vld [vmem:[#allocation2] sm:$0xff] }
 0xb1b   :  { %v3827_v12 = vpack.c.bf16 %v1574_v11, %v1574_v11 }
 0xb1c   :  { %v2044_v13 = vld [vmem:[#allocation2 + $0x8] sm:$0xff] }
 0xb1d   :  { %1579 = vrot.lane.b32.xlu0 %v3827_v12, %s3402_s30  ;;  %1464 = vrot.lane.b32.xlu1 %v3827_v12, %s3400_s28  ;;  %v3841_v15 = vpack.c.bf16 %v2044_v13, %v2044_v13 }
 0xb21   :  { %1696 = vrot.lane.b32.xlu0 %v3827_v12, %s3404_s17  ;;  %1577 = vrot.lane.b32.xlu1 %v3827_v12, %s3399_s27 }
 0xb25   :  { %1815 = vrot.lane.b32.xlu0 %v3827_v12, %s3405_s18  ;;  %1698 = vrot.lane.b32.xlu1 %v3827_v12, %s3401_s29 }
 0xb29   :  { %1817 = vrot.lane.b32.xlu1 %v3827_v12, %s3403_s16  ;;  %2049 = vrot.lane.b32.xlu0 %v3841_v15, %s3402_s30  ;;  %s4146_s30 = smov 16  }
 0xb2d   :  { %2168 = vrot.lane.b32.xlu0 %v3841_v15, %s3401_s29  ;;  %1934 = vrot.lane.b32.xlu1 %v3841_v15, %s3400_s28  ;;  %s4144_s28 = smov 40   ;;  %s4145_s29 = smov 8  }
 0xb31   :  { %2287 = vrot.lane.b32.xlu0 %v3841_v15, %s3403_s16  ;;  %2047 = vrot.lane.b32.xlu1 %v3841_v15, %s3399_s27  ;;  %s4143_s27 = smov 48   ;;  %s4147_s16 = smov 24  }
 0xb35   :  { %2166 = vrot.lane.b32.xlu1 %v3841_v15, %s3404_s17 }
 0xb39   :  { %2285 = vrot.lane.b32.xlu1 %v3841_v15, %s3405_s18 }
 0xb8f   :  { %v1465_v17 = vpop.permute.xlu1 %1464  ;;  %v1580_v18 = vpop.permute.xlu0 %1579 }
 0xb90   :  { %v1470_v16 = vsel %vm131_vm3, %v1465_v17, 0  ;;  %v1585_v20 = vsel %vm131_vm3, %v1580_v18, 0 }
 0xb91   :  { %3128 = vmatpush3.bf16.xpose.msra.mxu0 %v1470_v16 }
 0xb92   :  { %3139 = vmatprep.subr.bf16.mxu0 %v3397_v1 }
 0xb93   :  { %v1578_v19 = vpop.permute.xlu1 %1577  ;;  %v1697_v24 = vpop.permute.xlu0 %1696 }
 0xb97   :  { %v1699_v21 = vpop.permute.xlu1 %1698  ;;  %v1816_v27 = vpop.permute.xlu0 %1815 }
 0xb98   :  { %3130 = vmatmul.mubr.msk.bf16.vlgmr.msra.gmra.mrb[40].mxu0 %vm131_vm3, %v3827_v12  ;;  %v1704_v22 = vsel %vm131_vm3, %v1699_v21, 0 }
 0xb99   :  { %3140 = vmatpush3.bf16.xpose.msra.mxu0 %v1585_v20  ;;  %3141 = vmatprep.mubr.msk.bf16.mxu0 %vm3398_vm0, %v3397_v1 }
 0xb9a   :  { %3151 = vmatprep.subr.bf16.mxu0 %v3397_v1 }
 0xb9b   :  { %v1818_v23 = vpop.permute.xlu1 %1817  ;;  %v2050_v29 = vpop.permute.xlu0 %2049 }
 0xb9c   :  { %v1823_v25 = vsel %vm131_vm3, %v1818_v23, 0  ;;  %v2055_v30 = vsel %vm131_vm3, %v2050_v29, 0 }
 0xb9f   :  { %v1935_v26 = vpop.permute.xlu1 %1934  ;;  %v2169_v31 = vpop.permute.xlu0 %2168 }
 0xba0   :  { %3142 = vmatmul.mubr.msk.bf16.vlgmr.msra.gmra.mrb[44].mxu0 %vm131_vm3, %v1578_v19  ;;  %v1940_v28 = vsel %vm131_vm3, %v1935_v26, 0  ;;  %v2174_v33 = vsel %vm131_vm3, %v2169_v31, 0 }
 0xba1   :  { %3152 = vmatpush3.bf16.xpose.msra.mxu0 %v1704_v22  ;;  %3153 = vmatprep.mubr.msk.bf16.mxu0 %vm3398_vm0, %v3397_v1 }
 0xba2   :  { %3163 = vmatprep.subr.bf16.mxu0 %v3397_v1 }
 0xba3   :  { %v2048_v32 = vpop.permute.xlu1 %2047  ;;  %v2288_v34 = vpop.permute.xlu0 %2287 }
 0xba4   :  { %v2293_v36 = vsel %vm131_vm3, %v2288_v34, 0 }
 0xba7   :  { %v2167_v35 = vpop.permute.xlu1 %2166 }
 0xba8   :  { %3154 = vmatmul.mubr.msk.bf16.vlgmr.msra.gmra.mrb[48].mxu0 %vm131_vm3, %v1697_v24 }
 0xba9   :  { %3164 = vmatpush3.bf16.xpose.msra.mxu0 %v1823_v25  ;;  %3165 = vmatprep.mubr.msk.bf16.mxu0 %vm3398_vm0, %v3397_v1 }
 0xbaa   :  { %3175 = vmatprep.subr.bf16.mxu0 %v3397_v1 }
 0xbab   :  { %v2286_v37 = vpop.permute.xlu1 %2285 }
 0xbb0   :  { %3166 = vmatmul.mubr.msk.bf16.vlgmr.msra.gmra.mrb[52].mxu0 %vm131_vm3, %v1816_v27 }
 0xbb1   :  { %3176 = vmatpush3.bf16.xpose.msra.mxu0 %v1940_v28  ;;  %3177 = vmatprep.mubr.msk.bf16.mxu0 %vm3398_vm0, %v3397_v1 }
 0xbb2   :  { %3187 = vmatprep.subr.bf16.mxu0 %v3397_v1 }
 0xbb8   :  { %3178 = vmatmul.mubr.msk.bf16.vlgmr.msra.gmra.mrb[56].mxu0 %vm131_vm3, %v3841_v15 }
 0xbb9   :  { %3188 = vmatpush3.bf16.xpose.msra.mxu0 %v2055_v30  ;;  %3189 = vmatprep.mubr.msk.bf16.mxu0 %vm3398_vm0, %v3397_v1 }
 0xbba   :  { %3199 = vmatprep.subr.bf16.mxu0 %v3397_v1 }
 0xbc0   :  { %3190 = vmatmul.mubr.msk.bf16.vlgmr.msra.gmra.mrb[60].mxu0 %vm131_vm3, %v2048_v32 }
 0xbc1   :  { %3200 = vmatpush3.bf16.xpose.msra.mxu0 %v2174_v33  ;;  %3201 = vmatprep.mubr.msk.bf16.mxu0 %vm3398_vm0, %v3397_v1 }
 0xbc2   :  { %3211 = vmatprep.subr.bf16.mxu0 %v3397_v1 }
 0xbc8   :  { %3202 = vmatmul.mubr.msk.bf16.vlgmr.msra.gmra.mrb[64].mxu0 %vm131_vm3, %v2167_v35 }
 0xbc9   :  { %3212 = vmatpush3.bf16.xpose.msra.mxu0 %v2293_v36  ;;  %3213 = vmatprep.mubr.msk.bf16.mxu0 %vm3398_vm0, %v3397_v1 }
 0xbca   :  { %3223 = vmatprep.subr.bf16.mxu0 %v3397_v1 }
 0xbd0   :  { %3214 = vmatmul.mubr.msk.bf16.vlgmr.msra.gmra.mrb[68].mxu0 %vm131_vm3, %v2286_v37 }
 0xbd1   :  { %3227 = vmatprep.mubr.msk.bf16.mxu0 %vm3398_vm0, %v3397_v1 }
 0xc6b   :  { %v1506_v38 = vpop.f32.mrb[40].mxu0 }
 0xc6c   :  { %v1512_v39 = vmul.f32 0.35355338, %v1506_v38  ;;  %v3131_v40 = vpop.f32.mrb[41].mxu0 }
 0xc6d   :  { %v1509_v41 = vpop.f32.mrb[42].mxu0 }
 0xc6e   :  { %v3132_v42 = vpop.f32.mrb[43].mxu0  ;;  %v1513_v43 = vsel %vm131_vm3, %v1512_v39, -inf }
 0xc6f   :  { %1514 = vmax.xlane.f32.xlu0 %v1513_v43 }
 0xc73   :  { %v1621_v44 = vpop.f32.mrb[44].mxu0 }
 0xc74   :  { %v1627_v45 = vmul.f32 0.35355338, %v1621_v44  ;;  %v3143_v46 = vpop.f32.mrb[45].mxu0 }
 0xc75   :  { %v1624_v47 = vpop.f32.mrb[46].mxu0 }
 0xc76   :  { %v3144_v48 = vpop.f32.mrb[47].mxu0  ;;  %v1628_v49 = vsel %vm131_vm3, %v1627_v45, -inf }
 0xc77   :  { %1629 = vmax.xlane.f32.xlu1 %v1628_v49 }
 0xc7b   :  { %v1740_v50 = vpop.f32.mrb[48].mxu0 }
 0xc7c   :  { %v1746_v51 = vmul.f32 0.35355338, %v1740_v50  ;;  %v3155_v52 = vpop.f32.mrb[49].mxu0 }
 0xc7d   :  { %v1743_v53 = vpop.f32.mrb[50].mxu0 }
 0xc7e   :  { %v3156_v54 = vpop.f32.mrb[51].mxu0  ;;  %v1747_v14 = vsel %vm131_vm3, %v1746_v51, -inf }
 0xc7f   :  { %1748 = vmax.xlane.f32.xlu0 %v1747_v14 }
 0xc83   :  { %v1859_v55 = vpop.f32.mrb[52].mxu0 }
 0xc84   :  { %v3904_v3 = vmul.f32 0.35355338, %v1859_v55  ;;  %v3167_v4 = vpop.f32.mrb[53].mxu0 }
 0xc85   :  { %v1862_v56 = vpop.f32.mrb[54].mxu0 }
 0xc86   :  { %v3168_v57 = vpop.f32.mrb[55].mxu0  ;;  %v1866_v59 = vsel %vm131_vm3, %v3904_v3, -inf }
 0xc87   :  { %1867 = vmax.xlane.f32.xlu0 %v1866_v59 }
 0xc8b   :  { %v1976_v58 = vpop.f32.mrb[56].mxu0 }
 0xc8c   :  { %v3908_v60 = vmul.f32 0.35355338, %v1976_v58  ;;  %v3179_v61 = vpop.f32.mrb[57].mxu0 }
 0xc8d   :  { %v1979_v0 = vpop.f32.mrb[58].mxu0 }
 0xc8e   :  { %v3180_v2 = vpop.f32.mrb[59].mxu0  ;;  %v1983_v5 = vsel %vm131_vm3, %v3908_v60, -inf }
 0xc8f   :  { %1984 = vmax.xlane.f32.xlu1 %v1983_v5 }
 0xc93   :  { %v2091_v6 = vpop.f32.mrb[60].mxu0 }
 0xc94   :  { %v2097_v7 = vmul.f32 0.35355338, %v2091_v6  ;;  %v3191_v8 = vpop.f32.mrb[61].mxu0 }
 0xc95   :  { %v2094_v9 = vpop.f32.mrb[62].mxu0 }
 0xc96   :  { %v3192_v10 = vpop.f32.mrb[63].mxu0  ;;  %v2098_v11 = vsel %vm131_vm3, %v2097_v7, -inf }
 0xc97   :  { %2099 = vmax.xlane.f32.xlu0 %v2098_v11 }
 0xc9b   :  { %v2210_v13 = vpop.f32.mrb[64].mxu0 }
 0xc9c   :  { %v2216_v17 = vmul.f32 0.35355338, %v2210_v13  ;;  %v3203_v16 = vpop.f32.mrb[65].mxu0 }
 0xc9d   :  { %v2213_v18 = vpop.f32.mrb[66].mxu0 }
 0xc9e   :  { %v3204_v19 = vpop.f32.mrb[67].mxu0  ;;  %v2217_v20 = vsel %vm131_vm3, %v2216_v17, -inf }
 0xc9f   :  { %2218 = vmax.xlane.f32.xlu1 %v2217_v20 }
 0xca3   :  { %v2329_v21 = vpop.f32.mrb[68].mxu0 }
 0xca4   :  { %v3215_v22 = vpop.f32.mrb[69].mxu0  ;;  %v2335_v25 = vmul.f32 0.35355338, %v2329_v21 }
 0xca5   :  { %v2332_v23 = vpop.f32.mrb[70].mxu0 }
 0xca6   :  { %v3216_v24 = vpop.f32.mrb[71].mxu0  ;;  %v2336_v26 = vsel %vm131_vm3, %v2335_v25, -inf }
 0xcad   :  { %1640 = vrot.lane.b32.xlu0 %v3827_v12, %s3406_s19 }
 0xcb0   :  { %1525 = vrot.lane.b32.xlu1 %v3827_v12, %s4142_s2 }
 0xccc   :  { %2337 = vmax.xlane.f32.xlu0 %v2336_v26 }
 0xcfc   :  { %v1515_v27 = vpop.xlane.xlu0 %1514 }
 0xcfd   :  { %v1516_v28 = vsub.f32 %v1512_v39, %v1515_v27 }
 0xcff   :  { %v1517_v29 = vmul.f32 1.442695, %v1516_v28 }
 0xd01   :  { %3329 = vpow2.f32 %v1517_v29 }
 0xd04   :  { %v1630_v30 = vpop.xlane.xlu1 %1629 }
 0xd05   :  { %v1631_v31 = vsub.f32 %v1627_v45, %v1630_v30 }
 0xd07   :  { %v1632_v32 = vmul.f32 1.442695, %v1631_v31 }
 0xd09   :  { %3331 = vpow2.f32 %v1632_v32 }
 0xd0b   :  { %v3919_v33 = vpop.eup %3329 }
 0xd0c   :  { %v1749_v34 = vpop.xlane.xlu0 %1748  ;;  %v1519_v35 = vsel %vm131_vm3, %v3919_v33, 0.0 }
 0xd0d   :  { %v1750_v36 = vsub.f32 %v1746_v51, %v1749_v34  ;;  %1520 = vadd.xlane.f32.xlu1 %v1519_v35 }
 0xd0f   :  { %v1751_v37 = vmul.f32 1.442695, %v1750_v36 }
 0xd11   :  { %3333 = vpow2.f32 %v1751_v37 }
 0xd13   :  { %v3923_v38 = vpop.eup %3331 }
 0xd14   :  { %v1634_v39 = vsel %vm131_vm3, %v3923_v38, 0.0  ;;  %v1868_v45 = vpop.xlane.xlu0 %1867 }
 0xd15   :  { %1635 = vadd.xlane.f32.xlu0 %v1634_v39  ;;  %v1869_v47 = vsub.f32 %v3904_v3, %v1868_v45 }
 0xd17   :  { %v1870_v48 = vmul.f32 1.442695, %v1869_v47 }
 0xd19   :  { %3335 = vpow2.f32 %v1870_v48 }
 0xd1b   :  { %v3927_v40 = vpop.eup %3333 }
 0xd1c   :  { %v1753_v41 = vsel %vm131_vm3, %v3927_v40, 0.0  ;;  %v1985_v42 = vpop.xlane.xlu1 %1984 }
 0xd1d   :  { %1754 = vadd.xlane.f32.xlu1 %v1753_v41  ;;  %v1986_v49 = vsub.f32 %v3908_v60, %v1985_v42 }
 0xd1f   :  { %v1987_v52 = vmul.f32 1.442695, %v1986_v49 }
 0xd21   :  { %3337 = vpow2.f32 %v1987_v52 }
 0xd23   :  { %v3336_v14 = vpop.eup %3335 }
 0xd24   :  { %v2100_v50 = vpop.xlane.xlu0 %2099  ;;  %v1872_v55 = vsel %vm131_vm3, %v3336_v14, 0.0 }
 0xd25   :  { %v2101_v51 = vsub.f32 %v2097_v7, %v2100_v50 }
 0xd27   :  { %v2102_v54 = vmul.f32 1.442695, %v2101_v51 }
 0xd28   :  { %v1641_v60 = vpop.permute.xlu0 %1640 }
 0xd29   :  { %3339 = vpow2.f32 %v2102_v54  ;;  %v1646_v13 = vsel %vm196_vm4, %v1641_v60, 0 }
 0xd2b   :  { %1759 = vrot.lane.b32.xlu0 %v3827_v12, %s4143_s27  ;;  %v3940_v4 = vpop.eup %3337 }
 0xd2c   :  { %v2219_v43 = vpop.xlane.xlu1 %2218  ;;  %v1989_v56 = vsel %vm131_vm3, %v3940_v4, 0.0 }
 0xd2d   :  { %v2220_v53 = vsub.f32 %v2216_v17, %v2219_v43 }
 0xd2e   :  { %1878 = vrot.lane.b32.xlu1 %v3827_v12, %s4144_s28 }
 0xd2f   :  { %v2221_v12 = vmul.f32 1.442695, %v2220_v53 }
 0xd30   :  { %v1526_v44 = vpop.permute.xlu1 %1525 }
 0xd31   :  { %v1531_v46 = vsel %vm196_vm4, %v1526_v44, 0  ;;  %3341 = vpow2.f32 %v2221_v12 }
 0xd32   :  { %3134 = vmatpush3.bf16.msra.mxu1 %v1531_v46 }
 0xd33   :  { %3145 = vmatprep.subr.bf16.mxu1 %v3397_v1  ;;  %v3942_v3 = vpop.eup %3339 }
 0xd34   :  { %v2104_v59 = vsel %vm131_vm3, %v3942_v3, 0.0 }
 0xd3b   :  { %v3946_v57 = vpop.eup %3341 }
 0xd3c   :  { %v2223_v58 = vsel %vm131_vm3, %v3946_v57, 0.0 }
 0xd4a   :  { %1873 = vadd.xlane.f32.xlu0 %v1872_v55 }
 0xd4e   :  { %1990 = vadd.xlane.f32.xlu0 %v1989_v56 }
 0xd52   :  { %2105 = vadd.xlane.f32.xlu1 %v2104_v59  ;;  %2224 = vadd.xlane.f32.xlu0 %v2223_v58 }
 0xd59   :  { %v2338_v61 = vpop.xlane.xlu0 %2337 }
 0xd5a   :  { %v2339_v0 = vsub.f32 %v2335_v25, %v2338_v61 }
 0xd5c   :  { %v2340_v2 = vmul.f32 1.442695, %v2339_v0 }
 0xd5e   :  { %3343 = vpow2.f32 %v2340_v2 }
 0xd63   :  { %2110 = vrot.lane.b32.xlu1 %v3841_v15, %s3406_s19 }
 0xd67   :  { %2229 = vrot.lane.b32.xlu1 %v3841_v15, %s4143_s27 }
 0xd68   :  { %v3956_v5 = vpop.eup %3343 }
 0xd69   :  { %v2342_v6 = vsel %vm131_vm3, %v3956_v5, 0.0 }
 0xd6a   :  { %2343 = vadd.xlane.f32.xlu0 %v2342_v6 }
 0xd6b   :  { %2348 = vrot.lane.b32.xlu1 %v3841_v15, %s4144_s28 }
 0xd80   :  { %1995 = vrot.lane.b32.xlu0 %v3841_v15, %s4142_s2 }
 0xd9a   :  { %v1521_v7 = vpop.xlane.xlu1 %1520 }
 0xd9b   :  { %3345 = vrcp.f32 %v1521_v7 }
 0xda2   :  { %v1636_v8 = vpop.xlane.xlu0 %1635 }
 0xda3   :  { %3347 = vrcp.f32 %v1636_v8 }
 0xda5   :  { %v3346_v9 = vpop.eup %3345 }
 0xda6   :  { %v1523_v10 = vmul.f32 %v3346_v9, %v3919_v33  ;;  %v1760_v18 = vpop.permute.xlu0 %1759 }
 0xda7   :  { %v1765_v20 = vsel %vm196_vm4, %v1760_v18, 0  ;;  %v3282_v18 = vld [vmem:[%s4117_s3 + $0x18] sm:$0xff]  }
 0xda8   :  { %v1524_v11 = vpack.c.bf16 %v1523_v10, %v1523_v10 }
 0xdaa   :  { %3136 = vmatmul.mubr.msk.bf16.vlgmr.msra.gmra.mrb[44].mxu1 %vm131_vm3, %v1524_v11  ;;  %v1755_v17 = vpop.xlane.xlu1 %1754 }
 0xdab   :  { %3146 = vmatpush3.bf16.msra.mxu1 %v1646_v13  ;;  %3349 = vrcp.f32 %v1755_v17  ;;  %3147 = vmatprep.mubr.msk.bf16.mxu1 %vm3398_vm0, %v3397_v1 }
 0xdac   :  { %3157 = vmatprep.subr.bf16.mxu1 %v3397_v1 }
 0xdad   :  { %v3348_v15 = vpop.eup %3347 }
 0xdae   :  { %v1638_v16 = vmul.f32 %v3348_v15, %v3923_v38  ;;  %v1879_v23 = vpop.permute.xlu1 %1878 }
 0xdaf   :  { %v1884_v25 = vsel %vm196_vm4, %v1879_v23, 0 }
 0xdb0   :  { %v1639_v19 = vpack.c.bf16 %v1638_v16, %v1638_v16  ;;  %v3281_v16 = vld [vmem:[%s4117_s3 + $0x10] sm:$0xff]  }
 0xdb1   :  { %3224 = vmatpush3.bf16.msra.mxu0 %v3281_v16  ;;  %v2870_v16 = vld [vmem:[%s4122_s8 + $0x1] ss:$0 sm:$0xff] }
 0xdb2   :  { %3148 = vmatmul.mubr.msk.bf16.vlgmr.msra.gmra.mrb[48].mxu1 %vm131_vm3, %v1639_v19  ;;  %3225 = vmatprep.subr.bf16.mxu0 %v3397_v1 }
 0xdb3   :  { %3158 = vmatpush3.bf16.msra.mxu1 %v1765_v20  ;;  %3159 = vmatprep.mubr.msk.bf16.mxu1 %vm3398_vm0, %v3397_v1 }
 0xdb4   :  { %3169 = vmatprep.subr.bf16.mxu1 %v3397_v1 }
 0xdb5   :  { %v3350_v21 = vpop.eup %3349  ;;  %3226 = vmatpush3.bf16.msra.mxu0 %v3282_v18 }
 0xdb6   :  { %v1757_v22 = vmul.f32 %v3350_v21, %v3927_v40  ;;  %3239 = vmatprep.subr.bf16.mxu0 %v3397_v1 }
 0xdb8   :  { %v1758_v24 = vpack.c.bf16 %v1757_v22, %v1757_v22 }
 0xdba   :  { %3160 = vmatmul.mubr.msk.bf16.vlgmr.msra.gmra.mrb[52].mxu1 %vm131_vm3, %v1758_v24 }
 0xdbb   :  { %3170 = vmatpush3.bf16.msra.mxu1 %v1884_v25  ;;  %3171 = vmatprep.mubr.msk.bf16.mxu1 %vm3398_vm0, %v3397_v1 }
 0xdbc   :  { %3181 = vmatprep.subr.bf16.mxu1 %v3397_v1 }
 0xdd7   :  { %v1874_v26 = vpop.xlane.xlu0 %1873 }
 0xdd8   :  { %3351 = vrcp.f32 %v1874_v26 }
 0xddb   :  { %v1991_v30 = vpop.xlane.xlu0 %1990 }
 0xddc   :  { %3353 = vrcp.f32 %v1991_v30 }
 0xddf   :  { %v2106_v31 = vpop.xlane.xlu1 %2105  ;;  %v2225_v32 = vpop.xlane.xlu0 %2224 }
 0xde0   :  { %3355 = vrcp.f32 %v2106_v31 }
 0xde1   :  { %3357 = vrcp.f32 %v2225_v32 }
 0xde2   :  { %v3352_v27 = vpop.eup %3351 }
 0xde3   :  { %v1876_v28 = vmul.f32 %v3352_v27, %v3336_v14  ;;  %v2111_v38 = vpop.permute.xlu1 %2110 }
 0xde4   :  { %v2116_v41 = vsel %vm196_vm4, %v2111_v38, 0 }
 0xde5   :  { %v1877_v29 = vpack.c.bf16 %v1876_v28, %v1876_v28 }
 0xde6   :  { %v3354_v33 = vpop.eup %3353 }
 0xde7   :  { %3172 = vmatmul.mubr.msk.bf16.vlgmr.msra.gmra.mrb[56].mxu1 %vm131_vm3, %v1877_v29  ;;  %v1993_v35 = vmul.f32 %v3354_v33, %v3940_v4  ;;  %v2230_v43 = vpop.permute.xlu1 %2229 }
 0xde8   :  { %3183 = vmatprep.mubr.msk.bf16.mxu1 %vm3398_vm0, %v3397_v1  ;;  %v2235_v46 = vsel %vm196_vm4, %v2230_v43, 0 }
 0xde9   :  { %v1994_v39 = vpack.c.bf16 %v1993_v35, %v1993_v35 }
 0xdea   :  { %v3356_v40 = vpop.eup %3355 }
 0xdeb   :  { %v2108_v42 = vmul.f32 %v3356_v40, %v3942_v3  ;;  %v3358_v45 = vpop.eup %3357  ;;  %v2349_v48 = vpop.permute.xlu1 %2348 }
 0xdec   :  { %v2227_v47 = vmul.f32 %v3358_v45, %v3946_v57  ;;  %v2354_v51 = vsel %vm196_vm4, %v2349_v48, 0 }
 0xded   :  { %v2109_v44 = vpack.c.bf16 %v2108_v42, %v2108_v42 }
 0xdee   :  { %v2228_v49 = vpack.c.bf16 %v2227_v47, %v2227_v47 }
 0xdf7   :  { %v2344_v34 = vpop.xlane.xlu0 %2343 }
 0xdf8   :  { %3359 = vrcp.f32 %v2344_v34 }
 0xdfb   :  { %v1996_v36 = vpop.permute.xlu0 %1995 }
 0xdfc   :  { %v2001_v37 = vsel %vm196_vm4, %v1996_v36, 0  ;;  %v2857_v36 = vld [vmem:[%s4118_s4 + $0x1] ss:$0 sm:$0xff] }
 0xdfd   :  { %3182 = vmatpush3.bf16.msra.mxu1 %v2001_v37 }
 0xdfe   :  { %3193 = vmatprep.subr.bf16.mxu1 %v3397_v1 }
 0xe00   :  { %3184 = vmatmul.mubr.msk.bf16.vlgmr.msra.gmra.mrb[60].mxu1 %vm131_vm3, %v1994_v39 }
 0xe01   :  { %3194 = vmatpush3.bf16.msra.mxu1 %v2116_v41  ;;  %3195 = vmatprep.mubr.msk.bf16.mxu1 %vm3398_vm0, %v3397_v1 }
 0xe02   :  { %3205 = vmatprep.subr.bf16.mxu1 %v3397_v1  ;;  %v3360_v50 = vpop.eup %3359 }
 0xe03   :  { %v2346_v52 = vmul.f32 %v3360_v50, %v3956_v5 }
 0xe05   :  { %v2347_v53 = vpack.c.bf16 %v2346_v52, %v2346_v52 }
 0xe08   :  { %3196 = vmatmul.mubr.msk.bf16.vlgmr.msra.gmra.mrb[64].mxu1 %vm131_vm3, %v2109_v44 }
 0xe09   :  { %3206 = vmatpush3.bf16.msra.mxu1 %v2235_v46  ;;  %3207 = vmatprep.mubr.msk.bf16.mxu1 %vm3398_vm0, %v3397_v1 }
 0xe0a   :  { %3217 = vmatprep.subr.bf16.mxu1 %v3397_v1 }
 0xe10   :  { %3208 = vmatmul.mubr.msk.bf16.vlgmr.msra.gmra.mrb[68].mxu1 %vm131_vm3, %v2228_v49 }
 0xe11   :  { %3218 = vmatpush3.bf16.msra.mxu1 %v2354_v51  ;;  %3219 = vmatprep.mubr.msk.bf16.mxu1 %vm3398_vm0, %v3397_v1 }
 0xe12   :  { %3231 = vmatprep.subr.bf16.mxu1 %v3397_v1 }
 0xe18   :  { %3220 = vmatmul.mubr.msk.bf16.vlgmr.msra.gmra.mrb[72].mxu1 %vm131_vm3, %v2347_v53 }
 0xe19   :  { %3235 = vmatprep.mubr.msk.bf16.mxu1 %vm3398_vm0, %v3397_v1 }
 0xe7d   :  { %v1567_v54 = vpop.f32.mrb[44].mxu1 }
 0xe7e   :  { %1573 = vst.msk [vmem:[#allocation3] sm:$0xff] %vm131_vm3, %v1567_v54  ;;  %v3137_v12 = vpop.f32.mrb[45].mxu1 }
 0xe7f   :  { %v1570_v14 = vpop.f32.mrb[46].mxu1 }
 0xe80   :  { %v3138_v55 = vpop.f32.mrb[47].mxu1  ;;  %v3284_v14 = vld [vmem:[%s4121_s7 + $0x18] sm:$0xff]  }
 0xe81   :  { %v3285_v55 = vld [vmem:[%s4123_s9 + $0x20] sm:$0xff]  }
 0xe85   :  { %v1682_v4 = vpop.f32.mrb[48].mxu1 }
 0xe86   :  { %1689 = vrot.lane.b32.xlu1 %v1682_v4, %s4145_s29  ;;  %v3149_v3 = vpop.f32.mrb[49].mxu1  ;;  %v3286_v4 = vld [vmem:[%s4123_s9 + $0x28] sm:$0xff]  }
 0xe87   :  { %v1685_v56 = vpop.f32.mrb[50].mxu1 }
 0xe88   :  { %v3150_v57 = vpop.f32.mrb[51].mxu1 }
 0xe8d   :  { %v1801_v59 = vpop.f32.mrb[52].mxu1 }
 0xe8e   :  { %1808 = vrot.lane.b32.xlu0 %v1801_v59, %s4146_s30  ;;  %v3161_v58 = vpop.f32.mrb[53].mxu1 }
 0xe8f   :  { %v1804_v60 = vpop.f32.mrb[54].mxu1 }
 0xe90   :  { %v3162_v61 = vpop.f32.mrb[55].mxu1 }
 0xeba   :  { %v1920_v0 = vpop.f32.mrb[56].mxu1 }
 0xebb   :  { %1927 = vrot.lane.b32.xlu0 %v1920_v0, %s4147_s16  ;;  %v3173_v2 = vpop.f32.mrb[57].mxu1 }
 0xebc   :  { %v1923_v5 = vpop.f32.mrb[58].mxu1  ;;  %v2862_v2 = vld [vmem:[%s4119_s5 + $0x1] ss:$0 sm:$0xff] }
 0xebd   :  { %v3174_v6 = vpop.f32.mrb[59].mxu1 }
 0xed3   :  { %v2037_v7 = vpop.f32.mrb[60].mxu1 }
 0xed4   :  { %2043 = vst.msk [vmem:[#allocation3 + $0x8] sm:$0xff] %vm131_vm3, %v2037_v7  ;;  %v3185_v8 = vpop.f32.mrb[61].mxu1 }
 0xed5   :  { %v2040_v9 = vpop.f32.mrb[62].mxu1  ;;  %v2864_v8 = vld [vmem:[%s4120_s6 + $0x1] ss:$0 sm:$0xff] }
 0xed6   :  { %v3186_v10 = vpop.f32.mrb[63].mxu1 }
 0xedb   :  { %v2152_v11 = vpop.f32.mrb[64].mxu1 }
 0xedc   :  { %2159 = vrot.lane.b32.xlu1 %v2152_v11, %s4145_s29  ;;  %v3197_v13 = vpop.f32.mrb[65].mxu1 }
 0xedd   :  { %v2155_v17 = vpop.f32.mrb[66].mxu1 }
 0xede   :  { %v3198_v15 = vpop.f32.mrb[67].mxu1  ;;  %v3287_v17 = vld [vmem:[%s4123_s9 + $0x30] sm:$0xff]  }
 0xedf   :  { %v3288_v15 = vld [vmem:[%s4123_s9 + $0x38] sm:$0xff]  }
 0xee3   :  { %v2271_v19 = vpop.f32.mrb[68].mxu1 }
 0xee4   :  { %2278 = vrot.lane.b32.xlu1 %v2271_v19, %s4146_s30  ;;  %v3209_v20 = vpop.f32.mrb[69].mxu1 }
 0xee5   :  { %v2274_v21 = vpop.f32.mrb[70].mxu1 }
 0xee6   :  { %v3210_v22 = vpop.f32.mrb[71].mxu1 }
 0xeeb   :  { %v2390_v23 = vpop.f32.mrb[72].mxu1 }
 0xeec   :  { %2397 = vrot.lane.b32.xlu1 %v2390_v23, %s4147_s16  ;;  %v3221_v24 = vpop.f32.mrb[73].mxu1 }
 0xeed   :  { %v2393_v25 = vpop.f32.mrb[74].mxu1 }
 0xeee   :  { %v3222_v26 = vpop.f32.mrb[75].mxu1 }
 0xef8   :  { %v1690_v27 = vpop.permute.xlu1 %1689 }
 0xef9   :  { %1692 = vst.msk [vmem:[#allocation3] sm:$0xff] %vm359_vm5, %v1690_v27 }
 0xf00   :  { %v1809_v28 = vpop.permute.xlu0 %1808 }
 0xf01   :  { %1811 = vst.msk [vmem:[#allocation3] sm:$0xff] %vm479_vm6, %v1809_v28 }
 0xf2d   :  { %v1928_v29 = vpop.permute.xlu0 %1927 }
 0xf2e   :  { %1930 = vst.msk [vmem:[#allocation3] sm:$0xff] %vm599_vm7, %v1928_v29 }
 0xf35   :  { %v2401_v33 = vld [vmem:[#allocation3] sm:$0xff] }
 0xf4e   :  { %v2160_v30 = vpop.permute.xlu1 %2159 }
 0xf4f   :  { %2162 = vst.msk [vmem:[#allocation3 + $0x8] sm:$0xff] %vm359_vm5, %v2160_v30 }
 0xf56   :  { %v2279_v31 = vpop.permute.xlu1 %2278 }
 0xf57   :  { %2281 = vst.msk [vmem:[#allocation3 + $0x8] sm:$0xff] %vm479_vm6, %v2279_v31 }
 0xf5e   :  { %v2398_v32 = vpop.permute.xlu1 %2397 }
 0xf5f   :  { %2400 = vst.msk [vmem:[#allocation3 + $0x8] sm:$0xff] %vm599_vm7, %v2398_v32 }
 0xf66   :  { %v2402_v34 = vld [vmem:[#allocation3 + $0x8] sm:$0xff] }
 0xf67   :  { %v2403_v35 = vpack.c.bf16 %v2402_v34, %v2401_v33 }
 0xf69   :  { %3228 = vmatmul.mubr.msk.bf16.vlgmr.msra.gmra.mrb[72].mxu0 %vm78_vm1, %v2403_v35 }
 0xf6a   :  { %3247 = vmatprep.mubr.msk.bf16.mxu0 %vm3398_vm0, %v3397_v1  ;;  %3240 = vmatpush3.bf16.msra.mxu0 %v3285_v55 }
 0xf6b   :  { %3241 = vmatprep.subr.bf16.mxu0 %v3397_v1 }
 0xf6e   :  { %3242 = vmatpush3.bf16.msra.mxu0 %v3286_v4 }
 0xf6f   :  { %3243 = vmatprep.subr.bf16.mxu0 %v3397_v1 }
 0xf72   :  { %3244 = vmatpush3.bf16.msra.mxu0 %v3287_v17 }
 0xf73   :  { %3245 = vmatprep.subr.bf16.mxu0 %v3397_v1 }
 0xf76   :  { %3246 = vmatpush3.bf16.msra.mxu0 %v3288_v15 }
0x103c   :  { %v2466_v37 = vpop.f32.mrb[72].mxu0 }
0x103d   :  { %v2467_v38 = vadd.f32 %v2857_v36, %v2466_v37  ;;  %v3229_v39 = vpop.f32.mrb[73].mxu0 }
0x103e   :  { %v2469_v40 = vpop.f32.mrb[74].mxu0 }
0x103f   :  { %v2470_v41 = vadd.f32 %v2857_v36, %v2469_v40  ;;  %v3230_v42 = vpop.f32.mrb[75].mxu0  ;;  %v2473_v43 = vadd.f32 %v2467_v38, %v3813_v62 }
0x1041   :  { %v2475_v44 = vsel %vm78_vm1, %v2473_v43, 0.0  ;;  %v2474_v45 = vadd.f32 %v2470_v41, %v3815_v63  ;;  %v3283_v63 = vld [vmem:[%s4121_s7 + $0x10] sm:$0xff]  }
0x1042   :  { %2476 = vadd.xlane.f32.xlu0 %v2475_v44  ;;  %3232 = vmatpush3.bf16.msra.mxu1 %v3283_v63  ;;  %v2892_v63 = vld [vmem:[%s4126_s12 + $0x1] ss:$0 sm:$0xff] }
0x1043   :  { %v2478_v46 = vsel %vm78_vm1, %v2474_v45, 0.0  ;;  %3233 = vmatprep.subr.bf16.mxu1 %v3397_v1  ;;  %v2883_v1 = vld [vmem:[%s4124_s10 + $0x1] ss:$0 sm:$0xff] }
0x1044   :  { %2479 = vadd.xlane.f32.xlu1 %v2478_v46 }
0x1046   :  { %3234 = vmatpush3.bf16.msra.mxu1 %v3284_v14 }
0x10cf   :  { %v2477_v47 = vpop.xlane.xlu0 %2476 }
0x10d0   :  { %v2481_v48 = vmul.f32 0.03125, %v2477_v47 }
0x10d1   :  { %v2480_v49 = vpop.xlane.xlu1 %2479 }
0x10d2   :  { %v2483_v50 = vsub.f32 %v2473_v43, %v2481_v48  ;;  %v2482_v51 = vmul.f32 0.03125, %v2480_v49 }
0x10d4   :  { %v2484_v52 = vsub.f32 %v2474_v45, %v2482_v51  ;;  %v2485_v53 = vmul.f32 %v2483_v50, %v2483_v50 }
0x10d6   :  { %v2487_v54 = vsel %vm78_vm1, %v2485_v53, 0.0  ;;  %v2486_v12 = vmul.f32 %v2484_v52, %v2484_v52 }
0x10d7   :  { %2488 = vadd.xlane.f32.xlu0 %v2487_v54  ;;  %v2890_v54 = vld [vmem:[%s4125_s11 + $0x1] ss:$0 sm:$0xff] }
0x10d8   :  { %v2490_v62 = vsel %vm78_vm1, %v2486_v12, 0.0 }
0x10db   :  { %2491 = vadd.xlane.f32.xlu0 %v2490_v62 }
0x1164   :  { %v2489_v3 = vpop.xlane.xlu0 %2488 }
0x1165   :  { %v2493_v56 = vmul.f32 0.03125, %v2489_v3 }
0x1167   :  { %v2495_v57 = vadd.f32 1e-05, %v2493_v56 }
0x1168   :  { %v2492_v59 = vpop.xlane.xlu0 %2491 }
0x1169   :  { %3361 = vrsqrt.f32 %v2495_v57  ;;  %v2494_v58 = vmul.f32 0.03125, %v2492_v59 }
0x116b   :  { %v2496_v60 = vadd.f32 1e-05, %v2494_v58 }
0x116d   :  { %3363 = vrsqrt.f32 %v2496_v60 }
0x1173   :  { %v3362_v61 = vpop.eup %3361 }
0x1174   :  { %v2499_v0 = vmul.f32 %v3362_v61, %v2483_v50 }
0x1176   :  { %v2509_v6 = vmul.f32 %v2862_v2, %v2499_v0 }
0x1177   :  { %v3364_v5 = vpop.eup %3363 }
0x1178   :  { %v2500_v7 = vmul.f32 %v3364_v5, %v2484_v52  ;;  %v2519_v10 = vadd.f32 %v2864_v8, %v2509_v6 }
0x117a   :  { %v2510_v9 = vmul.f32 %v2862_v2, %v2500_v7 }
0x117c   :  { %v2520_v11 = vadd.f32 %v2864_v8, %v2510_v9 }
0x117e   :  { %v2521_v13 = vpack.c.bf16 %v2520_v11, %v2519_v10 }
0x1180   :  { %3236 = vmatmul.mubr.msk.bf16.vlgmr.msra.gmra.mrb[76].mxu1 %vm78_vm1, %v2521_v13 }
0x1253   :  { %v2584_v18 = vpop.f32.mrb[76].mxu1 }
0x1254   :  { %v2585_v19 = vadd.f32 %v2870_v16, %v2584_v18  ;;  %v3237_v20 = vpop.f32.mrb[77].mxu1 }
0x1255   :  { %v2587_v21 = vpop.f32.mrb[78].mxu1 }
0x1256   :  { %v2588_v22 = vadd.f32 %v2870_v16, %v2587_v21  ;;  %v3238_v23 = vpop.f32.mrb[79].mxu1  ;;  %v2591_v24 = vmax.f32 %v2585_v19, 0.0  ;;  %v2893_v19 = vld [vmem:[%s4127_s13] ss:$0 sm:$0xff] }
0x1258   :  { %v2592_v25 = vmax.f32 %v2588_v22, 0.0  ;;  %v2894_v22 = vld [vmem:[%s4128_s14] ss:$0 sm:$0xff] }
0x125a   :  { %v2593_v26 = vpack.c.bf16 %v2592_v25, %v2591_v24 }
0x125c   :  { %3248 = vmatmul.mubr.msk.bf16.vlgmr.msra.gmra.mrb[76].mxu0 %vm1298_vm8, %v2593_v26 }
0x132f   :  { %v2672_v27 = vpop.f32.mrb[76].mxu0 }
0x1330   :  { %v2673_v28 = vadd.f32 %v2883_v1, %v2672_v27  ;;  %v3249_v29 = vpop.f32.mrb[77].mxu0 }
0x1331   :  { %v2675_v30 = vpop.f32.mrb[78].mxu0 }
0x1332   :  { %v2679_v31 = vadd.f32 %v2673_v28, %v2519_v10  ;;  %v2676_v32 = vadd.f32 %v2883_v1, %v2675_v30  ;;  %v3250_v33 = vpop.f32.mrb[79].mxu0 }
0x1334   :  { %v2680_v34 = vadd.f32 %v2676_v32, %v2520_v11  ;;  %v2681_v35 = vsel %vm78_vm1, %v2679_v31, 0.0 }
0x1335   :  { %2682 = vadd.xlane.f32.xlu1 %v2681_v35 }
0x1336   :  { %v2684_v36 = vsel %vm78_vm1, %v2680_v34, 0.0 }
0x1337   :  { %2685 = vadd.xlane.f32.xlu0 %v2684_v36 }
0x13c2   :  { %v2683_v37 = vpop.xlane.xlu1 %2682 }
0x13c3   :  { %v2687_v38 = vmul.f32 0.03125, %v2683_v37 }
0x13c4   :  { %v2686_v39 = vpop.xlane.xlu0 %2685 }
0x13c5   :  { %v2689_v40 = vsub.f32 %v2679_v31, %v2687_v38  ;;  %v2688_v41 = vmul.f32 0.03125, %v2686_v39 }
0x13c7   :  { %v2690_v42 = vsub.f32 %v2680_v34, %v2688_v41  ;;  %v2691_v43 = vmul.f32 %v2689_v40, %v2689_v40 }
0x13c9   :  { %v2693_v44 = vsel %vm78_vm1, %v2691_v43, 0.0  ;;  %v2692_v45 = vmul.f32 %v2690_v42, %v2690_v42 }
0x13ca   :  { %2694 = vadd.xlane.f32.xlu1 %v2693_v44 }
0x13cb   :  { %v2696_v46 = vsel %vm78_vm1, %v2692_v45, 0.0 }
0x13cc   :  { %2697 = vadd.xlane.f32.xlu0 %v2696_v46 }
0x1457   :  { %v2695_v47 = vpop.xlane.xlu1 %2694 }
0x1458   :  { %v2699_v48 = vmul.f32 0.03125, %v2695_v47 }
0x1459   :  { %v2698_v49 = vpop.xlane.xlu0 %2697 }
0x145a   :  { %v2701_v50 = vadd.f32 1e-05, %v2699_v48  ;;  %v2700_v51 = vmul.f32 0.03125, %v2698_v49 }
0x145c   :  { %3365 = vrsqrt.f32 %v2701_v50  ;;  %v2702_v52 = vadd.f32 1e-05, %v2700_v51 }
0x145e   :  { %3367 = vrsqrt.f32 %v2702_v52 }
0x1466   :  { %v3366_v53 = vpop.eup %3365 }
0x1467   :  { %v2705_v12 = vmul.f32 %v3366_v53, %v2689_v40 }
0x1468   :  { %v3368_v62 = vpop.eup %3367 }
0x1469   :  { %v2715_v14 = vmul.f32 %v2890_v54, %v2705_v12  ;;  %v2706_v55 = vmul.f32 %v3368_v62, %v2690_v42 }
0x146b   :  { %v2725_v4 = vadd.f32 %v2892_v63, %v2715_v14  ;;  %v2716_v3 = vmul.f32 %v2890_v54, %v2706_v55 }
0x146d   :  { %v2727_v56 = vsel %vm78_vm1, %v2725_v4, 0.0  ;;  %v2726_v57 = vadd.f32 %v2892_v63, %v2716_v3 }
0x146e   :  { %2728 = vadd.xlane.f32.xlu1 %v2727_v56 }
0x146f   :  { %v2730_v59 = vsel %vm78_vm1, %v2726_v57, 0.0 }
0x1470   :  { %2731 = vadd.xlane.f32.xlu0 %v2730_v59 }
0x14fb   :  { %v2729_v58 = vpop.xlane.xlu1 %2728 }
0x14fc   :  { %v2733_v60 = vmul.f32 0.03125, %v2729_v58 }
0x14fd   :  { %v2732_v61 = vpop.xlane.xlu0 %2731 }
0x14fe   :  { %v2735_v0 = vsub.f32 %v2725_v4, %v2733_v60  ;;  %v2734_v2 = vmul.f32 0.03125, %v2732_v61 }
0x1500   :  { %v2736_v5 = vsub.f32 %v2726_v57, %v2734_v2  ;;  %v2737_v6 = vmul.f32 %v2735_v0, %v2735_v0 }
0x1502   :  { %v2739_v7 = vsel %vm78_vm1, %v2737_v6, 0.0  ;;  %v2738_v8 = vmul.f32 %v2736_v5, %v2736_v5 }
0x1503   :  { %2740 = vadd.xlane.f32.xlu1 %v2739_v7 }
0x1504   :  { %v2742_v9 = vsel %vm78_vm1, %v2738_v8, 0.0 }
0x1505   :  { %2743 = vadd.xlane.f32.xlu0 %v2742_v9 }
0x1590   :  { %v2741_v10 = vpop.xlane.xlu1 %2740 }
0x1591   :  { %v2745_v11 = vmul.f32 0.03125, %v2741_v10 }
0x1592   :  { %v2744_v13 = vpop.xlane.xlu0 %2743 }
0x1593   :  { %v2747_v17 = vadd.f32 1e-05, %v2745_v11  ;;  %v2746_v15 = vmul.f32 0.03125, %v2744_v13 }
0x1595   :  { %3369 = vrsqrt.f32 %v2747_v17  ;;  %v2748_v16 = vadd.f32 1e-05, %v2746_v15 }
0x1597   :  { %3371 = vrsqrt.f32 %v2748_v16 }
0x159f   :  { %v3370_v18 = vpop.eup %3369 }
0x15a0   :  { %v2751_v20 = vmul.f32 %v3370_v18, %v2735_v0 }
0x15a1   :  { %v3372_v21 = vpop.eup %3371 }
0x15a2   :  { %v2752_v23 = vmul.f32 %v3372_v21, %v2736_v5  ;;  %v2760_v24 = vmul.f32 %v2893_v19, %v2751_v20 }
0x15a4   :  { %v2761_v25 = vmul.f32 %v2893_v19, %v2752_v23  ;;  %v2769_v26 = vadd.f32 %v2894_v22, %v2760_v24 }
0x15a6   :  { %v2770_v1 = vadd.f32 %v2894_v22, %v2761_v25  ;;  %2771 = vst.msk [vmem:[#allocation4] sm:$0xff] %vm78_vm1, %v2769_v26 }
0x15a8   :  { %2772 = vst.msk [vmem:[#allocation4 + $0x8] sm:$0xff] %vm78_vm1, %v2770_v1 }
0x15a9   :  { %3384 = shalt.err (!%p3381_p4)
}
0x15aa   :  { %s3385_s1 = scalar_lea.hbm %s4129_s15, 256 }
0x15ab   :  { %p3386_p5 = scmp.ne.s32.totalorder %s4129_s15, %s3385_s1  ;;  %p3389_p6 = scmp.lt.u32.totalorder %s3385_s1, %s4129_s15 }
0x15ad   :  { %p3391_p7 = pnand %p3389_p6, %p3386_p5 }
0x15af   :  { %3394 = shalt.err (!%p3391_p7)
}
0x15b0   :  { %s3414_s2 = smov 128  }
0x15b1   :  { %2784 = dma.vmem_to_hbm [thread:$0]  %s2779_s24, 256, %s4129_s15, [#allocation5], %s3414_s2, %s3414_s2, %s4145_s29  }
0x15b2   :  { %3395 = dma.done.wait [#allocation5], 256  }
0x15b3   :  { %3396 = vsyncadd [#allocation5], 4294967040 }
0x15b4   :  { %2788 = vsyncpa [#allocation5], 1 }

</bundles_post_ra>
